<compile_context>
chip_gen: v7x
topology: tpu7x:2x2x1
jax: 0.10.0
libtpu: 0.0.40
codegen_flags: <defaults>
</compile_context>

<pallas_src>
import jax
import jax.numpy as jnp
from jax.experimental import pallas as pl
from jax.experimental.pallas import tpu as pltpu

NEG_SLOPE = 0.01      # PyTorch nn.LeakyReLU default
BN_EPS = 1e-5
CIN_PAD = 8           # raw input channels padded 4 -> 8 (full-dim last block dim)
C_PAD = 128           # conv channels padded 120 -> 128 (lane-dense)
F_PAD = 640           # MLP features padded 600 -> 640 (= 5 * 128)
MAX_NB = 256          # batch tile (sweep 128-256; keep grid >= 2 on v7x at large N)


def _round_up(a, b):
    return (a + b - 1) // b * b


# -----------------------------------------------------------------------------
# Fused kernel: [Conv+BN+LeakyReLU+MaxPool] x3  ->  Linear+BN+LeakyReLU+Linear
# -----------------------------------------------------------------------------
def _cnn3_kernel(x_ref, w0_ref, s0_ref, w1_ref, s1_ref, w2_ref, s2_ref,
                 wfc1_ref, sfc1_ref, wfc2_ref, bfc2_ref, o_ref):
    """Whole network for one batch tile.

    Layouts (nb = batch tile, multiple of 8 so all reshapes are tile-aligned):
      x_ref   : (H+2, nb, 8)    bf16, zero rows at 0 and H+1 (conv padding=1)
      w*_ref  : (3, Cin, 128)   bf16 conv taps (BN scale folded in)
      s*_ref  : (1, 128)        f32 per-channel shift = (bias-mean)*scale+beta
      wfc1_ref: (5, 128, 640)   bf16 Linear(600,600), BN folded, (h,c,out) order
      sfc1_ref: (1, 640)        f32 folded BN1d shift
      wfc2_ref: (640, 128)      bf16 Linear(600,1) weights in column 0
      bfc2_ref: (1, 128)        f32 Linear(600,1) bias in column 0
      o_ref   : (nb, 128)       f32 output block (result in lane 0), lane-dense
    """
    _, nb, _ = x_ref.shape

    def conv_bn_lrelu_pool(xpad3, w_ref, s_ref):
        # xpad3: (hh+2, nb, cin) bf16, rows 0 and hh+1 are zero (conv padding=1).
        hh = xpad3.shape[0] - 2
        cin = xpad3.shape[2]
        cout = w_ref.shape[2]
        xp2d = xpad3.reshape((hh + 2) * nb, cin)      # free collapse (nb % 8 == 0)
        # kernel-size-3 conv = 3 accumulating 2-D MXU matmuls; tap t reads the
        # sublane-aligned window [t*nb, t*nb + hh*nb) of the padded slab.
        acc = jnp.dot(xp2d[0:hh * nb], w_ref[0],
                      preferred_element_type=jnp.float32)
        acc = acc + jnp.dot(xp2d[nb:(hh + 1) * nb], w_ref[1],
                            preferred_element_type=jnp.float32)
        acc = acc + jnp.dot(xp2d[2 * nb:(hh + 2) * nb], w_ref[2],
                            preferred_element_type=jnp.float32)
        y = acc + s_ref[...]                          # folded conv bias + BN (f32)
        y = jnp.where(y >= 0, y, NEG_SLOPE * y)       # LeakyReLU (f32, VPU)
        # MaxPool2d((2,1),(2,1)) along H: adjacent h rows are nb flattened rows
        # apart, so pooling is a tile-aligned split + element-wise max.
        y3 = y.reshape(hh // 2, 2 * nb, cout)
        return jnp.maximum(y3[:, :nb, :], y3[:, nb:, :])   # (hh//2, nb, cout)

    def pad_h(p3):
        # Add the next conv's zero-padding rows; cast once to bf16 for the MXU.
        zrow = jnp.zeros((1,) + p3.shape[1:], jnp.bfloat16)
        return jnp.concatenate([zrow, p3.astype(jnp.bfloat16), zrow], axis=0)

    p0 = conv_bn_lrelu_pool(x_ref[...], w0_ref, s0_ref)       # (H/2, nb, 128)
    p1 = conv_bn_lrelu_pool(pad_h(p0), w1_ref, s1_ref)        # (H/4, nb, 128)
    p2 = conv_bn_lrelu_pool(pad_h(p1), w2_ref, s2_ref)        # (H/8, nb, 128)
    p2 = p2.astype(jnp.bfloat16)

    # Linear(600,600) + BN1d + LeakyReLU as 5 accumulating K=128 matmuls (M=nb).
    # wfc1 rows were permuted offline from PyTorch's (C,H) flatten order, so no
    # in-kernel transpose / lane-concat of the features is needed.
    hf = p2.shape[0]                                           # = 5
    hid = jnp.dot(p2[0], wfc1_ref[0], preferred_element_type=jnp.float32)
    for t in range(1, hf):
        hid = hid + jnp.dot(p2[t], wfc1_ref[t],
                            preferred_element_type=jnp.float32)
    hid = hid + sfc1_ref[...]
    hid = jnp.where(hid >= 0, hid, NEG_SLOPE * hid)            # (nb, 640) f32

    # Linear(600,1) padded to (640,128) so the output store is lane-dense; the
    # real result lands in lane 0, the other 127 lanes are zeros.
    out = jnp.dot(hid.astype(jnp.bfloat16), wfc2_ref[...],
                  preferred_element_type=jnp.float32) + bfc2_ref[...]
    o_ref[...] = out                                           # (nb, 128)


# -----------------------------------------------------------------------------
# Wrapper
# -----------------------------------------------------------------------------
def cnn3_forward(x_nchw, prep):
    """x_nchw: (N, 4, 40, 1) like PyTorch.  prep: output of prepare_params()."""
    n, cin, h, w = x_nchw.shape
    assert w == 1 and h % 8 == 0 and (h // 8) * 120 == 600, "CNN_3 expects (N,4,40,1)"

    # One-time layout plumbing (tiny, fused by XLA): NCHW -> (H, N, C) so that
    # inside the kernel the batch maps to sublanes (matmul M) and channels to
    # lanes.  H gets the conv's zero padding; channels pad 4 -> 8 only (small
    # input DMA); batch pads to a multiple of the tile (dummy rows sliced off).
    nb = min(MAX_NB, _round_up(n, 8))             # batch tile, multiple of 8
    n_pad = _round_up(n, nb)
    x = jnp.transpose(x_nchw[..., 0], (2, 0, 1)).astype(jnp.bfloat16)   # (H, N, 4)
    x = jnp.pad(x, ((1, 1), (0, n_pad - n), (0, CIN_PAD - cin)))        # (H+2, n_pad, 8)

    grid = (n_pad // nb,)

    out = pl.pallas_call(
        _cnn3_kernel,
        out_shape=jax.ShapeDtypeStruct((n_pad, C_PAD), jnp.float32),
        grid_spec=pltpu.PrefetchScalarGridSpec(
            num_scalar_prefetch=0,
            grid=grid,
            in_specs=[
                pl.BlockSpec((h + 2, nb, CIN_PAD), lambda i: (0, i, 0)),    # x
                pl.BlockSpec((3, CIN_PAD, C_PAD), lambda i: (0, 0, 0)),     # w0
                pl.BlockSpec((1, C_PAD), lambda i: (0, 0)),                 # s0
                pl.BlockSpec((3, C_PAD, C_PAD), lambda i: (0, 0, 0)),       # w1
                pl.BlockSpec((1, C_PAD), lambda i: (0, 0)),                 # s1
                pl.BlockSpec((3, C_PAD, C_PAD), lambda i: (0, 0, 0)),       # w2
                pl.BlockSpec((1, C_PAD), lambda i: (0, 0)),                 # s2
                pl.BlockSpec((5, C_PAD, F_PAD), lambda i: (0, 0, 0)),       # wfc1
                pl.BlockSpec((1, F_PAD), lambda i: (0, 0)),                 # sfc1
                pl.BlockSpec((F_PAD, C_PAD), lambda i: (0, 0)),             # wfc2
                pl.BlockSpec((1, C_PAD), lambda i: (0, 0)),                 # bfc2
            ],
            out_specs=pl.BlockSpec((nb, C_PAD), lambda i: (i, 0)),
        ),
        compiler_params=pltpu.CompilerParams(
            dimension_semantics=("parallel",),
            vmem_limit_bytes=48 * 1024 * 1024),
    )(x, prep["w0"], prep["s0"], prep["w1"], prep["s1"], prep["w2"],
      prep["s2"], prep["wfc1"], prep["sfc1"], prep["wfc2"], prep["bfc2"])

    return out[:n, 0:1]


# -----------------------------------------------------------------------------
# Parameter preparation (done once, offline): BN folding, padding, dtype cast,
# and the (C,H) -> (H,C) reorganization of the first Linear.
# -----------------------------------------------------------------------------
def prepare_params(params):
    prep = {}
    cin_pads = (CIN_PAD, C_PAD, C_PAD)
    for i in range(3):
        p = params["conv%d" % i]
        w = p["w"].astype(jnp.float32)                       # (3, cin, cout)
        scale = p["gamma"] / jnp.sqrt(p["var"] + BN_EPS)     # (cout,)
        shift = (p["b"] - p["mean"]) * scale + p["beta"]     # (cout,)
        w = w * scale[None, None, :]                         # fold BN scale
        k, cin, cout = w.shape
        w = jnp.pad(w, ((0, 0), (0, cin_pads[i] - cin), (0, C_PAD - cout)))
        prep["w%d" % i] = w.astype(jnp.bfloat16)             # (3, cin_pad, 128)
        prep["s%d" % i] = jnp.pad(shift, (0, C_PAD - cout)).reshape(1, C_PAD)

    m = params["mlp"]
    scale1 = m["gamma"] / jnp.sqrt(m["var"] + BN_EPS)        # (600,)
    shift1 = (m["b1"] - m["mean"]) * scale1 + m["beta"]      # (600,)
    w1 = m["w1"].astype(jnp.float32) * scale1[None, :]       # (in=600, out=600)
    c_real = 120
    hf = w1.shape[0] // c_real                               # = 5
    # PyTorch flatten index f = c*hf + h  ->  kernel uses (h, c) indexing.
    w1 = w1.reshape(c_real, hf, 600)                         # [c, h, out]
    w1 = jnp.transpose(w1, (1, 0, 2))                        # [h, c, out]
    w1 = jnp.pad(w1, ((0, 0), (0, C_PAD - c_real), (0, F_PAD - 600)))
    prep["wfc1"] = w1.astype(jnp.bfloat16)                   # (5, 128, 640)
    prep["sfc1"] = jnp.pad(shift1, (0, F_PAD - 600)).reshape(1, F_PAD)
    w2 = jnp.pad(m["w2"][:, 0].astype(jnp.float32), (0, F_PAD - 600))   # (640,)
    prep["wfc2"] = jnp.zeros((F_PAD, C_PAD), jnp.float32).at[:, 0].set(w2).astype(jnp.bfloat16)
    prep["bfc2"] = jnp.pad(m["b2"].astype(jnp.float32), (0, C_PAD - 1)).reshape(1, C_PAD)
    return prep


# -----------------------------------------------------------------------------
# Deterministic synthetic parameters (shapes match the PyTorch module).
# Note: a real PyTorch Conv2d weight (cout, cin, k, 1) maps to w[k, cin, cout];
# a real nn.Linear weight (out, in) maps to w1/w2 = weight.T.
# -----------------------------------------------------------------------------
def init_params(key):
    ks = jax.random.split(key, 8)

    def conv_params(k, cin, cout):
        fan_in = cin * 3
        w = jax.random.normal(k, (3, cin, cout), jnp.float32) / jnp.sqrt(fan_in)
        b = jnp.zeros((cout,), jnp.float32) + 0.01
        return dict(w=w, b=b,
                    gamma=jnp.ones((cout,), jnp.float32),
                    beta=jnp.zeros((cout,), jnp.float32),
                    mean=jnp.zeros((cout,), jnp.float32),
                    var=jnp.ones((cout,), jnp.float32))

    return {
        "conv0": conv_params(ks[0], 4, 120),
        "conv1": conv_params(ks[1], 120, 120),
        "conv2": conv_params(ks[2], 120, 120),
        "mlp": dict(
            w1=jax.random.normal(ks[3], (600, 600), jnp.float32) / jnp.sqrt(600.0),
            b1=jnp.zeros((600,), jnp.float32) + 0.01,
            gamma=jnp.ones((600,), jnp.float32),
            beta=jnp.zeros((600,), jnp.float32),
            mean=jnp.zeros((600,), jnp.float32),
            var=jnp.ones((600,), jnp.float32),
            w2=jax.random.normal(ks[4], (600, 1), jnp.float32) / jnp.sqrt(600.0),
            b2=jnp.zeros((1,), jnp.float32),
        ),
    }


# -----------------------------------------------------------------------------
# Pure-JAX f32 reference (eval-mode semantics of the PyTorch module).
# -----------------------------------------------------------------------------
def _reference_forward(x_nchw, params):
    n = x_nchw.shape[0]
    x = jnp.transpose(x_nchw[..., 0], (0, 2, 1))             # (N, H, C)
    for i in range(3):
        p = params["conv%d" % i]
        h = x.shape[1]
        xp = jnp.pad(x, ((0, 0), (1, 1), (0, 0)))
        y = (jnp.einsum("nhc,cd->nhd", xp[:, 0:h], p["w"][0]) +
             jnp.einsum("nhc,cd->nhd", xp[:, 1:h + 1], p["w"][1]) +
             jnp.einsum("nhc,cd->nhd", xp[:, 2:h + 2], p["w"][2]) + p["b"])
        scale = p["gamma"] / jnp.sqrt(p["var"] + BN_EPS)
        y = (y - p["mean"]) * scale + p["beta"]
        y = jnp.where(y >= 0, y, NEG_SLOPE * y)
        y = jnp.max(y.reshape(n, h // 2, 2, y.shape[-1]), axis=2)
        x = y                                                 # Dropout: identity (eval)
    feat = jnp.transpose(x, (0, 2, 1)).reshape(n, -1)         # (N, 600), (C,H) order
    m = params["mlp"]
    h1 = feat @ m["w1"] + m["b1"]
    scale1 = m["gamma"] / jnp.sqrt(m["var"] + BN_EPS)
    h1 = (h1 - m["mean"]) * scale1 + m["beta"]
    h1 = jnp.where(h1 >= 0, h1, NEG_SLOPE * h1)
    return h1 @ m["w2"] + m["b2"]


if __name__ == "__main__":
    key = jax.random.PRNGKey(0)
    pkey, xkey = jax.random.split(key)
    params = init_params(pkey)
    prep = prepare_params(params)

    # Input consistent with the module: (N, 4, 40, 1).  After three MaxPool(2,1)
    # stages H: 40 -> 20 -> 10 -> 5, so the flatten is 120 * 5 * 1 = 600.
    x = jax.random.normal(xkey, (2, 4, 40, 1), jnp.float32)

    fwd = jax.jit(cnn3_forward)
    out = fwd(x, prep)
    jax.block_until_ready(out)
    assert out.shape == (2, 1) and out.dtype == jnp.float32

    ref = _reference_forward(x, params)
    max_err = float(jnp.max(jnp.abs(out - ref)))
    # bf16 MXU operands vs. the f32 reference give ~1e-2-scale absolute error at
    # these O(1) activation magnitudes; accumulation is in f32.
    assert max_err < 3e-2, "kernel/reference mismatch: %g" % max_err

    print("KERNEL_OK")
</pallas_src>

<mosaic_0001>
module attributes {stable_mosaic.version = 11 : i64} {
  func.func @_cnn3_kernel(%arg0: i32, %arg1: memref<42x8x8xbf16, #tpu.memory_space<vmem>>, %arg2: memref<3x8x128xbf16, #tpu.memory_space<vmem>>, %arg3: memref<1x128xf32, #tpu.memory_space<vmem>>, %arg4: memref<3x128x128xbf16, #tpu.memory_space<vmem>>, %arg5: memref<1x128xf32, #tpu.memory_space<vmem>>, %arg6: memref<3x128x128xbf16, #tpu.memory_space<vmem>>, %arg7: memref<1x128xf32, #tpu.memory_space<vmem>>, %arg8: memref<5x128x640xbf16, #tpu.memory_space<vmem>>, %arg9: memref<1x640xf32, #tpu.memory_space<vmem>>, %arg10: memref<640x128xbf16, #tpu.memory_space<vmem>>, %arg11: memref<1x128xf32, #tpu.memory_space<vmem>>, %arg12: memref<8x128xf32, #tpu.memory_space<vmem>>) attributes {dimension_semantics = [#tpu.dimension_semantics<parallel>], iteration_bounds = array<i64: 1>, scalar_prefetch = 0 : i64, scratch_operands = 0 : i64, tpu.core_type = #tpu.core_type<tc>, window_params = [{transform_indices = @transform_0, window_bounds = array<i64: 42, 8, 8>}, {pipeline_mode = #tpu.pipeline_mode<synchronous>, transform_indices = @transform_1, window_bounds = array<i64: 3, 8, 128>}, {pipeline_mode = #tpu.pipeline_mode<synchronous>, transform_indices = @transform_2, window_bounds = array<i64: 1, 128>}, {pipeline_mode = #tpu.pipeline_mode<synchronous>, transform_indices = @transform_3, window_bounds = array<i64: 3, 128, 128>}, {pipeline_mode = #tpu.pipeline_mode<synchronous>, transform_indices = @transform_4, window_bounds = array<i64: 1, 128>}, {pipeline_mode = #tpu.pipeline_mode<synchronous>, transform_indices = @transform_5, window_bounds = array<i64: 3, 128, 128>}, {pipeline_mode = #tpu.pipeline_mode<synchronous>, transform_indices = @transform_6, window_bounds = array<i64: 1, 128>}, {pipeline_mode = #tpu.pipeline_mode<synchronous>, transform_indices = @transform_7, window_bounds = array<i64: 5, 128, 640>}, {pipeline_mode = #tpu.pipeline_mode<synchronous>, transform_indices = @transform_8, window_bounds = array<i64: 1, 640>}, {pipeline_mode = #tpu.pipeline_mode<synchronous>, transform_indices = @transform_9, window_bounds = array<i64: 640, 128>}, {pipeline_mode = #tpu.pipeline_mode<synchronous>, transform_indices = @transform_10, window_bounds = array<i64: 1, 128>}, {transform_indices = @transform_11, window_bounds = array<i64: 8, 128>}]} {
    %c0 = arith.constant 0 : index
    %c0_0 = arith.constant 0 : index
    %c0_1 = arith.constant 0 : index
    %0 = vector.load %arg1[%c0, %c0_0, %c0_1] : memref<42x8x8xbf16, #tpu.memory_space<vmem>>, vector<42x8x8xbf16>
    %1 = vector.shape_cast %0 : vector<42x8x8xbf16> to vector<336x8xbf16>
    %2 = vector.extract_strided_slice %1 {offsets = [0, 0], sizes = [320, 8], strides = [1, 1]} : vector<336x8xbf16> to vector<320x8xbf16>
    %c0_2 = arith.constant 0 : index
    %c0_3 = arith.constant 0 : index
    %c0_4 = arith.constant 0 : index
    %3 = vector.load %arg2[%c0_2, %c0_3, %c0_4] : memref<3x8x128xbf16, #tpu.memory_space<vmem>>, vector<1x8x128xbf16>
    %4 = vector.shape_cast %3 : vector<1x8x128xbf16> to vector<8x128xbf16>
    %cst = arith.constant dense<0.000000e+00> : vector<320x128xf32>
    %5 = tpu.matmul %2, %4, %cst {dimension_numbers = #tpu.dot_dimension_numbers<[1], [0], [0], [1], [0, 0, 1, 1], [], []>} : vector<320x8xbf16>, vector<8x128xbf16>, vector<320x128xf32> -> vector<320x128xf32>
    %6 = vector.extract_strided_slice %1 {offsets = [8, 0], sizes = [320, 8], strides = [1, 1]} : vector<336x8xbf16> to vector<320x8xbf16>
    %c1 = arith.constant 1 : index
    %c0_5 = arith.constant 0 : index
    %c0_6 = arith.constant 0 : index
    %7 = vector.load %arg2[%c1, %c0_5, %c0_6] : memref<3x8x128xbf16, #tpu.memory_space<vmem>>, vector<1x8x128xbf16>
    %8 = vector.shape_cast %7 : vector<1x8x128xbf16> to vector<8x128xbf16>
    %cst_7 = arith.constant dense<0.000000e+00> : vector<320x128xf32>
    %9 = tpu.matmul %6, %8, %cst_7 {dimension_numbers = #tpu.dot_dimension_numbers<[1], [0], [0], [1], [0, 0, 1, 1], [], []>} : vector<320x8xbf16>, vector<8x128xbf16>, vector<320x128xf32> -> vector<320x128xf32>
    %10 = arith.addf %5, %9 : vector<320x128xf32>
    %11 = vector.extract_strided_slice %1 {offsets = [16, 0], sizes = [320, 8], strides = [1, 1]} : vector<336x8xbf16> to vector<320x8xbf16>
    %c2 = arith.constant 2 : index
    %c0_8 = arith.constant 0 : index
    %c0_9 = arith.constant 0 : index
    %12 = vector.load %arg2[%c2, %c0_8, %c0_9] : memref<3x8x128xbf16, #tpu.memory_space<vmem>>, vector<1x8x128xbf16>
    %13 = vector.shape_cast %12 : vector<1x8x128xbf16> to vector<8x128xbf16>
    %cst_10 = arith.constant dense<0.000000e+00> : vector<320x128xf32>
    %14 = tpu.matmul %11, %13, %cst_10 {dimension_numbers = #tpu.dot_dimension_numbers<[1], [0], [0], [1], [0, 0, 1, 1], [], []>} : vector<320x8xbf16>, vector<8x128xbf16>, vector<320x128xf32> -> vector<320x128xf32>
    %15 = arith.addf %10, %14 : vector<320x128xf32>
    %c0_11 = arith.constant 0 : index
    %c0_12 = arith.constant 0 : index
    %16 = vector.load %arg3[%c0_11, %c0_12] : memref<1x128xf32, #tpu.memory_space<vmem>>, vector<1x128xf32>
    %17 = vector.broadcast %16 : vector<1x128xf32> to vector<320x128xf32>
    %18 = arith.addf %15, %17 : vector<320x128xf32>
    %cst_13 = arith.constant 0.000000e+00 : f32
    %19 = vector.broadcast %cst_13 : f32 to vector<320x128xf32>
    %20 = arith.cmpf oge, %18, %19 : vector<320x128xf32>
    %cst_14 = arith.constant 0.00999999977 : f32
    %21 = vector.broadcast %cst_14 : f32 to vector<320x128xf32>
    %22 = arith.mulf %21, %18 : vector<320x128xf32>
    %23 = arith.select %20, %18, %22 : vector<320x128xi1>, vector<320x128xf32>
    %24 = vector.shape_cast %23 : vector<320x128xf32> to vector<20x16x128xf32>
    %25 = vector.extract_strided_slice %24 {offsets = [0, 0, 0], sizes = [20, 8, 128], strides = [1, 1, 1]} : vector<20x16x128xf32> to vector<20x8x128xf32>
    %26 = vector.extract_strided_slice %24 {offsets = [0, 8, 0], sizes = [20, 8, 128], strides = [1, 1, 1]} : vector<20x16x128xf32> to vector<20x8x128xf32>
    %27 = arith.maximumf %25, %26 : vector<20x8x128xf32>
    %cst_15 = arith.constant 0.000000e+00 : bf16
    %28 = vector.broadcast %cst_15 : bf16 to vector<1x8x128xbf16>
    %29 = arith.truncf %27 : vector<20x8x128xf32> to vector<20x8x128xbf16>
    %30 = tpu.concatenate %28, %29, %28 in 0 : vector<1x8x128xbf16>, vector<20x8x128xbf16>, vector<1x8x128xbf16> -> vector<22x8x128xbf16>
    %31 = vector.shape_cast %30 : vector<22x8x128xbf16> to vector<176x128xbf16>
    %32 = vector.extract_strided_slice %31 {offsets = [0, 0], sizes = [160, 128], strides = [1, 1]} : vector<176x128xbf16> to vector<160x128xbf16>
    %c0_16 = arith.constant 0 : index
    %c0_17 = arith.constant 0 : index
    %c0_18 = arith.constant 0 : index
    %33 = vector.load %arg4[%c0_16, %c0_17, %c0_18] : memref<3x128x128xbf16, #tpu.memory_space<vmem>>, vector<1x128x128xbf16>
    %34 = vector.shape_cast %33 : vector<1x128x128xbf16> to vector<128x128xbf16>
    %cst_19 = arith.constant dense<0.000000e+00> : vector<160x128xf32>
    %35 = tpu.matmul %32, %34, %cst_19 {dimension_numbers = #tpu.dot_dimension_numbers<[1], [0], [0], [1], [0, 0, 1, 1], [], []>} : vector<160x128xbf16>, vector<128x128xbf16>, vector<160x128xf32> -> vector<160x128xf32>
    %36 = vector.extract_strided_slice %31 {offsets = [8, 0], sizes = [160, 128], strides = [1, 1]} : vector<176x128xbf16> to vector<160x128xbf16>
    %c1_20 = arith.constant 1 : index
    %c0_21 = arith.constant 0 : index
    %c0_22 = arith.constant 0 : index
    %37 = vector.load %arg4[%c1_20, %c0_21, %c0_22] : memref<3x128x128xbf16, #tpu.memory_space<vmem>>, vector<1x128x128xbf16>
    %38 = vector.shape_cast %37 : vector<1x128x128xbf16> to vector<128x128xbf16>
    %cst_23 = arith.constant dense<0.000000e+00> : vector<160x128xf32>
    %39 = tpu.matmul %36, %38, %cst_23 {dimension_numbers = #tpu.dot_dimension_numbers<[1], [0], [0], [1], [0, 0, 1, 1], [], []>} : vector<160x128xbf16>, vector<128x128xbf16>, vector<160x128xf32> -> vector<160x128xf32>
    %40 = arith.addf %35, %39 : vector<160x128xf32>
    %41 = vector.extract_strided_slice %31 {offsets = [16, 0], sizes = [160, 128], strides = [1, 1]} : vector<176x128xbf16> to vector<160x128xbf16>
    %c2_24 = arith.constant 2 : index
    %c0_25 = arith.constant 0 : index
    %c0_26 = arith.constant 0 : index
    %42 = vector.load %arg4[%c2_24, %c0_25, %c0_26] : memref<3x128x128xbf16, #tpu.memory_space<vmem>>, vector<1x128x128xbf16>
    %43 = vector.shape_cast %42 : vector<1x128x128xbf16> to vector<128x128xbf16>
    %cst_27 = arith.constant dense<0.000000e+00> : vector<160x128xf32>
    %44 = tpu.matmul %41, %43, %cst_27 {dimension_numbers = #tpu.dot_dimension_numbers<[1], [0], [0], [1], [0, 0, 1, 1], [], []>} : vector<160x128xbf16>, vector<128x128xbf16>, vector<160x128xf32> -> vector<160x128xf32>
    %45 = arith.addf %40, %44 : vector<160x128xf32>
    %c0_28 = arith.constant 0 : index
    %c0_29 = arith.constant 0 : index
    %46 = vector.load %arg5[%c0_28, %c0_29] : memref<1x128xf32, #tpu.memory_space<vmem>>, vector<1x128xf32>
    %47 = vector.broadcast %46 : vector<1x128xf32> to vector<160x128xf32>
    %48 = arith.addf %45, %47 : vector<160x128xf32>
    %cst_30 = arith.constant 0.000000e+00 : f32
    %49 = vector.broadcast %cst_30 : f32 to vector<160x128xf32>
    %50 = arith.cmpf oge, %48, %49 : vector<160x128xf32>
    %cst_31 = arith.constant 0.00999999977 : f32
    %51 = vector.broadcast %cst_31 : f32 to vector<160x128xf32>
    %52 = arith.mulf %51, %48 : vector<160x128xf32>
    %53 = arith.select %50, %48, %52 : vector<160x128xi1>, vector<160x128xf32>
    %54 = vector.shape_cast %53 : vector<160x128xf32> to vector<10x16x128xf32>
    %55 = vector.extract_strided_slice %54 {offsets = [0, 0, 0], sizes = [10, 8, 128], strides = [1, 1, 1]} : vector<10x16x128xf32> to vector<10x8x128xf32>
    %56 = vector.extract_strided_slice %54 {offsets = [0, 8, 0], sizes = [10, 8, 128], strides = [1, 1, 1]} : vector<10x16x128xf32> to vector<10x8x128xf32>
    %57 = arith.maximumf %55, %56 : vector<10x8x128xf32>
    %cst_32 = arith.constant 0.000000e+00 : bf16
    %58 = vector.broadcast %cst_32 : bf16 to vector<1x8x128xbf16>
    %59 = arith.truncf %57 : vector<10x8x128xf32> to vector<10x8x128xbf16>
    %60 = tpu.concatenate %58, %59, %58 in 0 : vector<1x8x128xbf16>, vector<10x8x128xbf16>, vector<1x8x128xbf16> -> vector<12x8x128xbf16>
    %61 = vector.shape_cast %60 : vector<12x8x128xbf16> to vector<96x128xbf16>
    %62 = vector.extract_strided_slice %61 {offsets = [0, 0], sizes = [80, 128], strides = [1, 1]} : vector<96x128xbf16> to vector<80x128xbf16>
    %c0_33 = arith.constant 0 : index
    %c0_34 = arith.constant 0 : index
    %c0_35 = arith.constant 0 : index
    %63 = vector.load %arg6[%c0_33, %c0_34, %c0_35] : memref<3x128x128xbf16, #tpu.memory_space<vmem>>, vector<1x128x128xbf16>
    %64 = vector.shape_cast %63 : vector<1x128x128xbf16> to vector<128x128xbf16>
    %cst_36 = arith.constant dense<0.000000e+00> : vector<80x128xf32>
    %65 = tpu.matmul %62, %64, %cst_36 {dimension_numbers = #tpu.dot_dimension_numbers<[1], [0], [0], [1], [0, 0, 1, 1], [], []>} : vector<80x128xbf16>, vector<128x128xbf16>, vector<80x128xf32> -> vector<80x128xf32>
    %66 = vector.extract_strided_slice %61 {offsets = [8, 0], sizes = [80, 128], strides = [1, 1]} : vector<96x128xbf16> to vector<80x128xbf16>
    %c1_37 = arith.constant 1 : index
    %c0_38 = arith.constant 0 : index
    %c0_39 = arith.constant 0 : index
    %67 = vector.load %arg6[%c1_37, %c0_38, %c0_39] : memref<3x128x128xbf16, #tpu.memory_space<vmem>>, vector<1x128x128xbf16>
    %68 = vector.shape_cast %67 : vector<1x128x128xbf16> to vector<128x128xbf16>
    %cst_40 = arith.constant dense<0.000000e+00> : vector<80x128xf32>
    %69 = tpu.matmul %66, %68, %cst_40 {dimension_numbers = #tpu.dot_dimension_numbers<[1], [0], [0], [1], [0, 0, 1, 1], [], []>} : vector<80x128xbf16>, vector<128x128xbf16>, vector<80x128xf32> -> vector<80x128xf32>
    %70 = arith.addf %65, %69 : vector<80x128xf32>
    %71 = vector.extract_strided_slice %61 {offsets = [16, 0], sizes = [80, 128], strides = [1, 1]} : vector<96x128xbf16> to vector<80x128xbf16>
    %c2_41 = arith.constant 2 : index
    %c0_42 = arith.constant 0 : index
    %c0_43 = arith.constant 0 : index
    %72 = vector.load %arg6[%c2_41, %c0_42, %c0_43] : memref<3x128x128xbf16, #tpu.memory_space<vmem>>, vector<1x128x128xbf16>
    %73 = vector.shape_cast %72 : vector<1x128x128xbf16> to vector<128x128xbf16>
    %cst_44 = arith.constant dense<0.000000e+00> : vector<80x128xf32>
    %74 = tpu.matmul %71, %73, %cst_44 {dimension_numbers = #tpu.dot_dimension_numbers<[1], [0], [0], [1], [0, 0, 1, 1], [], []>} : vector<80x128xbf16>, vector<128x128xbf16>, vector<80x128xf32> -> vector<80x128xf32>
    %75 = arith.addf %70, %74 : vector<80x128xf32>
    %c0_45 = arith.constant 0 : index
    %c0_46 = arith.constant 0 : index
    %76 = vector.load %arg7[%c0_45, %c0_46] : memref<1x128xf32, #tpu.memory_space<vmem>>, vector<1x128xf32>
    %77 = vector.broadcast %76 : vector<1x128xf32> to vector<80x128xf32>
    %78 = arith.addf %75, %77 : vector<80x128xf32>
    %cst_47 = arith.constant 0.000000e+00 : f32
    %79 = vector.broadcast %cst_47 : f32 to vector<80x128xf32>
    %80 = arith.cmpf oge, %78, %79 : vector<80x128xf32>
    %cst_48 = arith.constant 0.00999999977 : f32
    %81 = vector.broadcast %cst_48 : f32 to vector<80x128xf32>
    %82 = arith.mulf %81, %78 : vector<80x128xf32>
    %83 = arith.select %80, %78, %82 : vector<80x128xi1>, vector<80x128xf32>
    %84 = vector.shape_cast %83 : vector<80x128xf32> to vector<5x16x128xf32>
    %85 = vector.extract_strided_slice %84 {offsets = [0, 0, 0], sizes = [5, 8, 128], strides = [1, 1, 1]} : vector<5x16x128xf32> to vector<5x8x128xf32>
    %86 = vector.extract_strided_slice %84 {offsets = [0, 8, 0], sizes = [5, 8, 128], strides = [1, 1, 1]} : vector<5x16x128xf32> to vector<5x8x128xf32>
    %87 = arith.maximumf %85, %86 : vector<5x8x128xf32>
    %88 = arith.truncf %87 : vector<5x8x128xf32> to vector<5x8x128xbf16>
    %89 = vector.extract_strided_slice %88 {offsets = [0, 0, 0], sizes = [1, 8, 128], strides = [1, 1, 1]} : vector<5x8x128xbf16> to vector<1x8x128xbf16>
    %90 = vector.shape_cast %89 : vector<1x8x128xbf16> to vector<8x128xbf16>
    %c0_49 = arith.constant 0 : index
    %c0_50 = arith.constant 0 : index
    %c0_51 = arith.constant 0 : index
    %91 = vector.load %arg8[%c0_49, %c0_50, %c0_51] : memref<5x128x640xbf16, #tpu.memory_space<vmem>>, vector<1x128x640xbf16>
    %92 = vector.shape_cast %91 : vector<1x128x640xbf16> to vector<128x640xbf16>
    %cst_52 = arith.constant dense<0.000000e+00> : vector<8x640xf32>
    %93 = tpu.matmul %90, %92, %cst_52 {dimension_numbers = #tpu.dot_dimension_numbers<[1], [0], [0], [1], [0, 0, 1, 1], [], []>} : vector<8x128xbf16>, vector<128x640xbf16>, vector<8x640xf32> -> vector<8x640xf32>
    %94 = vector.extract_strided_slice %88 {offsets = [1, 0, 0], sizes = [1, 8, 128], strides = [1, 1, 1]} : vector<5x8x128xbf16> to vector<1x8x128xbf16>
    %95 = vector.shape_cast %94 : vector<1x8x128xbf16> to vector<8x128xbf16>
    %c1_53 = arith.constant 1 : index
    %c0_54 = arith.constant 0 : index
    %c0_55 = arith.constant 0 : index
    %96 = vector.load %arg8[%c1_53, %c0_54, %c0_55] : memref<5x128x640xbf16, #tpu.memory_space<vmem>>, vector<1x128x640xbf16>
    %97 = vector.shape_cast %96 : vector<1x128x640xbf16> to vector<128x640xbf16>
    %cst_56 = arith.constant dense<0.000000e+00> : vector<8x640xf32>
    %98 = tpu.matmul %95, %97, %cst_56 {dimension_numbers = #tpu.dot_dimension_numbers<[1], [0], [0], [1], [0, 0, 1, 1], [], []>} : vector<8x128xbf16>, vector<128x640xbf16>, vector<8x640xf32> -> vector<8x640xf32>
    %99 = arith.addf %93, %98 : vector<8x640xf32>
    %100 = vector.extract_strided_slice %88 {offsets = [2, 0, 0], sizes = [1, 8, 128], strides = [1, 1, 1]} : vector<5x8x128xbf16> to vector<1x8x128xbf16>
    %101 = vector.shape_cast %100 : vector<1x8x128xbf16> to vector<8x128xbf16>
    %c2_57 = arith.constant 2 : index
    %c0_58 = arith.constant 0 : index
    %c0_59 = arith.constant 0 : index
    %102 = vector.load %arg8[%c2_57, %c0_58, %c0_59] : memref<5x128x640xbf16, #tpu.memory_space<vmem>>, vector<1x128x640xbf16>
    %103 = vector.shape_cast %102 : vector<1x128x640xbf16> to vector<128x640xbf16>
    %cst_60 = arith.constant dense<0.000000e+00> : vector<8x640xf32>
    %104 = tpu.matmul %101, %103, %cst_60 {dimension_numbers = #tpu.dot_dimension_numbers<[1], [0], [0], [1], [0, 0, 1, 1], [], []>} : vector<8x128xbf16>, vector<128x640xbf16>, vector<8x640xf32> -> vector<8x640xf32>
    %105 = arith.addf %99, %104 : vector<8x640xf32>
    %106 = vector.extract_strided_slice %88 {offsets = [3, 0, 0], sizes = [1, 8, 128], strides = [1, 1, 1]} : vector<5x8x128xbf16> to vector<1x8x128xbf16>
    %107 = vector.shape_cast %106 : vector<1x8x128xbf16> to vector<8x128xbf16>
    %c3 = arith.constant 3 : index
    %c0_61 = arith.constant 0 : index
    %c0_62 = arith.constant 0 : index
    %108 = vector.load %arg8[%c3, %c0_61, %c0_62] : memref<5x128x640xbf16, #tpu.memory_space<vmem>>, vector<1x128x640xbf16>
    %109 = vector.shape_cast %108 : vector<1x128x640xbf16> to vector<128x640xbf16>
    %cst_63 = arith.constant dense<0.000000e+00> : vector<8x640xf32>
    %110 = tpu.matmul %107, %109, %cst_63 {dimension_numbers = #tpu.dot_dimension_numbers<[1], [0], [0], [1], [0, 0, 1, 1], [], []>} : vector<8x128xbf16>, vector<128x640xbf16>, vector<8x640xf32> -> vector<8x640xf32>
    %111 = arith.addf %105, %110 : vector<8x640xf32>
    %112 = vector.extract_strided_slice %88 {offsets = [4, 0, 0], sizes = [1, 8, 128], strides = [1, 1, 1]} : vector<5x8x128xbf16> to vector<1x8x128xbf16>
    %113 = vector.shape_cast %112 : vector<1x8x128xbf16> to vector<8x128xbf16>
    %c4 = arith.constant 4 : index
    %c0_64 = arith.constant 0 : index
    %c0_65 = arith.constant 0 : index
    %114 = vector.load %arg8[%c4, %c0_64, %c0_65] : memref<5x128x640xbf16, #tpu.memory_space<vmem>>, vector<1x128x640xbf16>
    %115 = vector.shape_cast %114 : vector<1x128x640xbf16> to vector<128x640xbf16>
    %cst_66 = arith.constant dense<0.000000e+00> : vector<8x640xf32>
    %116 = tpu.matmul %113, %115, %cst_66 {dimension_numbers = #tpu.dot_dimension_numbers<[1], [0], [0], [1], [0, 0, 1, 1], [], []>} : vector<8x128xbf16>, vector<128x640xbf16>, vector<8x640xf32> -> vector<8x640xf32>
    %117 = arith.addf %111, %116 : vector<8x640xf32>
    %c0_67 = arith.constant 0 : index
    %c0_68 = arith.constant 0 : index
    %118 = vector.load %arg9[%c0_67, %c0_68] : memref<1x640xf32, #tpu.memory_space<vmem>>, vector<1x640xf32>
    %119 = vector.broadcast %118 : vector<1x640xf32> to vector<8x640xf32>
    %120 = arith.addf %117, %119 : vector<8x640xf32>
    %cst_69 = arith.constant 0.000000e+00 : f32
    %121 = vector.broadcast %cst_69 : f32 to vector<8x640xf32>
    %122 = arith.cmpf oge, %120, %121 : vector<8x640xf32>
    %cst_70 = arith.constant 0.00999999977 : f32
    %123 = vector.broadcast %cst_70 : f32 to vector<8x640xf32>
    %124 = arith.mulf %123, %120 : vector<8x640xf32>
    %125 = arith.select %122, %120, %124 : vector<8x640xi1>, vector<8x640xf32>
    %126 = arith.truncf %125 : vector<8x640xf32> to vector<8x640xbf16>
    %c0_71 = arith.constant 0 : index
    %c0_72 = arith.constant 0 : index
    %127 = vector.load %arg10[%c0_71, %c0_72] : memref<640x128xbf16, #tpu.memory_space<vmem>>, vector<640x128xbf16>
    %cst_73 = arith.constant dense<0.000000e+00> : vector<8x128xf32>
    %128 = tpu.matmul %126, %127, %cst_73 {dimension_numbers = #tpu.dot_dimension_numbers<[1], [0], [0], [1], [0, 0, 1, 1], [], []>} : vector<8x640xbf16>, vector<640x128xbf16>, vector<8x128xf32> -> vector<8x128xf32>
    %c0_74 = arith.constant 0 : index
    %c0_75 = arith.constant 0 : index
    %129 = vector.load %arg11[%c0_74, %c0_75] : memref<1x128xf32, #tpu.memory_space<vmem>>, vector<1x128xf32>
    %130 = vector.broadcast %129 : vector<1x128xf32> to vector<8x128xf32>
    %131 = arith.addf %128, %130 : vector<8x128xf32>
    %c0_76 = arith.constant 0 : index
    %c0_77 = arith.constant 0 : index
    %132 = vector.load %arg12[%c0_76, %c0_77] : memref<8x128xf32, #tpu.memory_space<vmem>>, vector<8x128xf32>
    tpu.vector_store %arg12[%c0_76, %c0_77], %131 {strides = array<i32>} : memref<8x128xf32, #tpu.memory_space<vmem>>, vector<8x128xf32>,
    return
  }
  func.func @transform_0(%arg0: i32) -> (i32, i32, i32) {
    %c0_i32 = arith.constant 0 : i32
    %c0_i32_0 = arith.constant 0 : i32
    %c0_i32_1 = arith.constant 0 : i32
    return %c0_i32, %arg0, %c0_i32_0 : i32, i32, i32
  }
  func.func @transform_1(%arg0: i32) -> (i32, i32, i32) {
    %c0_i32 = arith.constant 0 : i32
    %c0_i32_0 = arith.constant 0 : i32
    %c0_i32_1 = arith.constant 0 : i32
    %c0_i32_2 = arith.constant 0 : i32
    return %c0_i32, %c0_i32_0, %c0_i32_1 : i32, i32, i32
  }
  func.func @transform_2(%arg0: i32) -> (i32, i32) {
    %c0_i32 = arith.constant 0 : i32
    %c0_i32_0 = arith.constant 0 : i32
    %c0_i32_1 = arith.constant 0 : i32
    return %c0_i32, %c0_i32_0 : i32, i32
  }
  func.func @transform_3(%arg0: i32) -> (i32, i32, i32) {
    %c0_i32 = arith.constant 0 : i32
    %c0_i32_0 = arith.constant 0 : i32
    %c0_i32_1 = arith.constant 0 : i32
    %c0_i32_2 = arith.constant 0 : i32
    return %c0_i32, %c0_i32_0, %c0_i32_1 : i32, i32, i32
  }
  func.func @transform_4(%arg0: i32) -> (i32, i32) {
    %c0_i32 = arith.constant 0 : i32
    %c0_i32_0 = arith.constant 0 : i32
    %c0_i32_1 = arith.constant 0 : i32
    return %c0_i32, %c0_i32_0 : i32, i32
  }
  func.func @transform_5(%arg0: i32) -> (i32, i32, i32) {
    %c0_i32 = arith.constant 0 : i32
    %c0_i32_0 = arith.constant 0 : i32
    %c0_i32_1 = arith.constant 0 : i32
    %c0_i32_2 = arith.constant 0 : i32
    return %c0_i32, %c0_i32_0, %c0_i32_1 : i32, i32, i32
  }
  func.func @transform_6(%arg0: i32) -> (i32, i32) {
    %c0_i32 = arith.constant 0 : i32
    %c0_i32_0 = arith.constant 0 : i32
    %c0_i32_1 = arith.constant 0 : i32
    return %c0_i32, %c0_i32_0 : i32, i32
  }
  func.func @transform_7(%arg0: i32) -> (i32, i32, i32) {
    %c0_i32 = arith.constant 0 : i32
    %c0_i32_0 = arith.constant 0 : i32
    %c0_i32_1 = arith.constant 0 : i32
    %c0_i32_2 = arith.constant 0 : i32
    return %c0_i32, %c0_i32_0, %c0_i32_1 : i32, i32, i32
  }
  func.func @transform_8(%arg0: i32) -> (i32, i32) {
    %c0_i32 = arith.constant 0 : i32
    %c0_i32_0 = arith.constant 0 : i32
    %c0_i32_1 = arith.constant 0 : i32
    return %c0_i32, %c0_i32_0 : i32, i32
  }
  func.func @transform_9(%arg0: i32) -> (i32, i32) {
    %c0_i32 = arith.constant 0 : i32
    %c0_i32_0 = arith.constant 0 : i32
    %c0_i32_1 = arith.constant 0 : i32
    return %c0_i32, %c0_i32_0 : i32, i32
  }
  func.func @transform_10(%arg0: i32) -> (i32, i32) {
    %c0_i32 = arith.constant 0 : i32
    %c0_i32_0 = arith.constant 0 : i32
    %c0_i32_1 = arith.constant 0 : i32
    return %c0_i32, %c0_i32_0 : i32, i32
  }
  func.func @transform_11(%arg0: i32) -> (i32, i32) {
    %c0_i32 = arith.constant 0 : i32
    %c0_i32_0 = arith.constant 0 : i32
    return %arg0, %c0_i32 : i32, i32
  }
}

</mosaic_0001>

<bundles_post_ra>
// kernel: cnn3_forward.1
= control target key start
LH: loop header
LB: loop body
LE: loop exit
PB: predicated region body
PF: predicated region fallthrough
CT: control target
= control target key end

     0   :  { %16 = vsyncpa [#allocation3], 0  ;;  %s7522_s0 = inlined_call_operand.vmem [shape: bf16[42,8,8], index: 0, kind: input, shape index: {}]   ;;  %s7523_s1 = inlined_call_operand.vmem [shape: bf16[3,8,128], index: 1, kind: input, shape index: {}]   ;;  %s7524_s2 = inlined_call_operand.vmem [shape: f32[1,128], index: 2, kind: input, shape index: {}]   ;;  %s7525_s3 = inlined_call_operand.vmem [shape: bf16[3,128,128], index: 3, kind: input, shape index: {}]   ;;  %s7526_s4 = inlined_call_operand.vmem [shape: f32[1,128], index: 4, kind: input, shape index: {}]   ;;  %s7527_s5 = inlined_call_operand.hbm [shape: bf16[3,128,128], index: 5, kind: input, shape index: {}]   ;;  %s7528_s6 = inlined_call_operand.vmem [shape: f32[1,128], index: 6, kind: input, shape index: {}]   ;;  %s7529_s7 = inlined_call_operand.hbm [shape: bf16[5,128,640], index: 7, kind: input, shape index: {}]   ;;  %s7530_s8 = inlined_call_operand.vmem [shape: f32[1,640], index: 8, kind: input, shape index: {}]   ;;  %s7531_s9 = inlined_call_operand.hbm [shape: bf16[640,128], index: 9, kind: input, shape index: {}]   ;;  %s7532_s10 = inlined_call_operand.vmem [shape: f32[1,128], index: 10, kind: input, shape index: {}]   ;;  %s7533_s11 = inlined_call_operand.vmem [shape: f32[8,128], index: 11, kind: output, shape index: {}]  }
   0x1   :  { %17 = vsyncpa [#allocation5], 0  ;;  %s6708_s17 = smov [#allocation4]   ;;  %s6638_s21 = scalar_lea.hbm %s7529_s7, 25600 }
   0x2   :  { %s47_s18 = sshll.u32 %s6708_s17, 4  ;;  %p6639_p0 = scmp.ne.s32.totalorder %s7529_s7, %s6638_s21  ;;  %s48_s18 = int_to_ptr.vmem [resolvable:$true] %s47_s18 }
   0x3   :  { %p6642_p1 = scmp.lt.u32.totalorder %s6638_s21, %s7529_s7 }
   0x5   :  { %p6644_p2 = pnand %p6642_p1, %p6639_p0 }
   0x7   :  { %6647 = shalt.err (!%p6644_p2)
}
   0x8   :  { %s6648_s26 = scalar_lea.vmem %s48_s18, 25600  ;;  %p6653_p4 = scmp.lt.s32.totalorder %s48_s18, %s48_s18 }
   0x9   :  { %p6649_p3 = scmp.ne.s32.totalorder %s48_s18, %s6648_s26  ;;  %p6654_p5 = scmp.lt.s32.totalorder %s6648_s26, %s6648_s26 }
   0xb   :  { %p6655_p6 = por %p6654_p5, %p6653_p4 }
   0xd   :  { %p6656_p7 = pnand %p6655_p6, %p6649_p3 }
   0xf   :  { %6659 = shalt.err (!%p6656_p7)
}
  0x10   :  { %s6709_s27 = smov 320   ;;  %s6710_s28 = smov 20  }
  0x11   :  { %53 = dma.hbm_to_vmem [thread:$0]  %s7529_s7, 25600, %s48_s18, [#allocation5], %s6709_s27, %s6709_s27, %s6710_s28  }
  0x12   :  { %s6711_s12 = smov [#allocation2]   ;;  %s6660_s16 = scalar_lea.hbm %s7527_s5, 3072 }
  0x13   :  { %s33_s13 = sshll.u32 %s6711_s12, 4  ;;  %p6661_p8 = scmp.ne.s32.totalorder %s7527_s5, %s6660_s16  ;;  %s34_s13 = int_to_ptr.vmem [resolvable:$true] %s33_s13 }
  0x14   :  { %p6664_p9 = scmp.lt.u32.totalorder %s6660_s16, %s7527_s5 }
  0x16   :  { %p6666_p10 = pnand %p6664_p9, %p6661_p8 }
  0x18   :  { %6669 = shalt.err (!%p6666_p10)
}
  0x19   :  { %s6670_s22 = scalar_lea.vmem %s34_s13, 3072  ;;  %p6675_p12 = scmp.lt.s32.totalorder %s34_s13, %s34_s13 }
  0x1a   :  { %p6671_p11 = scmp.ne.s32.totalorder %s34_s13, %s6670_s22  ;;  %p6676_p13 = scmp.lt.s32.totalorder %s6670_s22, %s6670_s22 }
  0x1c   :  { %p6677_p0 = por %p6676_p13, %p6675_p12 }
  0x1e   :  { %p6678_p1 = pnand %p6677_p0, %p6671_p11 }
  0x20   :  { %6681 = shalt.err (!%p6678_p1)
}
  0x21   :  { %s6712_s7 = smov 64   ;;  %s6713_s18 = smov 4  }
  0x22   :  { %39 = dma.hbm_to_vmem [thread:$0]  %s7527_s5, 3072, %s34_s13, [#allocation3], %s6712_s7, %s6712_s7, %s6713_s18  }
  0x23   :  { %s6714_s25 = smov [#allocation6]   ;;  %s6682_s29 = scalar_lea.hbm %s7531_s9, 5120 }
  0x24   :  { %s61_s26 = sshll.u32 %s6714_s25, 4  ;;  %p6683_p2 = scmp.ne.s32.totalorder %s7531_s9, %s6682_s29  ;;  %s62_s26 = int_to_ptr.vmem [resolvable:$true] %s61_s26 }
  0x25   :  { %p6686_p3 = scmp.lt.u32.totalorder %s6682_s29, %s7531_s9 }
  0x27   :  { %p6688_p4 = pnand %p6686_p3, %p6683_p2 }
  0x29   :  { %6691 = shalt.err (!%p6688_p4)
}
  0x2a   :  { %s6692_s16 = scalar_lea.vmem %s62_s26, 5120  ;;  %p6697_p6 = scmp.lt.s32.totalorder %s62_s26, %s62_s26 }
  0x2b   :  { %p6693_p5 = scmp.ne.s32.totalorder %s62_s26, %s6692_s16  ;;  %p6698_p7 = scmp.lt.s32.totalorder %s6692_s16, %s6692_s16 }
  0x2d   :  { %p6699_p8 = por %p6698_p7, %p6697_p6 }
  0x2f   :  { %p6700_p9 = pnand %p6699_p8, %p6693_p5 }
  0x31   :  { %6703 = shalt.err (!%p6700_p9)
}
  0x32   :  { %67 = dma.hbm_to_vmem [thread:$0]  %s7531_s9, 5120, %s62_s26, [#allocation5], %s6712_s7, %s6712_s7, %s6713_s18  }
  0x33   :  { %6704 = dma.done.wait [#allocation3], 3072  }
  0x34   :  { %6705 = vsyncadd [#allocation3], 4294964224 }
  0x35   :  { %6706 = dma.done.wait [#allocation5], 30720  }
  0x36   :  { %6707 = vsyncadd [#allocation5], 4294936576  ;;  %vm286_vm0 = vcmask 1043456   ;;  %v4893_v0 = vld [vmem:[%s7523_s1 + $0x4] sm:$0xf]  ;;  %vm225_vm1 = vcmask 64512  }
  0x37   :  { %v6820_v1 = vld [vmem:[%s7522_s0 + $0x4] sm:$0xf]  ;;  %6216 = vmatprep.subr.msk.bf16.mxu0 %vm286_vm0, %v4893_v0  ;;  %v288_v2 = vsel %vm286_vm0, %v4893_v0, 0  ;;  %v82_v3 = vld [vmem:[%s7522_s0 + $0x8] sm:$0xf] }
  0x38   :  { %v83_v4 = vld [vmem:[%s7522_s0 + $0xc] sm:$0xf]  ;;  %5635 = vmatpush3.bf16.msra.mxu0 %v288_v2  ;;  %v84_v5 = vld [vmem:[%s7522_s0 + $0x10] sm:$0xf]  ;;  %v4894_v6 = vcombine.low %v6820_v1, %v82_v3  ;;  %v122_v8 = vld [vmem:[%s7523_s1] sm:$0xf] }
  0x39   :  { %v6834_v7 = vcombine.low %v82_v3, %v83_v4  ;;  %v85_v9 = vld [vmem:[%s7522_s0 + $0x14] sm:$0xf]  ;;  %v4895_v10 = vcombine.low %v83_v4, %v84_v5  ;;  %6217 = vmatprep.subr.msk.bf16.mxu0 %vm286_vm0, %v122_v8  ;;  %v566_v11 = vsel %vm286_vm0, %v122_v8, 0  ;;  %v86_v12 = vld [vmem:[%s7522_s0 + $0x18] sm:$0xf] }
  0x3a   :  { %v87_v13 = vld [vmem:[%s7522_s0 + $0x1c] sm:$0xf]  ;;  %v6850_v14 = vcombine.low %v84_v5, %v85_v9  ;;  %5636 = vmatprep.mubr.msk.bf16.mxu0 %vm225_vm1, %v4894_v6  ;;  %v4896_v15 = vcombine.low %v85_v9, %v86_v12  ;;  %v88_v16 = vld [vmem:[%s7522_s0 + $0x20] sm:$0xf]  ;;  %v89_v17 = vld [vmem:[%s7522_s0 + $0x24] sm:$0xf] }
  0x3b   :  { %v90_v18 = vld [vmem:[%s7522_s0 + $0x28] sm:$0xf]  ;;  %v6862_v19 = vcombine.low %v86_v12, %v87_v13  ;;  %5637 = vmatmul.mubr.msk.bf16.vlgmr.msra.gmra.mrb[0].mxu0 %vm225_vm1, %v4895_v10  ;;  %v91_v20 = vld [vmem:[%s7522_s0 + $0x2c] sm:$0xf]  ;;  %v92_v21 = vld [vmem:[%s7522_s0 + $0x30] sm:$0xf]  ;;  %v6874_v23 = vcombine.low %v88_v16, %v89_v17  ;;  %v4897_v38 = vcombine.low %v87_v13, %v88_v16 }
  0x3c   :  { %v93_v22 = vld [vmem:[%s7522_s0 + $0x34] sm:$0xf]  ;;  %5677 = vmatpush3.bf16.msra.mxu0 %v566_v11  ;;  %5640 = vmatprep.mubr.msk.bf16.mxu0 %vm225_vm1, %v4896_v15  ;;  %v94_v24 = vld [vmem:[%s7522_s0 + $0x38] sm:$0xf]  ;;  %v95_v25 = vld [vmem:[%s7522_s0 + $0x3c] sm:$0xf]  ;;  %v6886_v27 = vcombine.low %v90_v18, %v91_v20  ;;  %v4898_v43 = vcombine.low %v89_v17, %v90_v18  ;;  %v4899_v63 = vcombine.low %v91_v20, %v92_v21 }
  0x3d   :  { %v96_v26 = vld [vmem:[%s7522_s0 + $0x40] sm:$0xf]  ;;  %v6888_v28 = vcombine.low %v92_v21, %v93_v22  ;;  %v97_v29 = vld [vmem:[%s7522_s0 + $0x44] sm:$0xf]  ;;  %v98_v30 = vld [vmem:[%s7522_s0 + $0x48] sm:$0xf]  ;;  %v6899_v32 = vcombine.low %v94_v24, %v95_v25  ;;  %v4900_v0 = vcombine.low %v93_v22, %v94_v24 }
  0x3e   :  { %v99_v31 = vld [vmem:[%s7522_s0 + $0x4c] sm:$0xf]  ;;  %v100_v33 = vld [vmem:[%s7522_s0 + $0x50] sm:$0xf]  ;;  %v101_v34 = vld [vmem:[%s7522_s0 + $0x54] sm:$0xf]  ;;  %v6910_v36 = vcombine.low %v96_v26, %v97_v29  ;;  %v4901_v9 = vcombine.low %v95_v25, %v96_v26  ;;  %v4902_v10 = vcombine.low %v97_v29, %v98_v30 }
  0x3f   :  { %v102_v35 = vld [vmem:[%s7522_s0 + $0x58] sm:$0xf]  ;;  %v6912_v37 = vcombine.low %v98_v30, %v99_v31  ;;  %v103_v39 = vld [vmem:[%s7522_s0 + $0x5c] sm:$0xf]  ;;  %v104_v40 = vld [vmem:[%s7522_s0 + $0x60] sm:$0xf]  ;;  %v6923_v42 = vcombine.low %v100_v33, %v101_v34  ;;  %v4903_v11 = vcombine.low %v99_v31, %v100_v33 }
  0x40   :  { %v105_v41 = vld [vmem:[%s7522_s0 + $0x64] sm:$0xf]  ;;  %v106_v44 = vld [vmem:[%s7522_s0 + $0x68] sm:$0xf]  ;;  %v107_v45 = vld [vmem:[%s7522_s0 + $0x6c] sm:$0xf]  ;;  %v6934_v47 = vcombine.low %v102_v35, %v103_v39  ;;  %v4904_v12 = vcombine.low %v101_v34, %v102_v35  ;;  %v4905_v13 = vcombine.low %v103_v39, %v104_v40 }
  0x41   :  { %v108_v46 = vld [vmem:[%s7522_s0 + $0x70] sm:$0xf]  ;;  %v6936_v48 = vcombine.low %v104_v40, %v105_v41  ;;  %v109_v49 = vld [vmem:[%s7522_s0 + $0x74] sm:$0xf]  ;;  %v110_v50 = vld [vmem:[%s7522_s0 + $0x78] sm:$0xf]  ;;  %v6947_v52 = vcombine.low %v106_v44, %v107_v45  ;;  %v4906_v15 = vcombine.low %v105_v41, %v106_v44 }
  0x42   :  { %v111_v51 = vld [vmem:[%s7522_s0 + $0x7c] sm:$0xf]  ;;  %v112_v53 = vld [vmem:[%s7522_s0 + $0x80] sm:$0xf]  ;;  %v113_v54 = vld [vmem:[%s7522_s0 + $0x84] sm:$0xf]  ;;  %v6955_v55 = vcombine.low %v108_v46, %v109_v49  ;;  %v4907_v16 = vcombine.low %v107_v45, %v108_v46  ;;  %v4908_v17 = vcombine.low %v109_v49, %v110_v50 }
  0x43   :  { %v6957_v56 = vcombine.low %v110_v50, %v111_v51  ;;  %5641 = vmatmul.mubr.msk.bf16.gmra.mrb[4].mxu0 %vm225_vm1, %v4897_v38  ;;  %v114_v57 = vld [vmem:[%s7522_s0 + $0x88] sm:$0xf]  ;;  %v115_v58 = vld [vmem:[%s7522_s0 + $0x8c] sm:$0xf]  ;;  %v6966_v59 = vcombine.low %v112_v53, %v113_v54  ;;  %v116_v2 = vld [vmem:[%s7522_s0 + $0x90] sm:$0xf]  ;;  %v4909_v18 = vcombine.low %v111_v51, %v112_v53 }
  0x44   :  { %5644 = vmatprep.mubr.msk.bf16.mxu0 %vm225_vm1, %v4898_v43  ;;  %v6969_v60 = vcombine.low %v114_v57, %v115_v58  ;;  %v4974_v61 = vld [vmem:[%s7523_s1 + $0x8] sm:$0xf]  ;;  %v117_v3 = vld [vmem:[%s7522_s0 + $0x94] sm:$0xf]  ;;  %v118_v4 = vld [vmem:[%s7522_s0 + $0x98] sm:$0xf]  ;;  %v4910_v20 = vcombine.low %v113_v54, %v114_v57  ;;  %v4911_v21 = vcombine.low %v115_v58, %v116_v2 }
  0x45   :  { %6218 = vmatprep.subr.msk.bf16.mxu0 %vm286_vm0, %v4974_v61  ;;  %v770_v62 = vsel %vm286_vm0, %v4974_v61, 0  ;;  %v119_v5 = vld [vmem:[%s7522_s0 + $0x9c] sm:$0xf]  ;;  %v6989_v6 = vcombine.low %v116_v2, %v117_v3  ;;  %v4912_v22 = vcombine.low %v117_v3, %v118_v4  ;;  %v120_v24 = vld [vmem:[%s7522_s0 + $0xa0] sm:$0xf]  ;;  %v6271_v30 = vld [vmem:[%s7525_s3 + $0x48] sm:$0xff]  }
  0x46   :  { %v6992_v8 = vcombine.low %v118_v4, %v119_v5  ;;  %v80_v25 = vld [vmem:[%s7522_s0] sm:$0xf]  ;;  %v4913_v26 = vcombine.low %v119_v5, %v120_v24  ;;  %v6272_v31 = vld [vmem:[%s7525_s3 + $0x50] sm:$0xff]   ;;  %v6277_v33 = vld [vmem:[%s7525_s3 + $0x78] sm:$0xff]  }
  0x47   :  { %v4934_v29 = vcombine.low %v80_v25, %v6820_v1  ;;  %v6270_v1 = vld [vmem:[%s7525_s3 + $0x40] sm:$0xff]  }
  0x48   :  { %5760 = vmatprep.subr.bf16.mxu1 %v6270_v1  ;;  %v7123_v34 = vld [vmem:[%s7525_s3] sm:$0xff]  }
  0x49   :  { %5761 = vmatpush3.bf16.msra.mxu1 %v6270_v1  ;;  %v7129_v35 = vld [vmem:[%s7524_s2] ss:$0 sm:$0xff] }
  0x4a   :  { %5762 = vmatprep.subr.bf16.mxu1 %v6271_v30 }
  0x4b   :  { %5645 = vmatmul.mubr.msk.bf16.gmra.mrb[8].mxu0 %vm225_vm1, %v4899_v63 }
  0x4c   :  { %5648 = vmatprep.mubr.msk.bf16.mxu0 %vm225_vm1, %v4900_v0 }
  0x4d   :  { %5763 = vmatpush3.bf16.msra.mxu1 %v6271_v30 }
  0x4e   :  { %5764 = vmatprep.subr.bf16.mxu1 %v6272_v31 }
  0x51   :  { %5765 = vmatpush3.bf16.msra.mxu1 %v6272_v31 }
  0x53   :  { %5649 = vmatmul.mubr.msk.bf16.gmra.mrb[12].mxu0 %vm225_vm1, %v4901_v9 }
  0x54   :  { %5652 = vmatprep.mubr.msk.bf16.mxu0 %vm225_vm1, %v4902_v10 }
  0x5b   :  { %5653 = vmatmul.mubr.msk.bf16.gmra.mrb[16].mxu0 %vm225_vm1, %v4903_v11 }
  0x5c   :  { %5656 = vmatprep.mubr.msk.bf16.mxu0 %vm225_vm1, %v4904_v12 }
  0x63   :  { %5657 = vmatmul.mubr.msk.bf16.gmra.mrb[20].mxu0 %vm225_vm1, %v4905_v13 }
  0x64   :  { %5660 = vmatprep.mubr.msk.bf16.mxu0 %vm225_vm1, %v4906_v15 }
  0x6b   :  { %5661 = vmatmul.mubr.msk.bf16.gmra.mrb[24].mxu0 %vm225_vm1, %v4907_v16 }
  0x6c   :  { %5664 = vmatprep.mubr.msk.bf16.mxu0 %vm225_vm1, %v4908_v17 }
  0x73   :  { %5665 = vmatmul.mubr.msk.bf16.gmra.mrb[28].mxu0 %vm225_vm1, %v4909_v18 }
  0x74   :  { %5668 = vmatprep.mubr.msk.bf16.mxu0 %vm225_vm1, %v4910_v20 }
  0x7b   :  { %5669 = vmatmul.mubr.msk.bf16.gmra.mrb[32].mxu0 %vm225_vm1, %v4911_v21 }
  0x7c   :  { %5672 = vmatprep.mubr.msk.bf16.mxu0 %vm225_vm1, %v4912_v22 }
  0x83   :  { %5673 = vmatmul.mubr.msk.bf16.gmra.mrb[36].mxu0 %vm225_vm1, %v4913_v26  ;;  %v6279_v26 = vld [vmem:[%s7525_s3 + $0x8] sm:$0xff]  }
  0x84   :  { %5678 = vmatprep.mubr.msk.bf16.mxu0 %vm225_vm1, %v4934_v29 }
  0x8b   :  { %5679 = vmatmul.mubr.msk.bf16.vlgmr.msra.gmra.mrb[0].mxu0 %vm225_vm1, %v6834_v7 }
  0x8c   :  { %5719 = vmatpush3.bf16.msra.mxu0 %v770_v62  ;;  %5682 = vmatprep.mubr.msk.bf16.mxu0 %vm225_vm1, %v6850_v14 }
  0x93   :  { %5683 = vmatmul.mubr.msk.bf16.gmra.mrb[4].mxu0 %vm225_vm1, %v6862_v19 }
  0x94   :  { %5686 = vmatprep.mubr.msk.bf16.mxu0 %vm225_vm1, %v6874_v23 }
  0x9b   :  { %5687 = vmatmul.mubr.msk.bf16.gmra.mrb[8].mxu0 %vm225_vm1, %v6886_v27 }
  0x9c   :  { %5690 = vmatprep.mubr.msk.bf16.mxu0 %vm225_vm1, %v6888_v28 }
  0xa3   :  { %5691 = vmatmul.mubr.msk.bf16.gmra.mrb[12].mxu0 %vm225_vm1, %v6899_v32 }
  0xa4   :  { %5694 = vmatprep.mubr.msk.bf16.mxu0 %vm225_vm1, %v6910_v36 }
  0xab   :  { %5695 = vmatmul.mubr.msk.bf16.gmra.mrb[16].mxu0 %vm225_vm1, %v6912_v37 }
  0xac   :  { %5698 = vmatprep.mubr.msk.bf16.mxu0 %vm225_vm1, %v6923_v42 }
  0xb3   :  { %5699 = vmatmul.mubr.msk.bf16.gmra.mrb[20].mxu0 %vm225_vm1, %v6934_v47 }
  0xb4   :  { %5702 = vmatprep.mubr.msk.bf16.mxu0 %vm225_vm1, %v6936_v48 }
  0xbb   :  { %5703 = vmatmul.mubr.msk.bf16.gmra.mrb[24].mxu0 %vm225_vm1, %v6947_v52 }
  0xbc   :  { %5706 = vmatprep.mubr.msk.bf16.mxu0 %vm225_vm1, %v6955_v55 }
  0xc3   :  { %5707 = vmatmul.mubr.msk.bf16.gmra.mrb[28].mxu0 %vm225_vm1, %v6957_v56 }
  0xc4   :  { %5710 = vmatprep.mubr.msk.bf16.mxu0 %vm225_vm1, %v6966_v59 }
  0xcb   :  { %5711 = vmatmul.mubr.msk.bf16.gmra.mrb[32].mxu0 %vm225_vm1, %v6969_v60 }
  0xcc   :  { %5714 = vmatprep.mubr.msk.bf16.mxu0 %vm225_vm1, %v6989_v6 }
  0xd3   :  { %5715 = vmatmul.mubr.msk.bf16.gmra.mrb[36].mxu0 %vm225_vm1, %v6992_v8 }
  0xd4   :  { %5720 = vmatprep.mubr.msk.bf16.mxu0 %vm225_vm1, %v6834_v7  ;;  %v121_v7 = vld [vmem:[%s7522_s0 + $0xa4] sm:$0xf] }
  0xdb   :  { %5721 = vmatmul.mubr.msk.bf16.vlgmr.msra.gmra.mrb[0].mxu0 %vm225_vm1, %v6850_v14  ;;  %v4975_v14 = vcombine.low %v120_v24, %v121_v7 }
  0xdc   :  { %5724 = vmatprep.mubr.msk.bf16.mxu0 %vm225_vm1, %v6862_v19  ;;  %v6273_v19 = vld [vmem:[%s7525_s3 + $0x58] sm:$0xff]  }
  0xdd   :  { %5766 = vmatprep.subr.bf16.mxu1 %v6273_v19 }
  0xde   :  { %5767 = vmatpush3.bf16.msra.mxu1 %v6273_v19 }
  0xe3   :  { %5725 = vmatmul.mubr.msk.bf16.gmra.mrb[4].mxu0 %vm225_vm1, %v6874_v23  ;;  %v6274_v23 = vld [vmem:[%s7525_s3 + $0x60] sm:$0xff]  }
  0xe4   :  { %5728 = vmatprep.mubr.msk.bf16.mxu0 %vm225_vm1, %v6886_v27  ;;  %5768 = vmatprep.subr.bf16.mxu1 %v6274_v23  ;;  %v6275_v27 = vld [vmem:[%s7525_s3 + $0x68] sm:$0xff]  }
  0xe5   :  { %5769 = vmatpush3.bf16.msra.mxu1 %v6274_v23 }
  0xe6   :  { %5770 = vmatprep.subr.bf16.mxu1 %v6275_v27 }
  0xe9   :  { %5771 = vmatpush3.bf16.msra.mxu1 %v6275_v27  ;;  %v6280_v27 = vld [vmem:[%s7525_s3 + $0x10] sm:$0xff]  }
  0xeb   :  { %5729 = vmatmul.mubr.msk.bf16.gmra.mrb[8].mxu0 %vm225_vm1, %v6888_v28  ;;  %v6276_v28 = vld [vmem:[%s7525_s3 + $0x70] sm:$0xff]  }
  0xec   :  { %5732 = vmatprep.mubr.msk.bf16.mxu0 %vm225_vm1, %v6899_v32  ;;  %5772 = vmatprep.subr.bf16.mxu1 %v6276_v28  ;;  %v6715_v32 = vmov 0  }
  0xed   :  { %5773 = vmatpush3.bf16.msra.mxu1 %v6276_v28 }
  0xee   :  { %5774 = vmatprep.subr.bf16.mxu1 %v6277_v33 }
  0xf1   :  { %5775 = vmatpush3.bf16.msra.mxu1 %v6277_v33 }
  0xf2   :  { %5796 = vmatprep.subr.bf16.mxu1 %v7123_v34 }
  0xf3   :  { %5733 = vmatmul.mubr.msk.bf16.gmra.mrb[12].mxu0 %vm225_vm1, %v6910_v36 }
  0xf4   :  { %5736 = vmatprep.mubr.msk.bf16.mxu0 %vm225_vm1, %v6912_v37 }
  0xfb   :  { %5737 = vmatmul.mubr.msk.bf16.gmra.mrb[16].mxu0 %vm225_vm1, %v6923_v42 }
  0xfc   :  { %5740 = vmatprep.mubr.msk.bf16.mxu0 %vm225_vm1, %v6934_v47 }
 0x103   :  { %5741 = vmatmul.mubr.msk.bf16.gmra.mrb[20].mxu0 %vm225_vm1, %v6936_v48 }
 0x104   :  { %5744 = vmatprep.mubr.msk.bf16.mxu0 %vm225_vm1, %v6947_v52 }
 0x10b   :  { %5745 = vmatmul.mubr.msk.bf16.gmra.mrb[24].mxu0 %vm225_vm1, %v6955_v55 }
 0x10c   :  { %5748 = vmatprep.mubr.msk.bf16.mxu0 %vm225_vm1, %v6957_v56 }
 0x113   :  { %5749 = vmatmul.mubr.msk.bf16.gmra.mrb[28].mxu0 %vm225_vm1, %v6966_v59 }
 0x114   :  { %5752 = vmatprep.mubr.msk.bf16.mxu0 %vm225_vm1, %v6969_v60 }
 0x11b   :  { %5753 = vmatmul.mubr.msk.bf16.gmra.mrb[32].mxu0 %vm225_vm1, %v6989_v6 }
 0x11c   :  { %5756 = vmatprep.mubr.msk.bf16.mxu0 %vm225_vm1, %v6992_v8 }
 0x123   :  { %5757 = vmatmul.mubr.msk.bf16.gmra.mrb[36].mxu0 %vm225_vm1, %v4975_v14 }
 0x124   :  { %2815 = vmatprep.mubr.bf16.mxu0 %v6715_v32 }
 0x1ae   :  { %v5722_v36 = vpop.f32.mrb[0].mxu0 }
 0x1af   :  { %v1014_v37 = vadd.f32 %v5722_v36, %v7129_v35  ;;  %v806_v38 = vpop.f32.mrb[1].mxu0 }
 0x1b0   :  { %v1012_v39 = vadd.f32 %v7129_v35, %v806_v38  ;;  %v5723_v40 = vpop.f32.mrb[2].mxu0 }
 0x1b1   :  { %v1094_v41 = vmul.f32 0.01, %v1014_v37  ;;  %v1015_v42 = vadd.f32 %v5723_v40, %v7129_v35  ;;  %v809_v43 = vpop.f32.mrb[3].mxu0  ;;  %vm1054_vm2 = vcmp.ge.f32.partialorder %v1014_v37, 0.0 }
 0x1b2   :  { %v1092_v44 = vmul.f32 0.01, %v1012_v39  ;;  %v1013_v45 = vadd.f32 %v7129_v35, %v809_v43  ;;  %vm1052_vm3 = vcmp.ge.f32.partialorder %v1012_v39, 0.0 }
 0x1b3   :  { %vm1055_vm4 = vcmp.ge.f32.partialorder %v1015_v42, 0.0  ;;  %v1095_v46 = vmul.f32 0.01, %v1015_v42  ;;  %v1134_v48 = vsel %vm1054_vm2, %v1014_v37, %v1094_v41 }
 0x1b4   :  { %vm1053_vm5 = vcmp.ge.f32.partialorder %v1013_v45, 0.0  ;;  %v1093_v47 = vmul.f32 0.01, %v1013_v45  ;;  %v1132_v51 = vsel %vm1052_vm3, %v1012_v39, %v1092_v44  ;;  %v6281_v44 = vld [vmem:[%s7525_s3 + $0x18] sm:$0xff]  }
 0x1b5   :  { %v1135_v49 = vsel %vm1055_vm4, %v1015_v42, %v1095_v46 }
 0x1b6   :  { %v5726_v50 = vpop.f32.mrb[4].mxu0  ;;  %v1133_v52 = vsel %vm1053_vm5, %v1013_v45, %v1093_v47  ;;  %v1173_v53 = vmax.f32 %v1134_v48, %v1135_v49 }
 0x1b7   :  { %v1018_v54 = vadd.f32 %v5726_v50, %v7129_v35  ;;  %v822_v55 = vpop.f32.mrb[5].mxu0  ;;  %v7136_v56 = vmax.f32 %v1132_v51, %v1133_v52 }
 0x1b8   :  { %v1016_v57 = vadd.f32 %v7129_v35, %v822_v55  ;;  %v5727_v58 = vpop.f32.mrb[6].mxu0 }
 0x1b9   :  { %v1098_v59 = vmul.f32 0.01, %v1018_v54  ;;  %v1019_v60 = vadd.f32 %v5727_v58, %v7129_v35  ;;  %v825_v61 = vpop.f32.mrb[7].mxu0  ;;  %vm1058_vm6 = vcmp.ge.f32.partialorder %v1018_v54, 0.0  ;;  %v5352_v0 = vpack.c.bf16 %v1173_v53, %v7136_v56 }
 0x1ba   :  { %v1096_v62 = vmul.f32 0.01, %v1016_v57  ;;  %v1017_v63 = vadd.f32 %v7129_v35, %v825_v61  ;;  %vm1056_vm7 = vcmp.ge.f32.partialorder %v1016_v57, 0.0 }
 0x1bb   :  { %vm1059_vm8 = vcmp.ge.f32.partialorder %v1019_v60, 0.0  ;;  %v1099_v2 = vmul.f32 0.01, %v1019_v60  ;;  %5776 = vmatprep.mubr.bf16.mxu1 %v5352_v0  ;;  %v1138_v4 = vsel %vm1058_vm6, %v1018_v54, %v1098_v59  ;;  %v6282_v54 = vld [vmem:[%s7525_s3 + $0x20] sm:$0xff]  }
 0x1bc   :  { %vm1057_vm9 = vcmp.ge.f32.partialorder %v1017_v63, 0.0  ;;  %v1097_v3 = vmul.f32 0.01, %v1017_v63  ;;  %v1136_v6 = vsel %vm1056_vm7, %v1016_v57, %v1096_v62 }
 0x1bd   :  { %v1139_v5 = vsel %vm1059_vm8, %v1019_v60, %v1099_v2 }
 0x1be   :  { %v1137_v8 = vsel %vm1057_vm9, %v1017_v63, %v1097_v3  ;;  %v5730_v9 = vpop.f32.mrb[8].mxu0  ;;  %v1175_v10 = vmax.f32 %v1138_v4, %v1139_v5  ;;  %v6283_v4 = vld [vmem:[%s7525_s3 + $0x28] sm:$0xff]  }
 0x1bf   :  { %v1174_v11 = vmax.f32 %v1136_v6, %v1137_v8  ;;  %v1022_v12 = vadd.f32 %v5730_v9, %v7129_v35  ;;  %v838_v13 = vpop.f32.mrb[9].mxu0 }
 0x1c0   :  { %v1020_v15 = vadd.f32 %v7129_v35, %v838_v13  ;;  %v5731_v16 = vpop.f32.mrb[10].mxu0 }
 0x1c1   :  { %v7144_v17 = vpack.c.bf16 %v1174_v11, %v1173_v53  ;;  %v1102_v18 = vmul.f32 0.01, %v1022_v12  ;;  %v1023_v20 = vadd.f32 %v5731_v16, %v7129_v35  ;;  %v841_v21 = vpop.f32.mrb[11].mxu0  ;;  %vm1062_vm10 = vcmp.ge.f32.partialorder %v1022_v12, 0.0  ;;  %v6284_v16 = vld [vmem:[%s7525_s3 + $0x30] sm:$0xff]  }
 0x1c2   :  { %v1100_v22 = vmul.f32 0.01, %v1020_v15  ;;  %v1021_v24 = vadd.f32 %v7129_v35, %v841_v21  ;;  %v5353_v25 = vpack.c.bf16 %v1175_v10, %v1174_v11  ;;  %vm1060_vm11 = vcmp.ge.f32.partialorder %v1020_v15, 0.0 }
 0x1c3   :  { %vm1063_vm12 = vcmp.ge.f32.partialorder %v1023_v20, 0.0  ;;  %v1103_v29 = vmul.f32 0.01, %v1023_v20  ;;  %v1142_v30 = vsel %vm1062_vm10, %v1022_v12, %v1102_v18 }
 0x1c4   :  { %vm1061_vm13 = vcmp.ge.f32.partialorder %v1021_v24, 0.0  ;;  %v1101_v1 = vmul.f32 0.01, %v1021_v24  ;;  %5777 = vmatmul.mubr.bf16.vlgmr.msra.gmra.mrb[0].mxu1 %v5353_v25  ;;  %v1140_v7 = vsel %vm1060_vm11, %v1020_v15, %v1100_v22 }
 0x1c5   :  { %v1143_v31 = vsel %vm1063_vm12, %v1023_v20, %v1103_v29  ;;  %5797 = vmatpush3.bf16.msra.mxu1 %v7123_v34 }
 0x1c6   :  { %v1141_v14 = vsel %vm1061_vm13, %v1021_v24, %v1101_v1  ;;  %v5734_v19 = vpop.f32.mrb[12].mxu0  ;;  %v1177_v23 = vmax.f32 %v1142_v30, %v1143_v31  ;;  %5798 = vmatprep.subr.bf16.mxu1 %v6279_v26 }
 0x1c7   :  { %v1026_v28 = vadd.f32 %v5734_v19, %v7129_v35  ;;  %v854_v33 = vpop.f32.mrb[13].mxu0  ;;  %v1176_v36 = vmax.f32 %v1140_v7, %v1141_v14  ;;  %v6285_v7 = vld [vmem:[%s7525_s3 + $0x38] sm:$0xff]  }
 0x1c8   :  { %v1024_v37 = vadd.f32 %v7129_v35, %v854_v33  ;;  %v5735_v38 = vpop.f32.mrb[14].mxu0 }
 0x1c9   :  { %v1106_v39 = vmul.f32 0.01, %v1026_v28  ;;  %v1027_v40 = vadd.f32 %v5735_v38, %v7129_v35  ;;  %v857_v34 = vpop.f32.mrb[15].mxu0  ;;  %v5354_v41 = vpack.c.bf16 %v1177_v23, %v1176_v36  ;;  %5799 = vmatpush3.bf16.msra.mxu1 %v6279_v26  ;;  %vm1066_vm14 = vcmp.ge.f32.partialorder %v1026_v28, 0.0 }
 0x1ca   :  { %v1104_v42 = vmul.f32 0.01, %v1024_v37  ;;  %v1025_v43 = vadd.f32 %v7129_v35, %v857_v34  ;;  %5800 = vmatprep.subr.bf16.mxu1 %v6280_v27  ;;  %v7162_v45 = vpack.c.bf16 %v1176_v36, %v1175_v10  ;;  %vm1064_vm15 = vcmp.ge.f32.partialorder %v1024_v37, 0.0 }
 0x1cb   :  { %vm1067_vm0 = vcmp.ge.f32.partialorder %v1027_v40, 0.0  ;;  %v1107_v46 = vmul.f32 0.01, %v1027_v40  ;;  %5780 = vmatprep.mubr.bf16.mxu1 %v5354_v41  ;;  %v1146_v48 = vsel %vm1066_vm14, %v1026_v28, %v1106_v39  ;;  %v7191_v39 = vld [vmem:[%s7525_s3 + $0x80] sm:$0xff]  }
 0x1cc   :  { %vm1065_vm1 = vcmp.ge.f32.partialorder %v1025_v43, 0.0  ;;  %v1105_v47 = vmul.f32 0.01, %v1025_v43  ;;  %v1144_v50 = vsel %vm1064_vm15, %v1024_v37, %v1104_v42 }
 0x1cd   :  { %v1147_v49 = vsel %vm1067_vm0, %v1027_v40, %v1107_v46  ;;  %5801 = vmatpush3.bf16.msra.mxu1 %v6280_v27 }
 0x1ce   :  { %v1145_v51 = vsel %vm1065_vm1, %v1025_v43, %v1105_v47  ;;  %v5738_v52 = vpop.f32.mrb[16].mxu0  ;;  %v1179_v53 = vmax.f32 %v1146_v48, %v1147_v49  ;;  %5802 = vmatprep.subr.bf16.mxu1 %v6281_v44 }
 0x1cf   :  { %v1030_v55 = vadd.f32 %v5738_v52, %v7129_v35  ;;  %v870_v57 = vpop.f32.mrb[17].mxu0  ;;  %v1178_v58 = vmax.f32 %v1144_v50, %v1145_v51 }
 0x1d0   :  { %v1028_v59 = vadd.f32 %v7129_v35, %v870_v57  ;;  %v5739_v60 = vpop.f32.mrb[18].mxu0 }
 0x1d1   :  { %v1110_v61 = vmul.f32 0.01, %v1030_v55  ;;  %v1031_v62 = vadd.f32 %v5739_v60, %v7129_v35  ;;  %v873_v63 = vpop.f32.mrb[19].mxu0  ;;  %v5355_v0 = vpack.c.bf16 %v1179_v53, %v1178_v58  ;;  %5803 = vmatpush3.bf16.msra.mxu1 %v6281_v44  ;;  %vm1070_vm2 = vcmp.ge.f32.partialorder %v1030_v55, 0.0 }
 0x1d2   :  { %v1108_v2 = vmul.f32 0.01, %v1028_v59  ;;  %v1029_v3 = vadd.f32 %v7129_v35, %v873_v63  ;;  %5804 = vmatprep.subr.bf16.mxu1 %v6282_v54  ;;  %v7174_v5 = vpack.c.bf16 %v1178_v58, %v1177_v23  ;;  %vm1068_vm3 = vcmp.ge.f32.partialorder %v1028_v59, 0.0 }
 0x1d3   :  { %vm1071_vm4 = vcmp.ge.f32.partialorder %v1031_v62, 0.0  ;;  %v1111_v6 = vmul.f32 0.01, %v1031_v62  ;;  %5781 = vmatmul.mubr.bf16.gmra.mrb[4].mxu1 %v5355_v0  ;;  %v1150_v9 = vsel %vm1070_vm2, %v1030_v55, %v1110_v61 }
 0x1d4   :  { %vm1069_vm5 = vcmp.ge.f32.partialorder %v1029_v3, 0.0  ;;  %v1109_v8 = vmul.f32 0.01, %v1029_v3  ;;  %v1148_v11 = vsel %vm1068_vm3, %v1028_v59, %v1108_v2 }
 0x1d5   :  { %v1151_v10 = vsel %vm1071_vm4, %v1031_v62, %v1111_v6  ;;  %5805 = vmatpush3.bf16.msra.mxu1 %v6282_v54 }
 0x1d6   :  { %v1149_v12 = vsel %vm1069_vm5, %v1029_v3, %v1109_v8  ;;  %v5742_v13 = vpop.f32.mrb[20].mxu0  ;;  %v1181_v15 = vmax.f32 %v1150_v9, %v1151_v10  ;;  %5806 = vmatprep.subr.bf16.mxu1 %v6283_v4 }
 0x1d7   :  { %v1034_v18 = vadd.f32 %v5742_v13, %v7129_v35  ;;  %v886_v20 = vpop.f32.mrb[21].mxu0  ;;  %v1180_v21 = vmax.f32 %v1148_v11, %v1149_v12 }
 0x1d8   :  { %v1032_v22 = vadd.f32 %v7129_v35, %v886_v20  ;;  %v5743_v24 = vpop.f32.mrb[22].mxu0 }
 0x1d9   :  { %v1114_v25 = vmul.f32 0.01, %v1034_v18  ;;  %v1035_v26 = vadd.f32 %v5743_v24, %v7129_v35  ;;  %v889_v29 = vpop.f32.mrb[23].mxu0  ;;  %v5356_v1 = vpack.c.bf16 %v1181_v15, %v1180_v21  ;;  %5807 = vmatpush3.bf16.msra.mxu1 %v6283_v4  ;;  %vm1074_vm6 = vcmp.ge.f32.partialorder %v1034_v18, 0.0 }
 0x1da   :  { %v1112_v30 = vmul.f32 0.01, %v1032_v22  ;;  %v1033_v31 = vadd.f32 %v7129_v35, %v889_v29  ;;  %5808 = vmatprep.subr.bf16.mxu1 %v6284_v16  ;;  %v7186_v14 = vpack.c.bf16 %v1180_v21, %v1179_v53  ;;  %vm1072_vm7 = vcmp.ge.f32.partialorder %v1032_v22, 0.0 }
 0x1db   :  { %vm1075_vm8 = vcmp.ge.f32.partialorder %v1035_v26, 0.0  ;;  %v1115_v19 = vmul.f32 0.01, %v1035_v26  ;;  %5784 = vmatprep.mubr.bf16.mxu1 %v5356_v1  ;;  %v1154_v27 = vsel %vm1074_vm6, %v1034_v18, %v1114_v25 }
 0x1dc   :  { %vm1073_vm9 = vcmp.ge.f32.partialorder %v1033_v31, 0.0  ;;  %v1113_v23 = vmul.f32 0.01, %v1033_v31  ;;  %v1152_v33 = vsel %vm1072_vm7, %v1032_v22, %v1112_v30 }
 0x1dd   :  { %v1155_v28 = vsel %vm1075_vm8, %v1035_v26, %v1115_v19  ;;  %5809 = vmatpush3.bf16.msra.mxu1 %v6284_v16 }
 0x1de   :  { %v1153_v36 = vsel %vm1073_vm9, %v1033_v31, %v1113_v23  ;;  %v5746_v37 = vpop.f32.mrb[24].mxu0  ;;  %v1183_v38 = vmax.f32 %v1154_v27, %v1155_v28  ;;  %5810 = vmatprep.subr.bf16.mxu1 %v6285_v7 }
 0x1df   :  { %v1038_v40 = vadd.f32 %v5746_v37, %v7129_v35  ;;  %v902_v34 = vpop.f32.mrb[25].mxu0  ;;  %v1182_v41 = vmax.f32 %v1152_v33, %v1153_v36 }
 0x1e0   :  { %v1036_v42 = vadd.f32 %v7129_v35, %v902_v34  ;;  %v5747_v43 = vpop.f32.mrb[26].mxu0 }
 0x1e1   :  { %v1118_v44 = vmul.f32 0.01, %v1038_v40  ;;  %v1039_v46 = vadd.f32 %v5747_v43, %v7129_v35  ;;  %v905_v47 = vpop.f32.mrb[27].mxu0  ;;  %v5357_v48 = vpack.c.bf16 %v1183_v38, %v1182_v41  ;;  %5811 = vmatpush3.bf16.msra.mxu1 %v6285_v7  ;;  %vm1078_vm10 = vcmp.ge.f32.partialorder %v1038_v40, 0.0 }
 0x1e2   :  { %v1116_v49 = vmul.f32 0.01, %v1036_v42  ;;  %v1037_v50 = vadd.f32 %v7129_v35, %v905_v47  ;;  %5832 = vmatprep.subr.bf16.mxu1 %v7191_v39  ;;  %v7198_v51 = vpack.c.bf16 %v1182_v41, %v1181_v15  ;;  %vm1076_vm11 = vcmp.ge.f32.partialorder %v1036_v42, 0.0 }
 0x1e3   :  { %vm1079_vm12 = vcmp.ge.f32.partialorder %v1039_v46, 0.0  ;;  %v1119_v52 = vmul.f32 0.01, %v1039_v46  ;;  %5785 = vmatmul.mubr.bf16.gmra.mrb[8].mxu1 %v5357_v48  ;;  %v1158_v54 = vsel %vm1078_vm10, %v1038_v40, %v1118_v44  ;;  %vm6717_vm10 = vmmov 0  }
 0x1e4   :  { %vm1077_vm13 = vcmp.ge.f32.partialorder %v1037_v50, 0.0  ;;  %v1117_v53 = vmul.f32 0.01, %v1037_v50  ;;  %v1156_v57 = vsel %vm1076_vm11, %v1036_v42, %v1116_v49 }
 0x1e5   :  { %v1159_v55 = vsel %vm1079_vm12, %v1039_v46, %v1119_v52 }
 0x1e6   :  { %v1157_v58 = vsel %vm1077_vm13, %v1037_v50, %v1117_v53  ;;  %v5750_v59 = vpop.f32.mrb[28].mxu0  ;;  %v1185_v60 = vmax.f32 %v1158_v54, %v1159_v55 }
 0x1e7   :  { %v1042_v61 = vadd.f32 %v5750_v59, %v7129_v35  ;;  %v918_v62 = vpop.f32.mrb[29].mxu0  ;;  %v1184_v63 = vmax.f32 %v1156_v57, %v1157_v58 }
 0x1e8   :  { %v1040_v0 = vadd.f32 %v7129_v35, %v918_v62  ;;  %v5751_v2 = vpop.f32.mrb[30].mxu0  ;;  %v1192_v62 = vpack.c.bf16 %v7136_v56, %v7136_v56  ;;  %v6288_v56 = vld [vmem:[%s7525_s3 + $0x90] sm:$0xff]  }
 0x1e9   :  { %v1122_v3 = vmul.f32 0.01, %v1042_v61  ;;  %v1043_v4 = vadd.f32 %v5751_v2, %v7129_v35  ;;  %v921_v6 = vpop.f32.mrb[31].mxu0  ;;  %v5358_v8 = vpack.c.bf16 %v1185_v60, %v1184_v63  ;;  %vm1082_vm14 = vcmp.ge.f32.partialorder %v1042_v61, 0.0 }
 0x1ea   :  { %v1120_v9 = vmul.f32 0.01, %v1040_v0  ;;  %v1041_v10 = vadd.f32 %v7129_v35, %v921_v6  ;;  %v7204_v11 = vpack.c.bf16 %v1184_v63, %v1183_v38  ;;  %vm1080_vm15 = vcmp.ge.f32.partialorder %v1040_v0, 0.0 }
 0x1eb   :  { %vm1083_vm0 = vcmp.ge.f32.partialorder %v1043_v4, 0.0  ;;  %v1123_v12 = vmul.f32 0.01, %v1043_v4  ;;  %5788 = vmatprep.mubr.bf16.mxu1 %v5358_v8  ;;  %v1162_v15 = vsel %vm1082_vm14, %v1042_v61, %v1122_v3  ;;  %v5031_v6 = vcombine.low %v6715_v32, %v1192_v62  ;;  %v6287_v8 = vld [vmem:[%s7525_s3 + $0x88] sm:$0xff]  }
 0x1ec   :  { %vm1081_vm1 = vcmp.ge.f32.partialorder %v1041_v10, 0.0  ;;  %v1121_v13 = vmul.f32 0.01, %v1041_v10  ;;  %v1160_v18 = vsel %vm1080_vm15, %v1040_v0, %v1120_v9  ;;  %v6289_v9 = vld [vmem:[%s7525_s3 + $0x98] sm:$0xff]  }
 0x1ed   :  { %v1163_v16 = vsel %vm1083_vm0, %v1043_v4, %v1123_v12  ;;  %v6292_v12 = vld [vmem:[%s7525_s3 + $0xb0] sm:$0xff]  }
 0x1ee   :  { %v1161_v20 = vsel %vm1081_vm1, %v1041_v10, %v1121_v13  ;;  %v5754_v21 = vpop.f32.mrb[32].mxu0  ;;  %v1187_v22 = vmax.f32 %v1162_v15, %v1163_v16  ;;  %v6291_v10 = vld [vmem:[%s7525_s3 + $0xa8] sm:$0xff]   ;;  %v6293_v13 = vld [vmem:[%s7525_s3 + $0xb8] sm:$0xff]   ;;  %v6716_v15 = vmov 0.0   ;;  %v6294_v16 = vld [vmem:[#allocation2 + $0x40] sm:$0xff]  }
 0x1ef   :  { %v1046_v24 = vadd.f32 %v5754_v21, %v7129_v35  ;;  %v934_v25 = vpop.f32.mrb[33].mxu0  ;;  %v1186_v26 = vmax.f32 %v1160_v18, %v1161_v20  ;;  %v6295_v18 = vld [vmem:[#allocation2 + $0x48] sm:$0xff]   ;;  %v6296_v20 = vld [vmem:[#allocation2 + $0x50] sm:$0xff]   ;;  %v6297_v21 = vld [vmem:[#allocation2 + $0x58] sm:$0xff]  }
 0x1f0   :  { %v1044_v29 = vadd.f32 %v7129_v35, %v934_v25  ;;  %v5755_v1 = vpop.f32.mrb[34].mxu0 }
 0x1f1   :  { %v1126_v30 = vmul.f32 0.01, %v1046_v24  ;;  %v1047_v31 = vadd.f32 %v5755_v1, %v7129_v35  ;;  %v937_v7 = vpop.f32.mrb[35].mxu0  ;;  %v5359_v19 = vpack.c.bf16 %v1187_v22, %v1186_v26  ;;  %vm1086_vm2 = vcmp.ge.f32.partialorder %v1046_v24, 0.0 }
 0x1f2   :  { %v1124_v23 = vmul.f32 0.01, %v1044_v29  ;;  %v1045_v27 = vadd.f32 %v7129_v35, %v937_v7  ;;  %v7210_v28 = vpack.c.bf16 %v1186_v26, %v1185_v60  ;;  %vm1084_vm3 = vcmp.ge.f32.partialorder %v1044_v29, 0.0 }
 0x1f3   :  { %vm1087_vm4 = vcmp.ge.f32.partialorder %v1047_v31, 0.0  ;;  %v1127_v33 = vmul.f32 0.01, %v1047_v31  ;;  %5789 = vmatmul.mubr.bf16.gmra.mrb[12].mxu1 %v5359_v19  ;;  %v1166_v37 = vsel %vm1086_vm2, %v1046_v24, %v1126_v30 }
 0x1f4   :  { %vm1085_vm5 = vcmp.ge.f32.partialorder %v1045_v27, 0.0  ;;  %v1125_v36 = vmul.f32 0.01, %v1045_v27  ;;  %v1164_v40 = vsel %vm1084_vm3, %v1044_v29, %v1124_v23 }
 0x1f5   :  { %v1167_v38 = vsel %vm1087_vm4, %v1047_v31, %v1127_v33 }
 0x1f6   :  { %v1165_v34 = vsel %vm1085_vm5, %v1045_v27, %v1125_v36  ;;  %v5758_v41 = vpop.f32.mrb[36].mxu0  ;;  %v1189_v42 = vmax.f32 %v1166_v37, %v1167_v38 }
 0x1f7   :  { %v1050_v43 = vadd.f32 %v5758_v41, %v7129_v35  ;;  %v950_v44 = vpop.f32.mrb[37].mxu0  ;;  %v1188_v46 = vmax.f32 %v1164_v40, %v1165_v34 }
 0x1f8   :  { %v1048_v47 = vadd.f32 %v7129_v35, %v950_v44  ;;  %v5759_v48 = vpop.f32.mrb[38].mxu0 }
 0x1f9   :  { %v1130_v49 = vmul.f32 0.01, %v1050_v43  ;;  %v1051_v50 = vadd.f32 %v5759_v48, %v7129_v35  ;;  %v953_v52 = vpop.f32.mrb[39].mxu0  ;;  %v5360_v53 = vpack.c.bf16 %v1189_v42, %v1188_v46  ;;  %vm1090_vm6 = vcmp.ge.f32.partialorder %v1050_v43, 0.0 }
 0x1fa   :  { %v1128_v54 = vmul.f32 0.01, %v1048_v47  ;;  %v1049_v55 = vadd.f32 %v7129_v35, %v953_v52  ;;  %v7216_v57 = vpack.c.bf16 %v1188_v46, %v1187_v22  ;;  %vm1088_vm7 = vcmp.ge.f32.partialorder %v1048_v47, 0.0  ;;  %v7279_v22 = vld [vmem:[%s7526_s4] ss:$0 sm:$0xff] }
 0x1fb   :  { %vm1091_vm8 = vcmp.ge.f32.partialorder %v1051_v50, 0.0  ;;  %v1131_v58 = vmul.f32 0.01, %v1051_v50  ;;  %5792 = vmatprep.mubr.bf16.mxu1 %v5360_v53  ;;  %v1170_v60 = vsel %vm1090_vm6, %v1050_v43, %v1130_v49 }
 0x1fc   :  { %vm1089_vm9 = vcmp.ge.f32.partialorder %v1049_v55, 0.0  ;;  %v1129_v59 = vmul.f32 0.01, %v1049_v55  ;;  %v1168_v63 = vsel %vm1088_vm7, %v1048_v47, %v1128_v54  ;;  %v6302_v47 = vld [vmem:[#allocation2] sm:$0xff]  }
 0x1fd   :  { %v1171_v61 = vsel %vm1091_vm8, %v1051_v50, %v1131_v58 }
 0x1fe   :  { %v1169_v0 = vsel %vm1089_vm9, %v1049_v55, %v1129_v59  ;;  %v7220_v2 = vmax.f32 %v1170_v60, %v1171_v61 }
 0x1ff   :  { %v1190_v3 = vmax.f32 %v1168_v63, %v1169_v0 }
 0x201   :  { %v5361_v35 = vpack.c.bf16 %v7220_v2, %v1190_v3  ;;  %v5370_v4 = vpack.c.bf16 %v1190_v3, %v1189_v42 }
 0x203   :  { %5793 = vmatmul.mubr.bf16.gmra.mrb[16].mxu1 %v5361_v35 }
 0x204   :  { %5812 = vmatprep.mubr.bf16.mxu1 %v5031_v6 }
 0x20b   :  { %5813 = vmatmul.mubr.bf16.vlgmr.msra.gmra.mrb[0].mxu1 %v7144_v17 }
 0x20c   :  { %5816 = vmatprep.mubr.bf16.mxu1 %v7162_v45  ;;  %5833 = vmatpush3.bf16.msra.mxu1 %v7191_v39  ;;  %v6290_v39 = vld [vmem:[%s7525_s3 + $0xa0] sm:$0xff]  }
 0x20d   :  { %5834 = vmatprep.subr.bf16.mxu1 %v6287_v8 }
 0x210   :  { %5835 = vmatpush3.bf16.msra.mxu1 %v6287_v8 }
 0x211   :  { %5836 = vmatprep.subr.bf16.mxu1 %v6288_v56 }
 0x213   :  { %5817 = vmatmul.mubr.bf16.gmra.mrb[4].mxu1 %v7174_v5 }
 0x214   :  { %5820 = vmatprep.mubr.bf16.mxu1 %v7186_v14  ;;  %5837 = vmatpush3.bf16.msra.mxu1 %v6288_v56 }
 0x215   :  { %5838 = vmatprep.subr.bf16.mxu1 %v6289_v9 }
 0x218   :  { %5839 = vmatpush3.bf16.msra.mxu1 %v6289_v9 }
 0x219   :  { %5840 = vmatprep.subr.bf16.mxu1 %v6290_v39 }
 0x21b   :  { %5821 = vmatmul.mubr.bf16.gmra.mrb[8].mxu1 %v7198_v51 }
 0x21c   :  { %5824 = vmatprep.mubr.bf16.mxu1 %v7204_v11  ;;  %5841 = vmatpush3.bf16.msra.mxu1 %v6290_v39  ;;  %v6304_v39 = vld [vmem:[#allocation2 + $0x10] sm:$0xff]  }
 0x21d   :  { %5842 = vmatprep.subr.bf16.mxu1 %v6291_v10 }
 0x220   :  { %5843 = vmatpush3.bf16.msra.mxu1 %v6291_v10 }
 0x221   :  { %5844 = vmatprep.subr.bf16.mxu1 %v6292_v12 }
 0x223   :  { %5825 = vmatmul.mubr.bf16.gmra.mrb[12].mxu1 %v7210_v28 }
 0x224   :  { %5828 = vmatprep.mubr.bf16.mxu1 %v7216_v57  ;;  %5845 = vmatpush3.bf16.msra.mxu1 %v6292_v12 }
 0x225   :  { %5846 = vmatprep.subr.bf16.mxu1 %v6293_v13 }
 0x228   :  { %5847 = vmatpush3.bf16.msra.mxu1 %v6293_v13 }
 0x229   :  { %5868 = vmatprep.subr.bf16.mxu1 %v6716_v15 }
 0x22b   :  { %5829 = vmatmul.mubr.bf16.gmra.mrb[16].mxu1 %v5370_v4 }
 0x22c   :  { %5848 = vmatprep.mubr.bf16.mxu1 %v7144_v17  ;;  %v6298_v17 = vld [vmem:[#allocation2 + $0x60] sm:$0xff]  }
 0x233   :  { %5849 = vmatmul.mubr.bf16.vlgmr.msra.gmra.mrb[0].mxu1 %v7162_v45  ;;  %v6299_v45 = vld [vmem:[#allocation2 + $0x68] sm:$0xff]  }
 0x234   :  { %5852 = vmatprep.mubr.bf16.mxu1 %v7174_v5  ;;  %5869 = vmatpush3.bf16.msra.mxu1 %v6294_v16  ;;  %v1211_v5 = vpack.c.bf16 %v7220_v2, %v7220_v2 }
 0x235   :  { %5870 = vmatprep.subr.bf16.mxu1 %v6716_v15 }
 0x238   :  { %5871 = vmatpush3.bf16.msra.mxu1 %v6295_v18 }
 0x239   :  { %5872 = vmatprep.subr.bf16.mxu1 %v6716_v15 }
 0x23b   :  { %5853 = vmatmul.mubr.bf16.gmra.mrb[4].mxu1 %v7186_v14  ;;  %v5065_v14 = vcombine.low %v1211_v5, %v6715_v32 }
 0x23c   :  { %5856 = vmatprep.mubr.bf16.mxu1 %v7198_v51  ;;  %5873 = vmatpush3.bf16.msra.mxu1 %v6296_v20  ;;  %v6300_v51 = vld [vmem:[#allocation2 + $0x70] sm:$0xff]  }
 0x23d   :  { %5874 = vmatprep.subr.bf16.mxu1 %v6716_v15 }
 0x240   :  { %5875 = vmatpush3.bf16.msra.mxu1 %v6297_v21 }
 0x241   :  { %5876 = vmatprep.subr.bf16.mxu1 %v6716_v15 }
 0x243   :  { %5857 = vmatmul.mubr.bf16.gmra.mrb[8].mxu1 %v7204_v11  ;;  %v6301_v11 = vld [vmem:[#allocation2 + $0x78] sm:$0xff]  }
 0x244   :  { %5860 = vmatprep.mubr.bf16.mxu1 %v7210_v28  ;;  %5877 = vmatpush3.bf16.msra.mxu1 %v6298_v17 }
 0x245   :  { %5878 = vmatprep.subr.bf16.mxu1 %v6716_v15 }
 0x248   :  { %5879 = vmatpush3.bf16.msra.mxu1 %v6299_v45  ;;  %v6305_v45 = vld [vmem:[#allocation2 + $0x18] sm:$0xff]  }
 0x249   :  { %5880 = vmatprep.subr.bf16.mxu1 %v6716_v15 }
 0x24b   :  { %5861 = vmatmul.mubr.bf16.gmra.mrb[12].mxu1 %v7216_v57  ;;  %v6303_v57 = vld [vmem:[#allocation2 + $0x8] sm:$0xff]  }
 0x24c   :  { %5864 = vmatprep.mubr.bf16.mxu1 %v5370_v4  ;;  %5881 = vmatpush3.bf16.msra.mxu1 %v6300_v51 }
 0x24d   :  { %5882 = vmatprep.subr.bf16.mxu1 %v6716_v15 }
 0x250   :  { %5883 = vmatpush3.bf16.msra.mxu1 %v6301_v11 }
 0x251   :  { %5904 = vmatprep.subr.bf16.mxu1 %v6716_v15 }
 0x253   :  { %5865 = vmatmul.mubr.bf16.gmra.mrb[16].mxu1 %v5065_v14 }
 0x254   :  { %5884 = vmatprep.mubr.msk.bf16.mxu1 %vm6717_vm10, %v6716_v15 }
 0x306   :  { %v5850_v24 = vpop.f32.mrb[0].mxu1 }
 0x307   :  { %v1858_v25 = vadd.f32 %v5850_v24, %v7279_v22  ;;  %v1750_v26 = vpop.f32.mrb[1].mxu1 }
 0x308   :  { %v1856_v29 = vadd.f32 %v7279_v22, %v1750_v26  ;;  %v5851_v1 = vpop.f32.mrb[2].mxu1 }
 0x309   :  { %v1898_v30 = vmul.f32 0.01, %v1858_v25  ;;  %v1859_v31 = vadd.f32 %v5851_v1, %v7279_v22  ;;  %v1753_v7 = vpop.f32.mrb[3].mxu1  ;;  %vm1878_vm11 = vcmp.ge.f32.partialorder %v1858_v25, 0.0 }
 0x30a   :  { %v1896_v19 = vmul.f32 0.01, %v1856_v29  ;;  %v1857_v23 = vadd.f32 %v7279_v22, %v1753_v7  ;;  %vm1876_vm12 = vcmp.ge.f32.partialorder %v1856_v29, 0.0 }
 0x30b   :  { %vm1879_vm13 = vcmp.ge.f32.partialorder %v1859_v31, 0.0  ;;  %v1899_v27 = vmul.f32 0.01, %v1859_v31  ;;  %v1918_v33 = vsel %vm1878_vm11, %v1858_v25, %v1898_v30 }
 0x30c   :  { %vm1877_vm14 = vcmp.ge.f32.partialorder %v1857_v23, 0.0  ;;  %v1897_v28 = vmul.f32 0.01, %v1857_v23  ;;  %v1916_v37 = vsel %vm1876_vm12, %v1856_v29, %v1896_v19 }
 0x30d   :  { %v1919_v36 = vsel %vm1879_vm13, %v1859_v31, %v1899_v27 }
 0x30e   :  { %v1937_v38 = vmax.f32 %v1918_v33, %v1919_v36  ;;  %v1917_v40 = vsel %vm1877_vm14, %v1857_v23, %v1897_v28  ;;  %v5854_v34 = vpop.f32.mrb[4].mxu1  ;;  %v6306_v23 = vld [vmem:[#allocation2 + $0x20] sm:$0xff]  }
 0x30f   :  { %v7285_v41 = vmax.f32 %v1916_v37, %v1917_v40  ;;  %v1862_v42 = vadd.f32 %v5854_v34, %v7279_v22  ;;  %v1766_v43 = vpop.f32.mrb[5].mxu1  ;;  %v6307_v34 = vld [vmem:[#allocation2 + $0x28] sm:$0xff]  }
 0x310   :  { %v1860_v44 = vadd.f32 %v7279_v22, %v1766_v43  ;;  %v5855_v46 = vpop.f32.mrb[6].mxu1 }
 0x311   :  { %v5371_v48 = vpack.c.bf16 %v1937_v38, %v7285_v41  ;;  %v1769_v49 = vpop.f32.mrb[7].mxu1  ;;  %v1902_v50 = vmul.f32 0.01, %v1862_v42  ;;  %v1863_v52 = vadd.f32 %v5855_v46, %v7279_v22  ;;  %vm1882_vm15 = vcmp.ge.f32.partialorder %v1862_v42, 0.0 }
 0x312   :  { %v1861_v53 = vadd.f32 %v7279_v22, %v1769_v49  ;;  %v1900_v54 = vmul.f32 0.01, %v1860_v44  ;;  %vm1880_vm0 = vcmp.ge.f32.partialorder %v1860_v44, 0.0 }
 0x313   :  { %5885 = vmatmul.mubr.bf16.vlgmr.msra.gmra.mrb[20].mxu1 %v5371_v48  ;;  %vm1883_vm1 = vcmp.ge.f32.partialorder %v1863_v52, 0.0  ;;  %v1903_v55 = vmul.f32 0.01, %v1863_v52  ;;  %v1922_v59 = vsel %vm1882_vm15, %v1862_v42, %v1902_v50 }
 0x314   :  { %vm1881_vm2 = vcmp.ge.f32.partialorder %v1861_v53, 0.0  ;;  %5905 = vmatpush3.bf16.msra.mxu1 %v6302_v47  ;;  %5888 = vmatprep.mubr.msk.bf16.mxu1 %vm6717_vm10, %v6716_v15  ;;  %v1901_v58 = vmul.f32 0.01, %v1861_v53  ;;  %v1920_v62 = vsel %vm1880_vm0, %v1860_v44, %v1900_v54 }
 0x315   :  { %5906 = vmatprep.subr.bf16.mxu1 %v6716_v15  ;;  %v1923_v60 = vsel %vm1883_vm1, %v1863_v52, %v1903_v55 }
 0x316   :  { %v5858_v61 = vpop.f32.mrb[8].mxu1  ;;  %v1921_v63 = vsel %vm1881_vm2, %v1861_v53, %v1901_v58  ;;  %v1939_v3 = vmax.f32 %v1922_v59, %v1923_v60  ;;  %v6308_v58 = vld [vmem:[#allocation2 + $0x30] sm:$0xff]  }
 0x317   :  { %v1866_v0 = vadd.f32 %v5858_v61, %v7279_v22  ;;  %v1782_v2 = vpop.f32.mrb[9].mxu1  ;;  %v1938_v6 = vmax.f32 %v1920_v62, %v1921_v63 }
 0x318   :  { %v1864_v35 = vadd.f32 %v7279_v22, %v1782_v2  ;;  %v5859_v4 = vpop.f32.mrb[10].mxu1  ;;  %5907 = vmatpush3.bf16.msra.mxu1 %v6303_v57 }
 0x319   :  { %v1906_v8 = vmul.f32 0.01, %v1866_v0  ;;  %v1867_v56 = vadd.f32 %v5859_v4, %v7279_v22  ;;  %v1785_v9 = vpop.f32.mrb[11].mxu1  ;;  %5908 = vmatprep.subr.bf16.mxu1 %v6716_v15  ;;  %vm1886_vm3 = vcmp.ge.f32.partialorder %v1866_v0, 0.0  ;;  %v5372_v13 = vpack.c.bf16 %v1939_v3, %v1938_v6 }
 0x31a   :  { %v1904_v10 = vmul.f32 0.01, %v1864_v35  ;;  %v1865_v12 = vadd.f32 %v7279_v22, %v1785_v9  ;;  %vm1884_vm4 = vcmp.ge.f32.partialorder %v1864_v35, 0.0  ;;  %v7300_v18 = vpack.c.bf16 %v1938_v6, %v1937_v38 }
 0x31b   :  { %vm1887_vm5 = vcmp.ge.f32.partialorder %v1867_v56, 0.0  ;;  %v1907_v16 = vmul.f32 0.01, %v1867_v56  ;;  %5889 = vmatmul.mubr.bf16.gmra.mrb[24].mxu1 %v5372_v13  ;;  %v1926_v21 = vsel %vm1886_vm3, %v1866_v0, %v1906_v8  ;;  %v1946_v9 = vpack.c.bf16 %v7285_v41, %v7285_v41  ;;  %v6312_v13 = vld [vmem:[#allocation2 + $0x90] sm:$0xff]   ;;  %v6313_v41 = vld [vmem:[#allocation2 + $0x98] sm:$0xff]  }
 0x31c   :  { %vm1885_vm6 = vcmp.ge.f32.partialorder %v1865_v12, 0.0  ;;  %v1905_v20 = vmul.f32 0.01, %v1865_v12  ;;  %5909 = vmatpush3.bf16.msra.mxu1 %v6304_v39  ;;  %5892 = vmatprep.mubr.msk.bf16.mxu1 %vm6717_vm10, %v6716_v15  ;;  %v1924_v5 = vsel %vm1884_vm4, %v1864_v35, %v1904_v10  ;;  %v6310_v39 = vld [vmem:[#allocation2 + $0x80] sm:$0xff]  }
 0x31d   :  { %v1927_v17 = vsel %vm1887_vm5, %v1867_v56, %v1907_v16  ;;  %5910 = vmatprep.subr.bf16.mxu1 %v6716_v15  ;;  %v5088_v10 = vcombine.low %v6715_v32, %v1946_v9  ;;  %v6314_v16 = vld [vmem:[#allocation2 + $0xa0] sm:$0xff]  }
 0x31e   :  { %v1925_v14 = vsel %vm1885_vm6, %v1865_v12, %v1905_v20  ;;  %v5862_v51 = vpop.f32.mrb[12].mxu1  ;;  %v1941_v11 = vmax.f32 %v1926_v21, %v1927_v17  ;;  %v6311_v12 = vld [vmem:[#allocation2 + $0x88] sm:$0xff]   ;;  %v6316_v21 = vld [vmem:[#allocation2 + $0xb0] sm:$0xff]   ;;  %v6317_v17 = vld [vmem:[#allocation2 + $0xb8] sm:$0xff]  }
 0x31f   :  { %v1870_v24 = vadd.f32 %v5862_v51, %v7279_v22  ;;  %v1798_v25 = vpop.f32.mrb[13].mxu1  ;;  %v1940_v26 = vmax.f32 %v1924_v5, %v1925_v14  ;;  %v6315_v20 = vld [vmem:[#allocation2 + $0xa8] sm:$0xff]   ;;  %v6320_v5 = vld [vmem:[#allocation4 + $0x144] ss:$20 sps:$4 sm:$0xff]  }
 0x320   :  { %v1868_v29 = vadd.f32 %v7279_v22, %v1798_v25  ;;  %v5863_v1 = vpop.f32.mrb[14].mxu1  ;;  %5911 = vmatpush3.bf16.msra.mxu1 %v6305_v45  ;;  %v6318_v45 = vld [vmem:[#allocation4 + $0x140] ss:$20 sps:$4 sm:$0xff]   ;;  %2783 = vmatprep.subr.bf16.mxu0 %v6320_v5  ;;  %v6321_v51 = vld [vmem:[#allocation4 + $0x168] ss:$20 sps:$4 sm:$0xff]  }
 0x321   :  { %v1910_v30 = vmul.f32 0.01, %v1870_v24  ;;  %v1871_v31 = vadd.f32 %v5863_v1, %v7279_v22  ;;  %v1801_v7 = vpop.f32.mrb[15].mxu1  ;;  %v5373_v19 = vpack.c.bf16 %v1941_v11, %v1940_v26  ;;  %vm1890_vm7 = vcmp.ge.f32.partialorder %v1870_v24, 0.0  ;;  %5912 = vmatprep.subr.bf16.mxu1 %v6716_v15  ;;  %2784 = vmatpush1.bf16.msra.mxu0 %v6318_v45  ;;  %v6326_v25 = vld [vmem:[#allocation4 + $0x194] ss:$20 sps:$4 sm:$0xff]  }
 0x322   :  { %v1908_v27 = vmul.f32 0.01, %v1868_v29  ;;  %v1869_v28 = vadd.f32 %v7279_v22, %v1801_v7  ;;  %v7310_v33 = vpack.c.bf16 %v1940_v26, %v1939_v3  ;;  %vm1888_vm8 = vcmp.ge.f32.partialorder %v1868_v29, 0.0  ;;  %v6309_v3 = vld [vmem:[#allocation2 + $0x38] sm:$0xff]   ;;  %v6330_v1 = vld [vmem:[#allocation4 + $0x1e0] ss:$20 sps:$4 sm:$0xff]  }
 0x323   :  { %vm1891_vm9 = vcmp.ge.f32.partialorder %v1871_v31, 0.0  ;;  %v1911_v36 = vmul.f32 0.01, %v1871_v31  ;;  %5893 = vmatmul.mubr.bf16.gmra.mrb[28].mxu1 %v5373_v19  ;;  %v1930_v38 = vsel %vm1890_vm7, %v1870_v24, %v1910_v30  ;;  %v6324_v24 = vld [vmem:[#allocation4 + $0x190] ss:$20 sps:$4 sm:$0xff]  }
 0x324   :  { %vm1889_vm11 = vcmp.ge.f32.partialorder %v1869_v28, 0.0  ;;  %v1909_v37 = vmul.f32 0.01, %v1869_v28  ;;  %5913 = vmatpush3.bf16.msra.mxu1 %v6306_v23  ;;  %5896 = vmatprep.mubr.msk.bf16.mxu1 %vm6717_vm10, %v6716_v15  ;;  %v1928_v42 = vsel %vm1888_vm8, %v1868_v29, %v1908_v27  ;;  %v6327_v26 = vld [vmem:[#allocation4 + $0x1b8] ss:$20 sps:$4 sm:$0xff]  }
 0x325   :  { %v1931_v40 = vsel %vm1891_vm9, %v1871_v31, %v1911_v36  ;;  %5914 = vmatprep.subr.bf16.mxu1 %v6716_v15  ;;  %v6329_v29 = vld [vmem:[#allocation4 + $0x1bc] ss:$20 sps:$4 sm:$0xff]   ;;  %v6332_v30 = vld [vmem:[#allocation4 + $0x1e4] ss:$20 sps:$4 sm:$0xff]   ;;  %v6335_v7 = vld [vmem:[#allocation4 + $0x14c] ss:$20 sps:$4 sm:$0xff]  }
 0x326   :  { %v1929_v43 = vsel %vm1889_vm11, %v1869_v28, %v1909_v37  ;;  %v5866_v44 = vpop.f32.mrb[16].mxu1  ;;  %v1943_v46 = vmax.f32 %v1930_v38, %v1931_v40  ;;  %v6333_v31 = vld [vmem:[#allocation4 + $0x148] ss:$20 sps:$4 sm:$0xff]   ;;  %v6338_v27 = vld [vmem:[#allocation4 + $0x20c] ss:$20 sps:$4 sm:$0xff]  }
 0x327   :  { %v1874_v47 = vadd.f32 %v5866_v44, %v7279_v22  ;;  %v1814_v48 = vpop.f32.mrb[17].mxu1  ;;  %v1942_v49 = vmax.f32 %v1928_v42, %v1929_v43  ;;  %v6341_v19 = vld [vmem:[#allocation4 + $0x174] ss:$20 sps:$4 sm:$0xff]   ;;  %v6339_v28 = vld [vmem:[#allocation4 + $0x170] ss:$20 sps:$4 sm:$0xff]  }
 0x328   :  { %v1872_v50 = vadd.f32 %v7279_v22, %v1814_v48  ;;  %v5867_v52 = vpop.f32.mrb[18].mxu1  ;;  %5915 = vmatpush3.bf16.msra.mxu1 %v6307_v34  ;;  %v6336_v23 = vld [vmem:[#allocation4 + $0x208] ss:$20 sps:$4 sm:$0xff]   ;;  %v6347_v37 = vld [vmem:[#allocation4 + $0x1c4] ss:$20 sps:$4 sm:$0xff]  }
 0x329   :  { %v1914_v53 = vmul.f32 0.01, %v1874_v47  ;;  %v1875_v54 = vadd.f32 %v5867_v52, %v7279_v22  ;;  %v1817_v55 = vpop.f32.mrb[19].mxu1  ;;  %v5374_v57 = vpack.c.bf16 %v1943_v46, %v1942_v49  ;;  %vm1894_vm12 = vcmp.ge.f32.partialorder %v1874_v47, 0.0  ;;  %5916 = vmatprep.subr.bf16.mxu1 %v6716_v15  ;;  %v6344_v36 = vld [vmem:[#allocation4 + $0x19c] ss:$20 sps:$4 sm:$0xff]  }
 0x32a   :  { %v1912_v59 = vmul.f32 0.01, %v1872_v50  ;;  %v1873_v60 = vadd.f32 %v7279_v22, %v1817_v55  ;;  %v5378_v61 = vpack.c.bf16 %v1942_v49, %v1941_v11  ;;  %vm1892_vm13 = vcmp.ge.f32.partialorder %v1872_v50, 0.0  ;;  %v6323_v11 = vld [vmem:[#allocation4 + $0x16c] ss:$20 sps:$4 sm:$0xff]  }
 0x32b   :  { %vm1895_vm14 = vcmp.ge.f32.partialorder %v1875_v54, 0.0  ;;  %v1915_v62 = vmul.f32 0.01, %v1875_v54  ;;  %5897 = vmatmul.mubr.bf16.gmra.mrb[32].mxu1 %v5374_v57  ;;  %v1934_v0 = vsel %vm1894_vm12, %v1874_v47, %v1914_v53  ;;  %2785 = vmatprep.subr.bf16.mxu0 %v6323_v11  ;;  %v6345_v38 = vld [vmem:[#allocation4 + $0x1c0] ss:$20 sps:$4 sm:$0xff]  }
 0x32c   :  { %vm1893_vm15 = vcmp.ge.f32.partialorder %v1873_v60, 0.0  ;;  %v1913_v63 = vmul.f32 0.01, %v1873_v60  ;;  %5900 = vmatprep.mubr.msk.bf16.mxu1 %vm6717_vm10, %v6716_v15  ;;  %5917 = vmatpush3.bf16.msra.mxu1 %v6308_v58  ;;  %v1932_v35 = vsel %vm1892_vm13, %v1872_v50, %v1912_v59  ;;  %v6353_v40 = vld [vmem:[#allocation4 + $0x1ec] ss:$20 sps:$4 sm:$0xff]  }
 0x32d   :  { %v1935_v2 = vsel %vm1895_vm14, %v1875_v54, %v1915_v62  ;;  %5918 = vmatprep.subr.bf16.mxu1 %v6716_v15  ;;  %2786 = vmatpush1.bf16.msra.mxu0 %v6321_v51  ;;  %v6351_v34 = vld [vmem:[#allocation4 + $0x1e8] ss:$20 sps:$4 sm:$0xff]   ;;  %v6348_v43 = vld [vmem:[#allocation4 + $0x230] ss:$20 sps:$4 sm:$0xff]   ;;  %v6360_v48 = vld [vmem:[#allocation4 + $0x238] ss:$20 sps:$4 sm:$0xff]  }
 0x32e   :  { %v1933_v4 = vsel %vm1893_vm15, %v1873_v60, %v1913_v63  ;;  %v1945_v6 = vmax.f32 %v1934_v0, %v1935_v2  ;;  %2787 = vmatprep.subr.bf16.mxu0 %v6326_v25  ;;  %v6356_v42 = vld [vmem:[#allocation4 + $0x214] ss:$20 sps:$4 sm:$0xff]   ;;  %v6362_v47 = vld [vmem:[#allocation4 + $0x23c] ss:$20 sps:$4 sm:$0xff]   ;;  %v6365_v50 = vld [vmem:[#allocation4 + $0x264] ss:$20 sps:$4 sm:$0xff]  }
 0x32f   :  { %v1944_v22 = vmax.f32 %v1932_v35, %v1933_v4  ;;  %v6350_v44 = vld [vmem:[#allocation4 + $0x234] ss:$20 sps:$4 sm:$0xff]   ;;  %v6359_v49 = vld [vmem:[#allocation4 + $0x25c] ss:$20 sps:$4 sm:$0xff]   ;;  %v6357_v52 = vld [vmem:[#allocation4 + $0x258] ss:$20 sps:$4 sm:$0xff]  }
 0x330   :  { %5919 = vmatpush3.bf16.msra.mxu1 %v6309_v3  ;;  %v6363_v53 = vld [vmem:[#allocation4 + $0x260] ss:$20 sps:$4 sm:$0xff]   ;;  %v6368_v54 = vld [vmem:[#allocation4 + $0x4] ss:$20 sps:$4 sm:$0xff]  }
 0x331   :  { %v5375_v8 = vpack.c.bf16 %v1945_v6, %v1944_v22  ;;  %v5379_v56 = vpack.c.bf16 %v1944_v22, %v1943_v46  ;;  %5940 = vmatprep.subr.bf16.mxu1 %v6716_v15  ;;  %2788 = vmatpush1.bf16.msra.mxu0 %v6324_v24  ;;  %v6354_v46 = vld [vmem:[#allocation4 + $0x210] ss:$20 sps:$4 sm:$0xff]  }
 0x332   :  { %2789 = vmatprep.subr.bf16.mxu0 %v6329_v29 }
 0x333   :  { %5901 = vmatmul.mubr.bf16.gmra.mrb[36].mxu1 %v5375_v8 }
 0x334   :  { %5920 = vmatprep.mubr.msk.bf16.mxu1 %vm6717_vm10, %v6716_v15 }
 0x335   :  { %2790 = vmatpush1.bf16.msra.mxu0 %v6327_v26 }
 0x336   :  { %2791 = vmatprep.subr.bf16.mxu0 %v6332_v30 }
 0x339   :  { %2792 = vmatpush1.bf16.msra.mxu0 %v6330_v1 }
 0x33a   :  { %2793 = vmatprep.subr.bf16.mxu0 %v6338_v27 }
 0x33b   :  { %5921 = vmatmul.mubr.bf16.vlgmr.msra.gmra.mrb[40].mxu1 %v5088_v10 }
 0x33c   :  { %5941 = vmatpush3.bf16.msra.mxu1 %v6310_v39  ;;  %5924 = vmatprep.mubr.msk.bf16.mxu1 %vm6717_vm10, %v6716_v15 }
 0x33d   :  { %5942 = vmatprep.subr.bf16.mxu1 %v6716_v15  ;;  %2794 = vmatpush1.bf16.msra.mxu0 %v6336_v23 }
 0x33e   :  { %2795 = vmatprep.subr.bf16.mxu0 %v6350_v44 }
 0x340   :  { %5943 = vmatpush3.bf16.msra.mxu1 %v6311_v12 }
 0x341   :  { %5944 = vmatprep.subr.bf16.mxu1 %v6716_v15  ;;  %2796 = vmatpush1.bf16.msra.mxu0 %v6348_v43 }
 0x342   :  { %2797 = vmatprep.subr.bf16.mxu0 %v6359_v49 }
 0x343   :  { %5925 = vmatmul.mubr.bf16.gmra.mrb[44].mxu1 %v7300_v18 }
 0x344   :  { %5945 = vmatpush3.bf16.msra.mxu1 %v6312_v13  ;;  %5928 = vmatprep.mubr.msk.bf16.mxu1 %vm6717_vm10, %v6716_v15 }
 0x345   :  { %5946 = vmatprep.subr.bf16.mxu1 %v6716_v15  ;;  %2798 = vmatpush1.bf16.msra.mxu0 %v6357_v52 }
 0x346   :  { %5976 = vmatprep.subr.bf16.mxu0 %v6716_v15 }
 0x348   :  { %5947 = vmatpush3.bf16.msra.mxu1 %v6313_v41 }
 0x349   :  { %5948 = vmatprep.subr.bf16.mxu1 %v6716_v15 }
 0x34b   :  { %5929 = vmatmul.mubr.bf16.gmra.mrb[48].mxu1 %v7310_v33 }
 0x34c   :  { %5949 = vmatpush3.bf16.msra.mxu1 %v6314_v16  ;;  %5932 = vmatprep.mubr.msk.bf16.mxu1 %vm6717_vm10, %v6716_v15 }
 0x34d   :  { %5950 = vmatprep.subr.bf16.mxu1 %v6716_v15 }
 0x350   :  { %5951 = vmatpush3.bf16.msra.mxu1 %v6315_v20 }
 0x351   :  { %5952 = vmatprep.subr.bf16.mxu1 %v6716_v15 }
 0x353   :  { %5933 = vmatmul.mubr.bf16.gmra.mrb[52].mxu1 %v5378_v61 }
 0x354   :  { %5936 = vmatprep.mubr.msk.bf16.mxu1 %vm6717_vm10, %v6716_v15  ;;  %5953 = vmatpush3.bf16.msra.mxu1 %v6316_v21 }
 0x355   :  { %5954 = vmatprep.subr.bf16.mxu1 %v6716_v15 }
 0x358   :  { %5955 = vmatpush3.bf16.msra.mxu1 %v6317_v17 }
 0x359   :  { %2824 = vmatprep.subr.bf16.mxu1 %v6335_v7 }
 0x35b   :  { %5937 = vmatmul.mubr.bf16.gmra.mrb[56].mxu1 %v5379_v56 }
 0x35c   :  { %5956 = vmatprep.mubr.msk.bf16.mxu1 %vm6717_vm10, %v6716_v15 }
 0x363   :  { %5957 = vmatmul.mubr.bf16.vlgmr.msra.gmra.mrb[60].mxu1 %v7300_v18  ;;  %v1955_v18 = vpack.c.bf16 %v1945_v6, %v1945_v6 }
 0x364   :  { %5960 = vmatprep.mubr.msk.bf16.mxu1 %vm6717_vm10, %v6716_v15  ;;  %2825 = vmatpush1.bf16.msra.mxu1 %v6333_v31 }
 0x365   :  { %v5101_v14 = vcombine.low %v1955_v18, %v6715_v32  ;;  %2826 = vmatprep.subr.bf16.mxu1 %v6341_v19 }
 0x368   :  { %2827 = vmatpush1.bf16.msra.mxu1 %v6339_v28 }
 0x369   :  { %2828 = vmatprep.subr.bf16.mxu1 %v6344_v36 }
 0x36b   :  { %5961 = vmatmul.mubr.bf16.gmra.mrb[64].mxu1 %v7310_v33  ;;  %v6342_v33 = vld [vmem:[#allocation4 + $0x198] ss:$20 sps:$4 sm:$0xff]  }
 0x36c   :  { %5964 = vmatprep.mubr.msk.bf16.mxu1 %vm6717_vm10, %v6716_v15  ;;  %2829 = vmatpush1.bf16.msra.mxu1 %v6342_v33 }
 0x36d   :  { %2830 = vmatprep.subr.bf16.mxu1 %v6347_v37 }
 0x370   :  { %2831 = vmatpush1.bf16.msra.mxu1 %v6345_v38 }
 0x371   :  { %2832 = vmatprep.subr.bf16.mxu1 %v6353_v40 }
 0x373   :  { %5965 = vmatmul.mubr.bf16.gmra.mrb[68].mxu1 %v5378_v61 }
 0x374   :  { %5968 = vmatprep.mubr.msk.bf16.mxu1 %vm6717_vm10, %v6716_v15  ;;  %2833 = vmatpush1.bf16.msra.mxu1 %v6351_v34 }
 0x375   :  { %2834 = vmatprep.subr.bf16.mxu1 %v6356_v42  ;;  %v7372_v42 = vld [vmem:[%s7528_s6] ss:$0 sm:$0xff] }
 0x378   :  { %2835 = vmatpush1.bf16.msra.mxu1 %v6354_v46 }
 0x379   :  { %2836 = vmatprep.subr.bf16.mxu1 %v6362_v47 }
 0x37b   :  { %5969 = vmatmul.mubr.bf16.gmra.mrb[72].mxu1 %v5379_v56 }
 0x37c   :  { %5972 = vmatprep.mubr.msk.bf16.mxu1 %vm6717_vm10, %v6716_v15  ;;  %2837 = vmatpush1.bf16.msra.mxu1 %v6360_v48 }
 0x37d   :  { %2838 = vmatprep.subr.bf16.mxu1 %v6365_v50 }
 0x380   :  { %2839 = vmatpush1.bf16.msra.mxu1 %v6363_v53 }
 0x381   :  { %3113 = vmatprep.subr.bf16.mxu1 %v6368_v54 }
 0x383   :  { %5973 = vmatmul.mubr.bf16.gmra.mrb[76].mxu1 %v5101_v14 }
 0x384   :  { %2856 = vmatprep.mubr.bf16.mxu1 %v6715_v32 }
 0x3e6   :  { %v2101_v55 = vpop.f32.mrb[20].mxu1 }
 0x3e7   :  { %v5886_v57 = vpop.f32.mrb[21].mxu1 }
 0x3e8   :  { %v2104_v58 = vpop.f32.mrb[22].mxu1 }
 0x3e9   :  { %v5887_v59 = vpop.f32.mrb[23].mxu1 }
 0x3ee   :  { %v2109_v60 = vpop.f32.mrb[24].mxu1 }
 0x3ef   :  { %v5890_v61 = vpop.f32.mrb[25].mxu1 }
 0x3f0   :  { %v2112_v62 = vpop.f32.mrb[26].mxu1 }
 0x3f1   :  { %v5891_v63 = vpop.f32.mrb[27].mxu1 }
 0x3f6   :  { %v2117_v0 = vpop.f32.mrb[28].mxu1 }
 0x3f7   :  { %v5894_v2 = vpop.f32.mrb[29].mxu1 }
 0x3f8   :  { %v2120_v3 = vpop.f32.mrb[30].mxu1 }
 0x3f9   :  { %v5895_v35 = vpop.f32.mrb[31].mxu1 }
 0x3fe   :  { %v2125_v4 = vpop.f32.mrb[32].mxu1 }
 0x3ff   :  { %v5898_v6 = vpop.f32.mrb[33].mxu1 }
 0x400   :  { %v2128_v22 = vpop.f32.mrb[34].mxu1 }
 0x401   :  { %v5899_v8 = vpop.f32.mrb[35].mxu1 }
 0x406   :  { %v2133_v56 = vpop.f32.mrb[36].mxu1 }
 0x407   :  { %v5902_v9 = vpop.f32.mrb[37].mxu1 }
 0x408   :  { %v2136_v39 = vpop.f32.mrb[38].mxu1 }
 0x409   :  { %v5903_v10 = vpop.f32.mrb[39].mxu1 }
 0x40e   :  { %v2232_v12 = vpop.f32.mrb[40].mxu1 }
 0x40f   :  { %v2233_v13 = vadd.f32 %v2232_v12, %v2101_v55  ;;  %v5922_v41 = vpop.f32.mrb[41].mxu1 }
 0x410   :  { %v2235_v16 = vpop.f32.mrb[42].mxu1  ;;  %v6366_v41 = vld [vmem:[#allocation4] ss:$20 sps:$4 sm:$0xff]  }
 0x411   :  { %v2236_v20 = vadd.f32 %v2235_v16, %v2104_v58  ;;  %v5923_v21 = vpop.f32.mrb[43].mxu1  ;;  %v6369_v16 = vld [vmem:[#allocation4 + $0x150] ss:$20 sps:$4 sm:$0xff]  }
 0x412   :  { %v6372_v21 = vld [vmem:[#allocation4 + $0x2c] ss:$20 sps:$4 sm:$0xff]  }
 0x416   :  { %v2240_v17 = vpop.f32.mrb[44].mxu1 }
 0x417   :  { %v2241_v45 = vadd.f32 %v2240_v17, %v2109_v60  ;;  %v5926_v5 = vpop.f32.mrb[45].mxu1 }
 0x418   :  { %v2243_v18 = vpop.f32.mrb[46].mxu1  ;;  %v6370_v5 = vld [vmem:[#allocation4 + $0x28] ss:$20 sps:$4 sm:$0xff]  }
 0x419   :  { %v2244_v14 = vadd.f32 %v2243_v18, %v2112_v62  ;;  %v5927_v51 = vpop.f32.mrb[47].mxu1 }
 0x41e   :  { %v2248_v11 = vpop.f32.mrb[48].mxu1 }
 0x41f   :  { %v2249_v24 = vadd.f32 %v2248_v11, %v2117_v0  ;;  %v5930_v25 = vpop.f32.mrb[49].mxu1  ;;  %v6376_v11 = vld [vmem:[#allocation4 + $0x54] ss:$20 sps:$4 sm:$0xff]  }
 0x420   :  { %v2251_v26 = vpop.f32.mrb[50].mxu1 }
 0x421   :  { %v2252_v29 = vadd.f32 %v2251_v26, %v2120_v3  ;;  %v5931_v1 = vpop.f32.mrb[51].mxu1 }
 0x426   :  { %v2256_v30 = vpop.f32.mrb[52].mxu1 }
 0x427   :  { %v7361_v31 = vadd.f32 %v2256_v30, %v2125_v4  ;;  %v5934_v7 = vpop.f32.mrb[53].mxu1 }
 0x428   :  { %v2259_v19 = vpop.f32.mrb[54].mxu1 }
 0x429   :  { %v7363_v23 = vadd.f32 %v2259_v19, %v2128_v22  ;;  %v5935_v27 = vpop.f32.mrb[55].mxu1 }
 0x42e   :  { %v2264_v28 = vpop.f32.mrb[56].mxu1 }
 0x42f   :  { %v7365_v33 = vadd.f32 %v2264_v28, %v2133_v56  ;;  %v5938_v36 = vpop.f32.mrb[57].mxu1  ;;  %v6374_v28 = vld [vmem:[#allocation4 + $0x50] ss:$20 sps:$4 sm:$0xff]  }
 0x430   :  { %v2267_v37 = vpop.f32.mrb[58].mxu1  ;;  %v6377_v36 = vld [vmem:[#allocation4 + $0x1a0] ss:$20 sps:$4 sm:$0xff]  }
 0x431   :  { %v7367_v38 = vadd.f32 %v2267_v37, %v2136_v39  ;;  %v5939_v40 = vpop.f32.mrb[59].mxu1 }
 0x436   :  { %v2372_v34 = vpop.f32.mrb[60].mxu1 }
 0x437   :  { %v2411_v43 = vadd.f32 %v2372_v34, %v2233_v13  ;;  %v5958_v44 = vpop.f32.mrb[61].mxu1  ;;  %v6378_v34 = vld [vmem:[#allocation4 + $0x78] ss:$20 sps:$4 sm:$0xff]  }
 0x438   :  { %v2375_v46 = vpop.f32.mrb[62].mxu1  ;;  %v6381_v44 = vld [vmem:[#allocation4 + $0x1c8] ss:$20 sps:$4 sm:$0xff]  }
 0x439   :  { %v2428_v47 = vadd.f32 %v7372_v42, %v2411_v43  ;;  %v2412_v48 = vadd.f32 %v2375_v46, %v2236_v20  ;;  %v5959_v49 = vpop.f32.mrb[63].mxu1  ;;  %v6384_v46 = vld [vmem:[#allocation4 + $0xa4] ss:$20 sps:$4 sm:$0xff]  }
 0x43b   :  { %v2448_v50 = vmul.f32 0.01, %v2428_v47  ;;  %v2429_v52 = vadd.f32 %v7372_v42, %v2412_v48  ;;  %vm2438_vm0 = vcmp.ge.f32.partialorder %v2428_v47, 0.0 }
 0x43d   :  { %vm2439_vm1 = vcmp.ge.f32.partialorder %v2429_v52, 0.0  ;;  %v2449_v53 = vmul.f32 0.01, %v2429_v52  ;;  %v2458_v55 = vsel %vm2438_vm0, %v2428_v47, %v2448_v50 }
 0x43e   :  { %v2380_v54 = vpop.f32.mrb[64].mxu1 }
 0x43f   :  { %v2459_v57 = vsel %vm2439_vm1, %v2429_v52, %v2449_v53  ;;  %v2413_v58 = vadd.f32 %v2380_v54, %v2241_v45  ;;  %v5962_v59 = vpop.f32.mrb[65].mxu1 }
 0x440   :  { %v2383_v60 = vpop.f32.mrb[66].mxu1  ;;  %v7376_v61 = vmax.f32 %v2458_v55, %v2459_v57  ;;  %v6385_v59 = vld [vmem:[#allocation4 + $0x1f0] ss:$20 sps:$4 sm:$0xff]  }
 0x441   :  { %v2430_v62 = vadd.f32 %v7372_v42, %v2413_v58  ;;  %v2414_v63 = vadd.f32 %v2383_v60, %v2244_v14  ;;  %v5963_v0 = vpop.f32.mrb[67].mxu1  ;;  %v6373_v14 = vld [vmem:[#allocation4 + $0x178] ss:$20 sps:$4 sm:$0xff]   ;;  %v6382_v58 = vld [vmem:[#allocation4 + $0xa0] ss:$20 sps:$4 sm:$0xff]  }
 0x442   :  { %v6388_v60 = vld [vmem:[#allocation4 + $0xcc] ss:$20 sps:$4 sm:$0xff]  }
 0x443   :  { %v2450_v2 = vmul.f32 0.01, %v2430_v62  ;;  %v2431_v3 = vadd.f32 %v7372_v42, %v2414_v63  ;;  %vm2440_vm2 = vcmp.ge.f32.partialorder %v2430_v62, 0.0  ;;  %v6386_v63 = vld [vmem:[#allocation4 + $0xc8] ss:$20 sps:$4 sm:$0xff]  }
 0x445   :  { %vm2441_vm3 = vcmp.ge.f32.partialorder %v2431_v3, 0.0  ;;  %v2451_v35 = vmul.f32 0.01, %v2431_v3  ;;  %v2460_v6 = vsel %vm2440_vm2, %v2430_v62, %v2450_v2  ;;  %v6389_v2 = vld [vmem:[#allocation4 + $0x218] ss:$20 sps:$4 sm:$0xff]  }
 0x446   :  { %v2388_v4 = vpop.f32.mrb[68].mxu1 }
 0x447   :  { %v2461_v22 = vsel %vm2441_vm3, %v2431_v3, %v2451_v35  ;;  %v2415_v8 = vadd.f32 %v2388_v4, %v2249_v24  ;;  %v5966_v56 = vpop.f32.mrb[69].mxu1 }
 0x448   :  { %v2469_v9 = vmax.f32 %v2460_v6, %v2461_v22  ;;  %v2391_v39 = vpop.f32.mrb[70].mxu1  ;;  %v6390_v6 = vld [vmem:[#allocation4 + $0xf0] ss:$20 sps:$4 sm:$0xff]   ;;  %v6393_v22 = vld [vmem:[#allocation4 + $0x240] ss:$20 sps:$4 sm:$0xff]  }
 0x449   :  { %v2432_v10 = vadd.f32 %v7372_v42, %v2415_v8  ;;  %v2416_v12 = vadd.f32 %v2391_v39, %v2252_v29  ;;  %v5967_v13 = vpop.f32.mrb[71].mxu1  ;;  %v6394_v8 = vld [vmem:[#allocation4 + $0x118] ss:$20 sps:$4 sm:$0xff]   ;;  %v6397_v56 = vld [vmem:[#allocation4 + $0x268] ss:$20 sps:$4 sm:$0xff]  }
 0x44a   :  { %v7381_v20 = vpack.c.bf16 %v2469_v9, %v2469_v9  ;;  %v6400_v9 = vld [vmem:[#allocation4 + $0xc] ss:$20 sps:$4 sm:$0xff]   ;;  %v6398_v39 = vld [vmem:[#allocation4 + $0x8] ss:$20 sps:$4 sm:$0xff]  }
 0x44b   :  { %v2452_v17 = vmul.f32 0.01, %v2432_v10  ;;  %v2433_v45 = vadd.f32 %v7372_v42, %v2416_v12  ;;  %vm2442_vm4 = vcmp.ge.f32.partialorder %v2432_v10, 0.0  ;;  %v7412_v12 = vpack.c.bf16 %v7376_v61, %v7376_v61  ;;  %v6404_v13 = vld [vmem:[#allocation4 + $0x34] ss:$20 sps:$4 sm:$0xff]  }
 0x44c   :  { %2816 = vmatmul.mubr.bf16.vlgmr.msra.gmra.mrb[40].mxu0 %v7381_v20  ;;  %2857 = vmatmul.mubr.bf16.vlgmr.msra.gmra.mrb[80].mxu1 %v7381_v20  ;;  %v6406_v61 = vld [vmem:[#allocation4 + $0x58] ss:$20 sps:$4 sm:$0xff]  }
 0x44d   :  { %vm2443_vm5 = vcmp.ge.f32.partialorder %v2433_v45, 0.0  ;;  %v2453_v18 = vmul.f32 0.01, %v2433_v45  ;;  %5977 = vmatpush3.bf16.msra.mxu0 %v6369_v16  ;;  %3114 = vmatpush1.bf16.msra.mxu1 %v6366_v41  ;;  %v2462_v24 = vsel %vm2442_vm4, %v2432_v10, %v2452_v17  ;;  %v6401_v10 = vld [vmem:[#allocation4 + $0x10] ss:$20 sps:$4 sm:$0xff]  }
 0x44e   :  { %v2396_v51 = vpop.f32.mrb[72].mxu1  ;;  %5978 = vmatprep.subr.bf16.mxu0 %v6716_v15  ;;  %3115 = vmatprep.subr.bf16.mxu1 %v6372_v21  ;;  %v6402_v41 = vld [vmem:[#allocation4 + $0x30] ss:$20 sps:$4 sm:$0xff]   ;;  %v6405_v16 = vld [vmem:[#allocation4 + $0x38] ss:$20 sps:$4 sm:$0xff]  }
 0x44f   :  { %v2463_v25 = vsel %vm2443_vm5, %v2433_v45, %v2453_v18  ;;  %v2417_v26 = vadd.f32 %v2396_v51, %v7361_v31  ;;  %v5970_v29 = vpop.f32.mrb[73].mxu1  ;;  %5992 = vmatprep.mubr.msk.bf16.mxu0 %vm6717_vm10, %v6716_v15  ;;  %3145 = vmatprep.mubr.bf16.mxu1 %v6715_v32  ;;  %v6380_v31 = vld [vmem:[#allocation4 + $0x7c] ss:$20 sps:$4 sm:$0xff]   ;;  %v6409_v17 = vld [vmem:[#allocation4 + $0x60] ss:$20 sps:$4 sm:$0xff]  }
 0x450   :  { %v2399_v1 = vpop.f32.mrb[74].mxu1  ;;  %v7391_v30 = vmax.f32 %v2462_v24, %v2463_v25  ;;  %v6408_v21 = vld [vmem:[#allocation4 + $0x5c] ss:$20 sps:$4 sm:$0xff]   ;;  %v6410_v45 = vld [vmem:[#allocation4 + $0x80] ss:$20 sps:$4 sm:$0xff]  }
 0x451   :  { %v2434_v7 = vadd.f32 %v7372_v42, %v2417_v26  ;;  %v2418_v19 = vadd.f32 %v2399_v1, %v7363_v23  ;;  %5979 = vmatpush3.bf16.msra.mxu0 %v6373_v14  ;;  %3116 = vmatpush1.bf16.msra.mxu1 %v6370_v5  ;;  %v5971_v27 = vpop.f32.mrb[75].mxu1  ;;  %v6413_v5 = vld [vmem:[#allocation4 + $0x88] ss:$20 sps:$4 sm:$0xff]   ;;  %v6416_v18 = vld [vmem:[#allocation4 + $0xac] ss:$20 sps:$4 sm:$0xff]  }
 0x452   :  { %5980 = vmatprep.subr.bf16.mxu0 %v6716_v15  ;;  %3117 = vmatprep.subr.bf16.mxu1 %v6376_v11  ;;  %v6414_v14 = vld [vmem:[#allocation4 + $0xa8] ss:$20 sps:$4 sm:$0xff]   ;;  %v6417_v51 = vld [vmem:[#allocation4 + $0xb0] ss:$20 sps:$4 sm:$0xff]   ;;  %v6421_v25 = vld [vmem:[#allocation4 + $0xd8] ss:$20 sps:$4 sm:$0xff]  }
 0x453   :  { %v2454_v37 = vmul.f32 0.01, %v2434_v7  ;;  %v2435_v40 = vadd.f32 %v7372_v42, %v2418_v19  ;;  %vm2444_vm6 = vcmp.ge.f32.partialorder %v2434_v7, 0.0  ;;  %v6420_v11 = vld [vmem:[#allocation4 + $0xd4] ss:$20 sps:$4 sm:$0xff]  }
 0x454   :  { %v6418_v24 = vld [vmem:[#allocation4 + $0xd0] ss:$20 sps:$4 sm:$0xff]   ;;  %v6422_v29 = vld [vmem:[#allocation4 + $0xf8] ss:$20 sps:$4 sm:$0xff]   ;;  %v6425_v1 = vld [vmem:[#allocation4 + $0x100] ss:$20 sps:$4 sm:$0xff]  }
 0x455   :  { %vm2445_vm7 = vcmp.ge.f32.partialorder %v2435_v40, 0.0  ;;  %v2455_v43 = vmul.f32 0.01, %v2435_v40  ;;  %5981 = vmatpush3.bf16.msra.mxu0 %v6377_v36  ;;  %3118 = vmatpush1.bf16.msra.mxu1 %v6374_v28  ;;  %v2464_v47 = vsel %vm2444_vm6, %v2434_v7, %v2454_v37  ;;  %v6424_v26 = vld [vmem:[#allocation4 + $0xfc] ss:$20 sps:$4 sm:$0xff]  }
 0x456   :  { %v2404_v23 = vpop.f32.mrb[76].mxu1  ;;  %5982 = vmatprep.subr.bf16.mxu0 %v6716_v15  ;;  %3119 = vmatprep.subr.bf16.mxu1 %v6380_v31  ;;  %v6428_v7 = vld [vmem:[#allocation4 + $0x124] ss:$20 sps:$4 sm:$0xff]   ;;  %v6426_v19 = vld [vmem:[#allocation4 + $0x120] ss:$20 sps:$4 sm:$0xff]  }
 0x457   :  { %v2465_v48 = vsel %vm2445_vm7, %v2435_v40, %v2455_v43  ;;  %v2419_v49 = vadd.f32 %v2404_v23, %v7365_v33  ;;  %v5974_v50 = vpop.f32.mrb[77].mxu1  ;;  %v6429_v27 = vld [vmem:[#allocation4 + $0x128] ss:$20 sps:$4 sm:$0xff]   ;;  %v6432_v28 = vld [vmem:[#allocation4 + $0x284] ss:$20 sps:$4 sm:$0xff]  }
 0x458   :  { %v2407_v52 = vpop.f32.mrb[78].mxu1  ;;  %v7399_v53 = vmax.f32 %v2464_v47, %v2465_v48  ;;  %v6435_v36 = vld [vmem:[#allocation4 + $0x28c] ss:$20 sps:$4 sm:$0xff]   ;;  %v6433_v37 = vld [vmem:[#allocation4 + $0x288] ss:$20 sps:$4 sm:$0xff]  }
 0x459   :  { %v2436_v54 = vadd.f32 %v7372_v42, %v2419_v49  ;;  %v2420_v55 = vadd.f32 %v2407_v52, %v7367_v38  ;;  %5983 = vmatpush3.bf16.msra.mxu0 %v6381_v44  ;;  %3120 = vmatpush1.bf16.msra.mxu1 %v6378_v34  ;;  %v5975_v57 = vpop.f32.mrb[79].mxu1  ;;  %v6392_v38 = vld [vmem:[#allocation4 + $0xf4] ss:$20 sps:$4 sm:$0xff]   ;;  %v6438_v40 = vld [vmem:[#allocation4 + $0x2ac] ss:$20 sps:$4 sm:$0xff]  }
 0x45a   :  { %5984 = vmatprep.subr.bf16.mxu0 %v6716_v15  ;;  %3121 = vmatprep.subr.bf16.mxu1 %v6384_v46  ;;  %v6430_v31 = vld [vmem:[#allocation4 + $0x280] ss:$20 sps:$4 sm:$0xff]   ;;  %v6436_v43 = vld [vmem:[#allocation4 + $0x2a8] ss:$20 sps:$4 sm:$0xff]   ;;  %v6439_v44 = vld [vmem:[#allocation4 + $0x2b0] ss:$20 sps:$4 sm:$0xff]  }
 0x45b   :  { %v2456_v62 = vmul.f32 0.01, %v2436_v54  ;;  %v2437_v33 = vadd.f32 %v7372_v42, %v2420_v55  ;;  %vm2446_vm8 = vcmp.ge.f32.partialorder %v2436_v54, 0.0  ;;  %v6396_v42 = vld [vmem:[#allocation4 + $0x11c] ss:$20 sps:$4 sm:$0xff]  }
 0x45c   :  { %v6441_v34 = vld [vmem:[#allocation4 + $0x2b4] ss:$20 sps:$4 sm:$0xff]   ;;  %v6447_v46 = vld [vmem:[#allocation4 + $0x2dc] ss:$20 sps:$4 sm:$0xff]   ;;  %v6445_v48 = vld [vmem:[#allocation4 + $0x2d8] ss:$20 sps:$4 sm:$0xff]  }
 0x45d   :  { %vm2447_vm9 = vcmp.ge.f32.partialorder %v2437_v33, 0.0  ;;  %v2457_v0 = vmul.f32 0.01, %v2437_v33  ;;  %5985 = vmatpush3.bf16.msra.mxu0 %v6385_v59  ;;  %3122 = vmatpush1.bf16.msra.mxu1 %v6382_v58  ;;  %v2466_v3 = vsel %vm2446_vm8, %v2436_v54, %v2456_v62  ;;  %v6444_v23 = vld [vmem:[#allocation4 + $0x2d4] ss:$20 sps:$4 sm:$0xff]  }
 0x45e   :  { %5986 = vmatprep.subr.bf16.mxu0 %v6716_v15  ;;  %3123 = vmatprep.subr.bf16.mxu1 %v6388_v60  ;;  %v6442_v47 = vld [vmem:[#allocation4 + $0x2d0] ss:$20 sps:$4 sm:$0xff]   ;;  %v6448_v52 = vld [vmem:[#allocation4 + $0x2f8] ss:$20 sps:$4 sm:$0xff]   ;;  %v6451_v54 = vld [vmem:[#allocation4 + $0x300] ss:$20 sps:$4 sm:$0xff]  }
 0x45f   :  { %v2467_v35 = vsel %vm2447_vm9, %v2437_v33, %v2457_v0  ;;  %v6450_v49 = vld [vmem:[#allocation4 + $0x2fc] ss:$20 sps:$4 sm:$0xff]   ;;  %v6453_v50 = vld [vmem:[#allocation4 + $0x304] ss:$20 sps:$4 sm:$0xff]   ;;  %v6459_v57 = vld [vmem:[#allocation4 + $0x32c] ss:$20 sps:$4 sm:$0xff]  }
 0x460   :  { %v7406_v4 = vmax.f32 %v2466_v3, %v2467_v35  ;;  %v6456_v55 = vld [vmem:[#allocation4 + $0x324] ss:$20 sps:$4 sm:$0xff]   ;;  %v6454_v58 = vld [vmem:[#allocation4 + $0x320] ss:$20 sps:$4 sm:$0xff]   ;;  %v6457_v59 = vld [vmem:[#allocation4 + $0x328] ss:$20 sps:$4 sm:$0xff]  }
 0x461   :  { %5987 = vmatpush3.bf16.msra.mxu0 %v6389_v2  ;;  %3124 = vmatpush1.bf16.msra.mxu1 %v6386_v63  ;;  %v6462_v60 = vld [vmem:[#allocation4 + $0x34c] ss:$20 sps:$4 sm:$0xff]   ;;  %v6465_v62 = vld [vmem:[#allocation4 + $0x354] ss:$20 sps:$4 sm:$0xff]   ;;  %v6463_v63 = vld [vmem:[#allocation4 + $0x350] ss:$20 sps:$4 sm:$0xff]  }
 0x462   :  { %5988 = vmatprep.subr.bf16.mxu0 %v6716_v15  ;;  %3125 = vmatprep.subr.bf16.mxu1 %v6392_v38  ;;  %v6460_v33 = vld [vmem:[#allocation4 + $0x348] ss:$20 sps:$4 sm:$0xff]   ;;  %v6466_v38 = vld [vmem:[#allocation4 + $0x370] ss:$20 sps:$4 sm:$0xff]   ;;  %v6469_v3 = vld [vmem:[#allocation4 + $0x378] ss:$20 sps:$4 sm:$0xff]  }
 0x463   :  { %v6468_v0 = vld [vmem:[#allocation4 + $0x374] ss:$20 sps:$4 sm:$0xff]   ;;  %v6471_v2 = vld [vmem:[#allocation4 + $0x37c] ss:$20 sps:$4 sm:$0xff]  }
 0x464   :  { %v6474_v35 = vld [vmem:[#allocation4 + $0x39c] ss:$20 sps:$4 sm:$0xff]  }
 0x465   :  { %5989 = vmatpush3.bf16.msra.mxu0 %v6393_v22  ;;  %3126 = vmatpush1.bf16.msra.mxu1 %v6390_v6  ;;  %v6477_v6 = vld [vmem:[#allocation4 + $0x3a4] ss:$20 sps:$4 sm:$0xff]  }
 0x466   :  { %5990 = vmatprep.subr.bf16.mxu0 %v6716_v15  ;;  %3127 = vmatprep.subr.bf16.mxu1 %v6396_v42  ;;  %v6472_v22 = vld [vmem:[#allocation4 + $0x398] ss:$20 sps:$4 sm:$0xff]   ;;  %v6475_v42 = vld [vmem:[#allocation4 + $0x3a0] ss:$20 sps:$4 sm:$0xff]  }
 0x469   :  { %5991 = vmatpush3.bf16.msra.mxu0 %v6397_v56  ;;  %3128 = vmatpush1.bf16.msra.mxu1 %v6394_v8  ;;  %v6480_v8 = vld [vmem:[#allocation4 + $0x3c4] ss:$20 sps:$4 sm:$0xff]   ;;  %v6478_v56 = vld [vmem:[#allocation4 + $0x3c0] ss:$20 sps:$4 sm:$0xff]  }
 0x46a   :  { %3154 = vmatprep.subr.bf16.mxu0 %v6400_v9  ;;  %5996 = vmatprep.subr.bf16.mxu1 %v6716_v15  ;;  %v6481_v9 = vld [vmem:[#allocation4 + $0x290] ss:$20 sps:$4 sm:$0xff]  }
 0x46c   :  { %5993 = vmatmul.mubr.bf16.vlgmr.msra.gmra.mrb[44].mxu0 %v7381_v20  ;;  %3146 = vmatmul.mubr.bf16.vlgmr.msra.gmra.mrb[84].mxu1 %v7412_v12  ;;  %v6412_v20 = vld [vmem:[#allocation4 + $0x84] ss:$20 sps:$4 sm:$0xff]  }
 0x46d   :  { %3155 = vmatpush1.bf16.msra.mxu0 %v6398_v39  ;;  %5997 = vmatpush3.bf16.msra.mxu1 %v6401_v10  ;;  %v7433_v39 = vpack.c.bf16 %v7391_v30, %v7391_v30  ;;  %v6484_v10 = vld [vmem:[#allocation4 + $0x3ec] ss:$20 sps:$4 sm:$0xff]   ;;  %v6486_v30 = vld [vmem:[#allocation4 + $0x410] ss:$20 sps:$4 sm:$0xff]  }
 0x46e   :  { %3156 = vmatprep.subr.bf16.mxu0 %v6404_v13  ;;  %5998 = vmatprep.subr.bf16.mxu1 %v6716_v15  ;;  %v6485_v13 = vld [vmem:[#allocation4 + $0x2b8] ss:$20 sps:$4 sm:$0xff]  }
 0x46f   :  { %3186 = vmatprep.mubr.bf16.mxu0 %v6715_v32  ;;  %6012 = vmatprep.mubr.msk.bf16.mxu1 %vm6717_vm10, %v6716_v15 }
 0x471   :  { %3157 = vmatpush1.bf16.msra.mxu0 %v6402_v41  ;;  %5999 = vmatpush3.bf16.msra.mxu1 %v6405_v16  ;;  %v6488_v41 = vld [vmem:[#allocation4 + $0x414] ss:$20 sps:$4 sm:$0xff]  }
 0x472   :  { %3158 = vmatprep.subr.bf16.mxu0 %v6408_v21  ;;  %6000 = vmatprep.subr.bf16.mxu1 %v6716_v15  ;;  %v6489_v16 = vld [vmem:[#allocation4 + $0x2e0] ss:$20 sps:$4 sm:$0xff]   ;;  %v6492_v21 = vld [vmem:[#allocation4 + $0x43c] ss:$20 sps:$4 sm:$0xff]  }
 0x475   :  { %3159 = vmatpush1.bf16.msra.mxu0 %v6406_v61  ;;  %6001 = vmatpush3.bf16.msra.mxu1 %v6409_v17  ;;  %v6490_v61 = vld [vmem:[#allocation4 + $0x438] ss:$20 sps:$4 sm:$0xff]   ;;  %v6493_v17 = vld [vmem:[#allocation4 + $0x308] ss:$20 sps:$4 sm:$0xff]  }
 0x476   :  { %3160 = vmatprep.subr.bf16.mxu0 %v6412_v20  ;;  %6002 = vmatprep.subr.bf16.mxu1 %v6716_v15  ;;  %v6496_v20 = vld [vmem:[#allocation4 + $0x464] ss:$20 sps:$4 sm:$0xff]  }
 0x479   :  { %3161 = vmatpush1.bf16.msra.mxu0 %v6410_v45  ;;  %6003 = vmatpush3.bf16.msra.mxu1 %v6413_v5  ;;  %v6494_v45 = vld [vmem:[#allocation4 + $0x460] ss:$20 sps:$4 sm:$0xff]   ;;  %v6497_v5 = vld [vmem:[#allocation4 + $0x330] ss:$20 sps:$4 sm:$0xff]  }
 0x47a   :  { %3162 = vmatprep.subr.bf16.mxu0 %v6416_v18  ;;  %6004 = vmatprep.subr.bf16.mxu1 %v6716_v15  ;;  %v6500_v18 = vld [vmem:[#allocation4 + $0x48c] ss:$20 sps:$4 sm:$0xff]  }
 0x47d   :  { %3163 = vmatpush1.bf16.msra.mxu0 %v6414_v14  ;;  %6005 = vmatpush3.bf16.msra.mxu1 %v6417_v51  ;;  %v6498_v14 = vld [vmem:[#allocation4 + $0x488] ss:$20 sps:$4 sm:$0xff]   ;;  %v6501_v51 = vld [vmem:[#allocation4 + $0x358] ss:$20 sps:$4 sm:$0xff]  }
 0x47e   :  { %3164 = vmatprep.subr.bf16.mxu0 %v6420_v11  ;;  %6006 = vmatprep.subr.bf16.mxu1 %v6716_v15  ;;  %v6504_v11 = vld [vmem:[#allocation4 + $0x4b4] ss:$20 sps:$4 sm:$0xff]  }
 0x481   :  { %3165 = vmatpush1.bf16.msra.mxu0 %v6418_v24  ;;  %6007 = vmatpush3.bf16.msra.mxu1 %v6421_v25  ;;  %v6502_v24 = vld [vmem:[#allocation4 + $0x4b0] ss:$20 sps:$4 sm:$0xff]   ;;  %v6505_v25 = vld [vmem:[#allocation4 + $0x380] ss:$20 sps:$4 sm:$0xff]  }
 0x482   :  { %3166 = vmatprep.subr.bf16.mxu0 %v6424_v26  ;;  %6008 = vmatprep.subr.bf16.mxu1 %v6716_v15  ;;  %v6508_v26 = vld [vmem:[#allocation4 + $0x4dc] ss:$20 sps:$4 sm:$0xff]  }
 0x485   :  { %3167 = vmatpush1.bf16.msra.mxu0 %v6422_v29  ;;  %6009 = vmatpush3.bf16.msra.mxu1 %v6425_v1  ;;  %v6506_v29 = vld [vmem:[#allocation4 + $0x4d8] ss:$20 sps:$4 sm:$0xff]   ;;  %v6509_v1 = vld [vmem:[#allocation4 + $0x3a8] ss:$20 sps:$4 sm:$0xff]  }
 0x486   :  { %3168 = vmatprep.subr.bf16.mxu0 %v6428_v7  ;;  %6010 = vmatprep.subr.bf16.mxu1 %v6716_v15  ;;  %v6512_v7 = vld [vmem:[#allocation4 + $0x3cc] ss:$20 sps:$4 sm:$0xff]  }
 0x489   :  { %3169 = vmatpush1.bf16.msra.mxu0 %v6426_v19  ;;  %6011 = vmatpush3.bf16.msra.mxu1 %v6429_v27  ;;  %v6510_v19 = vld [vmem:[#allocation4 + $0x3c8] ss:$20 sps:$4 sm:$0xff]   ;;  %v6513_v27 = vld [vmem:[#allocation4 + $0x3d0] ss:$20 sps:$4 sm:$0xff]  }
 0x48a   :  { %3492 = vmatprep.subr.bf16.mxu0 %v6432_v28  ;;  %3533 = vmatprep.subr.bf16.mxu1 %v6435_v36  ;;  %v7450_v28 = vpack.c.bf16 %v7399_v53, %v7399_v53  ;;  %v6516_v36 = vld [vmem:[#allocation4 + $0x3f4] ss:$20 sps:$4 sm:$0xff]   ;;  %v6518_v53 = vld [vmem:[#allocation4 + $0x418] ss:$20 sps:$4 sm:$0xff]  }
 0x48c   :  { %3187 = vmatmul.mubr.bf16.vlgmr.msra.gmra.mrb[48].mxu0 %v7412_v12  ;;  %6013 = vmatmul.mubr.bf16.vlgmr.msra.gmra.mrb[88].mxu1 %v7412_v12  ;;  %v6482_v12 = vld [vmem:[#allocation4 + $0x3e8] ss:$20 sps:$4 sm:$0xff]  }
 0x48d   :  { %3493 = vmatpush1.bf16.msra.mxu0 %v6430_v31  ;;  %3534 = vmatpush1.bf16.msra.mxu1 %v6433_v37  ;;  %v6514_v31 = vld [vmem:[#allocation4 + $0x3f0] ss:$20 sps:$4 sm:$0xff]   ;;  %v6517_v37 = vld [vmem:[#allocation4 + $0x3f8] ss:$20 sps:$4 sm:$0xff]  }
 0x48e   :  { %3494 = vmatprep.subr.bf16.mxu0 %v6438_v40  ;;  %3535 = vmatprep.subr.bf16.mxu1 %v6441_v34  ;;  %v6520_v40 = vld [vmem:[#allocation4 + $0x41c] ss:$20 sps:$4 sm:$0xff]   ;;  %v6521_v34 = vld [vmem:[#allocation4 + $0x420] ss:$20 sps:$4 sm:$0xff]  }
 0x48f   :  { %3524 = vmatprep.mubr.bf16.mxu0 %v6715_v32  ;;  %3565 = vmatprep.mubr.bf16.mxu1 %v6715_v32 }
 0x491   :  { %3495 = vmatpush1.bf16.msra.mxu0 %v6436_v43  ;;  %3536 = vmatpush1.bf16.msra.mxu1 %v6439_v44  ;;  %v6524_v43 = vld [vmem:[#allocation4 + $0x444] ss:$20 sps:$4 sm:$0xff]   ;;  %v6522_v44 = vld [vmem:[#allocation4 + $0x440] ss:$20 sps:$4 sm:$0xff]  }
 0x492   :  { %3496 = vmatprep.subr.bf16.mxu0 %v6444_v23  ;;  %3537 = vmatprep.subr.bf16.mxu1 %v6447_v46  ;;  %v6525_v23 = vld [vmem:[#allocation4 + $0x448] ss:$20 sps:$4 sm:$0xff]   ;;  %v6528_v46 = vld [vmem:[#allocation4 + $0x46c] ss:$20 sps:$4 sm:$0xff]  }
 0x495   :  { %3497 = vmatpush1.bf16.msra.mxu0 %v6442_v47  ;;  %3538 = vmatpush1.bf16.msra.mxu1 %v6445_v48  ;;  %v6526_v47 = vld [vmem:[#allocation4 + $0x468] ss:$20 sps:$4 sm:$0xff]   ;;  %v6529_v48 = vld [vmem:[#allocation4 + $0x470] ss:$20 sps:$4 sm:$0xff]  }
 0x496   :  { %3498 = vmatprep.subr.bf16.mxu0 %v6450_v49  ;;  %3539 = vmatprep.subr.bf16.mxu1 %v6453_v50  ;;  %v6532_v49 = vld [vmem:[#allocation4 + $0x494] ss:$20 sps:$4 sm:$0xff]   ;;  %v6530_v50 = vld [vmem:[#allocation4 + $0x490] ss:$20 sps:$4 sm:$0xff]  }
 0x499   :  { %3499 = vmatpush1.bf16.msra.mxu0 %v6448_v52  ;;  %3540 = vmatpush1.bf16.msra.mxu1 %v6451_v54  ;;  %v6533_v52 = vld [vmem:[#allocation4 + $0x498] ss:$20 sps:$4 sm:$0xff]   ;;  %v6536_v54 = vld [vmem:[#allocation4 + $0x4bc] ss:$20 sps:$4 sm:$0xff]  }
 0x49a   :  { %3500 = vmatprep.subr.bf16.mxu0 %v6456_v55  ;;  %3541 = vmatprep.subr.bf16.mxu1 %v6459_v57  ;;  %v6534_v55 = vld [vmem:[#allocation4 + $0x4b8] ss:$20 sps:$4 sm:$0xff]   ;;  %v6537_v57 = vld [vmem:[#allocation4 + $0x4c0] ss:$20 sps:$4 sm:$0xff]  }
 0x49d   :  { %3501 = vmatpush1.bf16.msra.mxu0 %v6454_v58  ;;  %3542 = vmatpush1.bf16.msra.mxu1 %v6457_v59  ;;  %v6540_v58 = vld [vmem:[#allocation4 + $0x4e4] ss:$20 sps:$4 sm:$0xff]   ;;  %v6538_v59 = vld [vmem:[#allocation4 + $0x4e0] ss:$20 sps:$4 sm:$0xff]  }
 0x49e   :  { %3502 = vmatprep.subr.bf16.mxu0 %v6462_v60  ;;  %3543 = vmatprep.subr.bf16.mxu1 %v6465_v62  ;;  %v6541_v60 = vld [vmem:[#allocation4 + $0x4e8] ss:$20 sps:$4 sm:$0xff]   ;;  %v6544_v62 = vld [vmem:[#allocation4 + $0x504] ss:$20 sps:$4 sm:$0xff]  }
 0x4a1   :  { %3503 = vmatpush1.bf16.msra.mxu0 %v6460_v33  ;;  %3544 = vmatpush1.bf16.msra.mxu1 %v6463_v63  ;;  %v6547_v33 = vld [vmem:[#allocation4 + $0x50c] ss:$20 sps:$4 sm:$0xff]  }
 0x4a2   :  { %3504 = vmatprep.subr.bf16.mxu0 %v6468_v0  ;;  %3545 = vmatprep.subr.bf16.mxu1 %v6471_v2  ;;  %v6542_v63 = vld [vmem:[#allocation4 + $0x500] ss:$20 sps:$4 sm:$0xff]   ;;  %v6545_v0 = vld [vmem:[#allocation4 + $0x508] ss:$20 sps:$4 sm:$0xff]  }
 0x4a3   :  { %v6550_v2 = vld [vmem:[#allocation4 + $0x52c] ss:$20 sps:$4 sm:$0xff]  }
 0x4a5   :  { %3505 = vmatpush1.bf16.msra.mxu0 %v6466_v38  ;;  %3546 = vmatpush1.bf16.msra.mxu1 %v6469_v3  ;;  %v6553_v38 = vld [vmem:[#allocation4 + $0x534] ss:$20 sps:$4 sm:$0xff]  }
 0x4a6   :  { %3506 = vmatprep.subr.bf16.mxu0 %v6474_v35  ;;  %3547 = vmatprep.subr.bf16.mxu1 %v6477_v6  ;;  %v6548_v3 = vld [vmem:[#allocation4 + $0x528] ss:$20 sps:$4 sm:$0xff]   ;;  %v6551_v35 = vld [vmem:[#allocation4 + $0x530] ss:$20 sps:$4 sm:$0xff]  }
 0x4a7   :  { %v6556_v6 = vld [vmem:[#allocation4 + $0x554] ss:$20 sps:$4 sm:$0xff]  }
 0x4a9   :  { %3507 = vmatpush1.bf16.msra.mxu0 %v6472_v22  ;;  %3548 = vmatpush1.bf16.msra.mxu1 %v6475_v42  ;;  %v6559_v22 = vld [vmem:[#allocation4 + $0x55c] ss:$20 sps:$4 sm:$0xff]  }
 0x4aa   :  { %6016 = vmatprep.subr.bf16.mxu0 %v6716_v15  ;;  %3876 = vmatprep.subr.bf16.mxu1 %v6480_v8  ;;  %v6554_v42 = vld [vmem:[#allocation4 + $0x550] ss:$20 sps:$4 sm:$0xff]   ;;  %v6557_v8 = vld [vmem:[#allocation4 + $0x558] ss:$20 sps:$4 sm:$0xff]  }
 0x4ac   :  { %3525 = vmatmul.mubr.bf16.vlgmr.msra.gmra.mrb[52].mxu0 %v7433_v39  ;;  %3566 = vmatmul.mubr.bf16.vlgmr.msra.gmra.mrb[92].mxu1 %v7433_v39 }
 0x4ad   :  { %6017 = vmatpush3.bf16.msra.mxu0 %v6481_v9  ;;  %3877 = vmatpush1.bf16.msra.mxu1 %v6478_v56  ;;  %v6562_v56 = vld [vmem:[#allocation4 + $0x57c] ss:$20 sps:$4 sm:$0xff]   ;;  %v6565_v9 = vld [vmem:[#allocation4 + $0x584] ss:$20 sps:$4 sm:$0xff]  }
 0x4ae   :  { %6018 = vmatprep.subr.bf16.mxu0 %v6716_v15  ;;  %3878 = vmatprep.subr.bf16.mxu1 %v6484_v10  ;;  %v6563_v10 = vld [vmem:[#allocation4 + $0x580] ss:$20 sps:$4 sm:$0xff]  }
 0x4af   :  { %6032 = vmatprep.mubr.msk.bf16.mxu0 %vm6717_vm10, %v6716_v15  ;;  %3908 = vmatprep.mubr.bf16.mxu1 %v6715_v32 }
 0x4b1   :  { %6019 = vmatpush3.bf16.msra.mxu0 %v6485_v13  ;;  %3879 = vmatpush1.bf16.msra.mxu1 %v6482_v12  ;;  %v6568_v12 = vld [vmem:[#allocation4 + $0x5a4] ss:$20 sps:$4 sm:$0xff]   ;;  %v6571_v13 = vld [vmem:[#allocation4 + $0x5ac] ss:$20 sps:$4 sm:$0xff]  }
 0x4b2   :  { %6020 = vmatprep.subr.bf16.mxu0 %v6716_v15  ;;  %3880 = vmatprep.subr.bf16.mxu1 %v6488_v41  ;;  %v6566_v41 = vld [vmem:[#allocation4 + $0x5a0] ss:$20 sps:$4 sm:$0xff]  }
 0x4b5   :  { %6021 = vmatpush3.bf16.msra.mxu0 %v6489_v16  ;;  %3881 = vmatpush1.bf16.msra.mxu1 %v6486_v30  ;;  %v6574_v30 = vld [vmem:[#allocation4 + $0x5cc] ss:$20 sps:$4 sm:$0xff]   ;;  %v6577_v16 = vld [vmem:[#allocation4 + $0x5d4] ss:$20 sps:$4 sm:$0xff]  }
 0x4b6   :  { %6022 = vmatprep.subr.bf16.mxu0 %v6716_v15  ;;  %3882 = vmatprep.subr.bf16.mxu1 %v6492_v21  ;;  %v6572_v21 = vld [vmem:[#allocation4 + $0x5c8] ss:$20 sps:$4 sm:$0xff]  }
 0x4b9   :  { %6023 = vmatpush3.bf16.msra.mxu0 %v6493_v17  ;;  %3883 = vmatpush1.bf16.msra.mxu1 %v6490_v61  ;;  %v6575_v61 = vld [vmem:[#allocation4 + $0x5d0] ss:$20 sps:$4 sm:$0xff]   ;;  %v6580_v17 = vld [vmem:[#allocation4 + $0x5f4] ss:$20 sps:$4 sm:$0xff]  }
 0x4ba   :  { %6024 = vmatprep.subr.bf16.mxu0 %v6716_v15  ;;  %3884 = vmatprep.subr.bf16.mxu1 %v6496_v20  ;;  %v6583_v20 = vld [vmem:[#allocation4 + $0x5fc] ss:$20 sps:$4 sm:$0xff]  }
 0x4bd   :  { %6025 = vmatpush3.bf16.msra.mxu0 %v6497_v5  ;;  %3885 = vmatpush1.bf16.msra.mxu1 %v6494_v45  ;;  %v6578_v45 = vld [vmem:[#allocation4 + $0x5f0] ss:$20 sps:$4 sm:$0xff]   ;;  %v6581_v5 = vld [vmem:[#allocation4 + $0x5f8] ss:$20 sps:$4 sm:$0xff]  }
 0x4be   :  { %6026 = vmatprep.subr.bf16.mxu0 %v6716_v15  ;;  %3886 = vmatprep.subr.bf16.mxu1 %v6500_v18  ;;  %v6586_v18 = vld [vmem:[#allocation4 + $0x61c] ss:$20 sps:$4 sm:$0xff]  }
 0x4c1   :  { %6027 = vmatpush3.bf16.msra.mxu0 %v6501_v51  ;;  %3887 = vmatpush1.bf16.msra.mxu1 %v6498_v14  ;;  %v6589_v14 = vld [vmem:[#allocation4 + $0x624] ss:$20 sps:$4 sm:$0xff]  }
 0x4c2   :  { %6028 = vmatprep.subr.bf16.mxu0 %v6716_v15  ;;  %3888 = vmatprep.subr.bf16.mxu1 %v6504_v11  ;;  %v6584_v51 = vld [vmem:[#allocation4 + $0x618] ss:$20 sps:$4 sm:$0xff]   ;;  %v6587_v11 = vld [vmem:[#allocation4 + $0x620] ss:$20 sps:$4 sm:$0xff]  }
 0x4c5   :  { %6029 = vmatpush3.bf16.msra.mxu0 %v6505_v25  ;;  %3889 = vmatpush1.bf16.msra.mxu1 %v6502_v24  ;;  %v6590_v24 = vld [vmem:[#allocation4 + $0x510] ss:$20 sps:$4 sm:$0xff]   ;;  %v2477_v25 = vpack.c.bf16 %v7406_v4, %v7406_v4 }
 0x4c6   :  { %6030 = vmatprep.subr.bf16.mxu0 %v6716_v15  ;;  %3890 = vmatprep.subr.bf16.mxu1 %v6508_v26  ;;  %v6591_v26 = vld [vmem:[#allocation4 + $0x538] ss:$20 sps:$4 sm:$0xff]   ;;  %v6594_v4 = vld [vmem:[#allocation4 + $0x5b0] ss:$20 sps:$4 sm:$0xff]  }
 0x4c9   :  { %6031 = vmatpush3.bf16.msra.mxu0 %v6509_v1  ;;  %3891 = vmatpush1.bf16.msra.mxu1 %v6506_v29  ;;  %v6592_v29 = vld [vmem:[#allocation4 + $0x560] ss:$20 sps:$4 sm:$0xff]   ;;  %v6593_v1 = vld [vmem:[#allocation4 + $0x588] ss:$20 sps:$4 sm:$0xff]  }
 0x4ca   :  { %3917 = vmatprep.subr.bf16.mxu0 %v6512_v7  ;;  %6036 = vmatprep.subr.bf16.mxu1 %v6716_v15  ;;  %v6595_v7 = vld [vmem:[#allocation4 + $0x5d8] ss:$20 sps:$4 sm:$0xff]  }
 0x4cc   :  { %6033 = vmatmul.mubr.bf16.vlgmr.msra.gmra.mrb[56].mxu0 %v7433_v39  ;;  %3909 = vmatmul.mubr.bf16.vlgmr.msra.gmra.mrb[96].mxu1 %v7450_v28  ;;  %v6560_v39 = vld [vmem:[#allocation4 + $0x578] ss:$20 sps:$4 sm:$0xff]  }
 0x4cd   :  { %3918 = vmatpush1.bf16.msra.mxu0 %v6510_v19  ;;  %6037 = vmatpush3.bf16.msra.mxu1 %v6513_v27 }
 0x4ce   :  { %3919 = vmatprep.subr.bf16.mxu0 %v6516_v36  ;;  %6038 = vmatprep.subr.bf16.mxu1 %v6716_v15 }
 0x4cf   :  { %3949 = vmatprep.mubr.bf16.mxu0 %v6715_v32  ;;  %6052 = vmatprep.mubr.msk.bf16.mxu1 %vm6717_vm10, %v6716_v15 }
 0x4d1   :  { %3920 = vmatpush1.bf16.msra.mxu0 %v6514_v31  ;;  %6039 = vmatpush3.bf16.msra.mxu1 %v6517_v37 }
 0x4d2   :  { %3921 = vmatprep.subr.bf16.mxu0 %v6520_v40  ;;  %6040 = vmatprep.subr.bf16.mxu1 %v6716_v15  ;;  %v6596_v40 = vld [vmem:[#allocation4 + $0x600] ss:$20 sps:$4 sm:$0xff]  }
 0x4d5   :  { %3922 = vmatpush1.bf16.msra.mxu0 %v6518_v53  ;;  %6041 = vmatpush3.bf16.msra.mxu1 %v6521_v34 }
 0x4d6   :  { %3923 = vmatprep.subr.bf16.mxu0 %v6524_v43  ;;  %6042 = vmatprep.subr.bf16.mxu1 %v6716_v15  ;;  %v6597_v43 = vld [vmem:[#allocation4 + $0x628] ss:$20 sps:$4 sm:$0xff]  }
 0x4d9   :  { %3924 = vmatpush1.bf16.msra.mxu0 %v6522_v44  ;;  %6043 = vmatpush3.bf16.msra.mxu1 %v6525_v23 }
 0x4da   :  { %3925 = vmatprep.subr.bf16.mxu0 %v6528_v46  ;;  %6044 = vmatprep.subr.bf16.mxu1 %v6716_v15 }
 0x4dd   :  { %3926 = vmatpush1.bf16.msra.mxu0 %v6526_v47  ;;  %6045 = vmatpush3.bf16.msra.mxu1 %v6529_v48 }
 0x4de   :  { %3927 = vmatprep.subr.bf16.mxu0 %v6532_v49  ;;  %6046 = vmatprep.subr.bf16.mxu1 %v6716_v15 }
 0x4e1   :  { %3928 = vmatpush1.bf16.msra.mxu0 %v6530_v50  ;;  %6047 = vmatpush3.bf16.msra.mxu1 %v6533_v52 }
 0x4e2   :  { %3929 = vmatprep.subr.bf16.mxu0 %v6536_v54  ;;  %6048 = vmatprep.subr.bf16.mxu1 %v6716_v15 }
 0x4e5   :  { %3930 = vmatpush1.bf16.msra.mxu0 %v6534_v55  ;;  %6049 = vmatpush3.bf16.msra.mxu1 %v6537_v57  ;;  %v6598_v57 = vld [vmem:[#allocation6 + $0x40] sm:$0xff]  }
 0x4e6   :  { %3931 = vmatprep.subr.bf16.mxu0 %v6540_v58  ;;  %6050 = vmatprep.subr.bf16.mxu1 %v6716_v15  ;;  %v6599_v58 = vld [vmem:[#allocation6] sm:$0xff]  }
 0x4e9   :  { %3932 = vmatpush1.bf16.msra.mxu0 %v6538_v59  ;;  %6051 = vmatpush3.bf16.msra.mxu1 %v6541_v60  ;;  %v6600_v59 = vld [vmem:[#allocation6 + $0xc0] sm:$0xff]  }
 0x4ea   :  { %4260 = vmatprep.subr.bf16.mxu0 %v6544_v62  ;;  %4301 = vmatprep.subr.bf16.mxu1 %v6547_v33  ;;  %v6601_v60 = vld [vmem:[#allocation6 + $0x80] sm:$0xff]   ;;  %v6602_v62 = vld [vmem:[#allocation6 + $0x48] sm:$0xff]  }
 0x4eb   :  { %v6604_v33 = vld [vmem:[#allocation6 + $0xc8] sm:$0xff]  }
 0x4ec   :  { %3950 = vmatmul.mubr.bf16.vlgmr.msra.gmra.mrb[60].mxu0 %v7450_v28  ;;  %6053 = vmatmul.mubr.bf16.vlgmr.msra.gmra.mrb[100].mxu1 %v7450_v28 }
 0x4ed   :  { %4261 = vmatpush1.bf16.msra.mxu0 %v6542_v63  ;;  %4302 = vmatpush1.bf16.msra.mxu1 %v6545_v0  ;;  %v6603_v63 = vld [vmem:[#allocation6 + $0x8] sm:$0xff]  }
 0x4ee   :  { %4262 = vmatprep.subr.bf16.mxu0 %v6550_v2  ;;  %4303 = vmatprep.subr.bf16.mxu1 %v6553_v38  ;;  %v6605_v0 = vld [vmem:[#allocation6 + $0x88] sm:$0xff]   ;;  %v6606_v2 = vld [vmem:[#allocation6 + $0x50] sm:$0xff]  }
 0x4ef   :  { %4292 = vmatprep.mubr.bf16.mxu0 %v6715_v32  ;;  %4333 = vmatprep.mubr.bf16.mxu1 %v6715_v32  ;;  %v6569_v32 = vld [vmem:[#allocation4 + $0x5a8] ss:$20 sps:$4 sm:$0xff]   ;;  %v6608_v38 = vld [vmem:[#allocation6 + $0xd0] sm:$0xff]  }
 0x4f1   :  { %4263 = vmatpush1.bf16.msra.mxu0 %v6548_v3  ;;  %4304 = vmatpush1.bf16.msra.mxu1 %v6551_v35  ;;  %v6607_v3 = vld [vmem:[#allocation6 + $0x10] sm:$0xff]  }
 0x4f2   :  { %4264 = vmatprep.subr.bf16.mxu0 %v6556_v6  ;;  %4305 = vmatprep.subr.bf16.mxu1 %v6559_v22  ;;  %v6609_v35 = vld [vmem:[#allocation6 + $0x90] sm:$0xff]   ;;  %v6610_v6 = vld [vmem:[#allocation6 + $0x58] sm:$0xff]  }
 0x4f3   :  { %v6612_v22 = vld [vmem:[#allocation6 + $0xd8] sm:$0xff]  }
 0x4f5   :  { %4265 = vmatpush1.bf16.msra.mxu0 %v6554_v42  ;;  %4306 = vmatpush1.bf16.msra.mxu1 %v6557_v8  ;;  %v6611_v42 = vld [vmem:[#allocation6 + $0x18] sm:$0xff]  }
 0x4f6   :  { %4266 = vmatprep.subr.bf16.mxu0 %v6562_v56  ;;  %4307 = vmatprep.subr.bf16.mxu1 %v6565_v9  ;;  %v6613_v8 = vld [vmem:[#allocation6 + $0x98] sm:$0xff]   ;;  %v6614_v56 = vld [vmem:[#allocation6 + $0x60] sm:$0xff]  }
 0x4f7   :  { %v6616_v9 = vld [vmem:[#allocation6 + $0xe0] sm:$0xff]  }
 0x4f9   :  { %4267 = vmatpush1.bf16.msra.mxu0 %v6560_v39  ;;  %4308 = vmatpush1.bf16.msra.mxu1 %v6563_v10  ;;  %v6615_v39 = vld [vmem:[#allocation6 + $0x20] sm:$0xff]  }
 0x4fa   :  { %4268 = vmatprep.subr.bf16.mxu0 %v6568_v12  ;;  %4309 = vmatprep.subr.bf16.mxu1 %v6571_v13  ;;  %v6617_v10 = vld [vmem:[#allocation6 + $0xa0] sm:$0xff]   ;;  %v6618_v12 = vld [vmem:[#allocation6 + $0x68] sm:$0xff]  }
 0x4fb   :  { %v6619_v13 = vld [vmem:[#allocation6 + $0x28] sm:$0xff]  }
 0x4fd   :  { %4269 = vmatpush1.bf16.msra.mxu0 %v6566_v41  ;;  %4310 = vmatpush1.bf16.msra.mxu1 %v6569_v32  ;;  %v6620_v41 = vld [vmem:[#allocation6 + $0xe8] sm:$0xff]  }
 0x4fe   :  { %4270 = vmatprep.subr.bf16.mxu0 %v6574_v30  ;;  %4311 = vmatprep.subr.bf16.mxu1 %v6577_v16  ;;  %v6621_v32 = vld [vmem:[#allocation6 + $0xa8] sm:$0xff]  }
 0x501   :  { %4271 = vmatpush1.bf16.msra.mxu0 %v6572_v21  ;;  %4312 = vmatpush1.bf16.msra.mxu1 %v6575_v61 }
 0x502   :  { %4272 = vmatprep.subr.bf16.mxu0 %v6580_v17  ;;  %4313 = vmatprep.subr.bf16.mxu1 %v6583_v20 }
 0x505   :  { %4273 = vmatpush1.bf16.msra.mxu0 %v6578_v45  ;;  %4314 = vmatpush1.bf16.msra.mxu1 %v6581_v5  ;;  %v6622_v45 = vld [vmem:[#allocation6 + $0x70] sm:$0xff]  }
 0x506   :  { %4274 = vmatprep.subr.bf16.mxu0 %v6586_v18  ;;  %4315 = vmatprep.subr.bf16.mxu1 %v6589_v14 }
 0x509   :  { %4275 = vmatpush1.bf16.msra.mxu0 %v6584_v51  ;;  %4316 = vmatpush1.bf16.msra.mxu1 %v6587_v11  ;;  %v6623_v51 = vld [vmem:[#allocation6 + $0x30] sm:$0xff]  }
 0x50a   :  { %6056 = vmatprep.subr.bf16.mxu0 %v6716_v15  ;;  %5581 = vmatprep.subr.bf16.mxu1 %v6598_v57  ;;  %v6624_v11 = vld [vmem:[#allocation6 + $0xf0] sm:$0xff]  }
 0x50c   :  { %4293 = vmatmul.mubr.bf16.vlgmr.msra.gmra.mrb[64].mxu0 %v2477_v25  ;;  %4334 = vmatmul.mubr.bf16.vlgmr.msra.gmra.mrb[104].mxu1 %v2477_v25 }
 0x50d   :  { %6057 = vmatpush3.bf16.msra.mxu0 %v6590_v24  ;;  %6072 = vmatprep.mubr.msk.bf16.mxu0 %vm6717_vm10, %v6716_v15 }
 0x50e   :  { %6058 = vmatprep.subr.bf16.mxu0 %v6716_v15  ;;  %5582 = vmatpush3.bf16.msra.mxu1 %v6599_v58 }
 0x50f   :  { %5583 = vmatprep.subr.bf16.mxu1 %v6602_v62 }
 0x511   :  { %6059 = vmatpush3.bf16.msra.mxu0 %v6591_v26  ;;  %v6625_v26 = vld [vmem:[#allocation6 + $0xb0] sm:$0xff]  }
 0x512   :  { %6060 = vmatprep.subr.bf16.mxu0 %v6716_v15  ;;  %5584 = vmatpush3.bf16.msra.mxu1 %v6603_v63 }
 0x513   :  { %5585 = vmatprep.subr.bf16.mxu1 %v6606_v2 }
 0x515   :  { %6061 = vmatpush3.bf16.msra.mxu0 %v6592_v29  ;;  %v6626_v29 = vld [vmem:[#allocation6 + $0x78] sm:$0xff]  }
 0x516   :  { %6062 = vmatprep.subr.bf16.mxu0 %v6716_v15  ;;  %5586 = vmatpush3.bf16.msra.mxu1 %v6607_v3 }
 0x517   :  { %5587 = vmatprep.subr.bf16.mxu1 %v6610_v6 }
 0x519   :  { %6063 = vmatpush3.bf16.msra.mxu0 %v6593_v1  ;;  %v6627_v1 = vld [vmem:[#allocation6 + $0x38] sm:$0xff]  }
 0x51a   :  { %6064 = vmatprep.subr.bf16.mxu0 %v6716_v15  ;;  %5588 = vmatpush3.bf16.msra.mxu1 %v6611_v42  ;;  %v4389_v42 = vlaneseq }
 0x51b   :  { %5589 = vmatprep.subr.bf16.mxu1 %v6614_v56 }
 0x51d   :  { %6065 = vmatpush3.bf16.msra.mxu0 %v6594_v4  ;;  %v6628_v4 = vld [vmem:[#allocation6 + $0xf8] sm:$0xff]  }
 0x51e   :  { %6066 = vmatprep.subr.bf16.mxu0 %v6716_v15  ;;  %5590 = vmatpush3.bf16.msra.mxu1 %v6615_v39  ;;  %v4387_v39 = vld [vmem:[%s7530_s8] sm:$0x1f] }
 0x51f   :  { %v2817_v19 = vpop.f32.mrb[40].mxu0  ;;  %v7479_v27 = vpop.f32.mrb[80].mxu1  ;;  %5591 = vmatprep.subr.bf16.mxu1 %v6618_v12 }
 0x520   :  { %v2819_v28 = vpop.f32.mrb[41].mxu0  ;;  %v7481_v36 = vpop.f32.mrb[81].mxu1 }
 0x521   :  { %6067 = vmatpush3.bf16.msra.mxu0 %v6595_v7  ;;  %v2821_v31 = vpop.f32.mrb[42].mxu0  ;;  %v2862_v37 = vpop.f32.mrb[82].mxu1  ;;  %v6629_v7 = vld [vmem:[#allocation6 + $0xb8] sm:$0xff]  }
 0x522   :  { %v2822_v53 = vpop.f32.mrb[43].mxu0  ;;  %v2863_v34 = vpop.f32.mrb[83].mxu1  ;;  %6068 = vmatprep.subr.bf16.mxu0 %v6716_v15  ;;  %5592 = vmatpush3.bf16.msra.mxu1 %v6619_v13 }
 0x523   :  { %5593 = vmatprep.subr.bf16.mxu1 %v6622_v45 }
 0x525   :  { %6069 = vmatpush3.bf16.msra.mxu0 %v6596_v40 }
 0x526   :  { %6070 = vmatprep.subr.bf16.mxu0 %v6716_v15  ;;  %5594 = vmatpush3.bf16.msra.mxu1 %v6623_v51 }
 0x527   :  { %5595 = vmatprep.subr.bf16.mxu1 %v6626_v29 }
 0x529   :  { %6071 = vmatpush3.bf16.msra.mxu0 %v6597_v43 }
 0x52a   :  { %5603 = vmatprep.subr.bf16.mxu0 %v6600_v59  ;;  %5596 = vmatpush3.bf16.msra.mxu1 %v6627_v1 }
 0x52b   :  { %6076 = vmatprep.subr.bf16.mxu1 %v6716_v15 }
 0x52c   :  { %6073 = vmatmul.mubr.bf16.vlgmr.msra.gmra.mrb[68].mxu0 %v2477_v25 }
 0x52d   :  { %5604 = vmatpush3.bf16.msra.mxu0 %v6601_v60 }
 0x52e   :  { %5605 = vmatprep.subr.bf16.mxu0 %v6604_v33 }
 0x531   :  { %5606 = vmatpush3.bf16.msra.mxu0 %v6605_v0 }
 0x532   :  { %5607 = vmatprep.subr.bf16.mxu0 %v6608_v38 }
 0x535   :  { %5608 = vmatpush3.bf16.msra.mxu0 %v6609_v35 }
 0x536   :  { %5609 = vmatprep.subr.bf16.mxu0 %v6612_v22 }
 0x539   :  { %5610 = vmatpush3.bf16.msra.mxu0 %v6613_v8  ;;  %v7496_v8 = vshrl.u32 %v4389_v42, 7 }
 0x53a   :  { %5611 = vmatprep.subr.bf16.mxu0 %v6616_v9 }
 0x53b   :  { %v4391_v56 = vsub.s32 0, %v7496_v8  ;;  %v4399_v9 = vsub.s32 2, %v7496_v8  ;;  %v4403_v12 = vsub.s32 3, %v7496_v8 }
 0x53d   :  { %5612 = vmatpush3.bf16.msra.mxu0 %v6617_v10  ;;  %v4395_v10 = vsub.s32 1, %v7496_v8  ;;  %v4392_v13 = vrot.slane %v4387_v39, %v4391_v56 }
 0x53e   :  { %5613 = vmatprep.subr.bf16.mxu0 %v6620_v41  ;;  %v4400_v41 = vrot.slane %v4387_v39, %v4399_v9 }
 0x53f   :  { %v2899_v44 = vpop.f32.mrb[44].mxu0  ;;  %v3147_v23 = vpop.f32.mrb[84].mxu1 }
 0x540   :  { %v7485_v46 = vadd.f32 %v3147_v23, %v2817_v19  ;;  %v5994_v47 = vpop.f32.mrb[45].mxu0  ;;  %v3149_v48 = vpop.f32.mrb[85].mxu1 }
 0x541   :  { %v7487_v49 = vadd.f32 %v3149_v48, %v2819_v28  ;;  %v2902_v50 = vpop.f32.mrb[46].mxu0  ;;  %v3151_v52 = vpop.f32.mrb[86].mxu1  ;;  %5614 = vmatpush3.bf16.msra.mxu0 %v6621_v32 }
 0x542   :  { %v5995_v54 = vpop.f32.mrb[47].mxu0  ;;  %v3152_v55 = vpop.f32.mrb[87].mxu1  ;;  %5615 = vmatprep.subr.bf16.mxu0 %v6624_v11 }
 0x545   :  { %5616 = vmatpush3.bf16.msra.mxu0 %v6625_v26 }
 0x546   :  { %5617 = vmatprep.subr.bf16.mxu0 %v6628_v4 }
 0x549   :  { %5618 = vmatpush3.bf16.msra.mxu0 %v6629_v7 }
 0x55f   :  { %v3188_v30 = vpop.f32.mrb[48].mxu0  ;;  %v3229_v16 = vpop.f32.mrb[88].mxu1 }
 0x560   :  { %v3189_v21 = vadd.f32 %v3188_v30, %v7479_v27  ;;  %v3230_v61 = vadd.f32 %v3229_v16, %v2899_v44  ;;  %v3190_v17 = vpop.f32.mrb[49].mxu0  ;;  %v6014_v20 = vpop.f32.mrb[89].mxu1  ;;  %v4396_v16 = vrot.slane %v4387_v39, %v4395_v10 }
 0x561   :  { %v3191_v5 = vadd.f32 %v3190_v17, %v7481_v36  ;;  %v3192_v18 = vpop.f32.mrb[50].mxu0  ;;  %v3232_v14 = vpop.f32.mrb[90].mxu1 }
 0x562   :  { %v3193_v24 = vpop.f32.mrb[51].mxu0  ;;  %v6015_v25 = vpop.f32.mrb[91].mxu1 }
 0x57f   :  { %v3526_v19 = vpop.f32.mrb[52].mxu0  ;;  %v3567_v27 = vpop.f32.mrb[92].mxu1 }
 0x580   :  { %v3614_v28 = vadd.f32 %v3526_v19, %v7485_v46  ;;  %v3616_v36 = vadd.f32 %v3567_v27, %v3189_v21  ;;  %v3528_v31 = vpop.f32.mrb[53].mxu0  ;;  %v3569_v37 = vpop.f32.mrb[93].mxu1  ;;  %v4404_v21 = vrot.slane %v4387_v39, %v4403_v12 }
 0x581   :  { %v3615_v40 = vadd.f32 %v3528_v31, %v7487_v49  ;;  %v3617_v53 = vadd.f32 %v3569_v37, %v3191_v5  ;;  %v3530_v34 = vpop.f32.mrb[54].mxu0  ;;  %v3571_v43 = vpop.f32.mrb[94].mxu1 }
 0x582   :  { %v3531_v44 = vpop.f32.mrb[55].mxu0  ;;  %v3572_v23 = vpop.f32.mrb[95].mxu1  ;;  %v6630_v34 = vld [vmem:[#allocation6 + $0x100] sm:$0xff]  }
 0x583   :  { %v6631_v23 = vld [vmem:[#allocation6 + $0x108] sm:$0xff]  }
 0x59f   :  { %v3608_v47 = vpop.f32.mrb[56].mxu0  ;;  %v3910_v48 = vpop.f32.mrb[96].mxu1 }
 0x5a0   :  { %v3618_v50 = vadd.f32 %v3608_v47, %v3230_v61  ;;  %v3998_v52 = vadd.f32 %v3910_v48, %v3614_v28  ;;  %v6034_v54 = vpop.f32.mrb[57].mxu0  ;;  %v3912_v55 = vpop.f32.mrb[97].mxu1  ;;  %v6632_v47 = vld [vmem:[#allocation6 + $0x110] sm:$0xff]   ;;  %v6633_v48 = vld [vmem:[#allocation6 + $0x118] sm:$0xff]  }
 0x5a1   :  { %v3999_v57 = vadd.f32 %v3912_v55, %v3615_v40  ;;  %v3611_v58 = vpop.f32.mrb[58].mxu0  ;;  %v3914_v59 = vpop.f32.mrb[98].mxu1  ;;  %v6635_v54 = vld [vmem:[#allocation6 + $0x128] sm:$0xff]  }
 0x5a2   :  { %v6035_v46 = vpop.f32.mrb[59].mxu0  ;;  %v3915_v60 = vpop.f32.mrb[99].mxu1 }
 0x5a3   :  { %v6636_v46 = vld [vmem:[#allocation6 + $0x130] sm:$0xff]  }
 0x5bf   :  { %v3951_v62 = vpop.f32.mrb[60].mxu0  ;;  %v3992_v33 = vpop.f32.mrb[100].mxu1 }
 0x5c0   :  { %v4000_v63 = vadd.f32 %v3951_v62, %v3616_v36  ;;  %v7494_v49 = vadd.f32 %v3992_v33, %v3618_v50  ;;  %v3953_v0 = vpop.f32.mrb[61].mxu0  ;;  %v6054_v2 = vpop.f32.mrb[101].mxu1  ;;  %v6634_v50 = vld [vmem:[#allocation6 + $0x120] sm:$0xff]  }
 0x5c1   :  { %v4001_v38 = vadd.f32 %v3953_v0, %v3617_v53  ;;  %v3955_v3 = vpop.f32.mrb[62].mxu0  ;;  %v3995_v35 = vpop.f32.mrb[102].mxu1  ;;  %v6637_v0 = vld [vmem:[#allocation6 + $0x138] sm:$0xff]  }
 0x5c2   :  { %v3956_v6 = vpop.f32.mrb[63].mxu0  ;;  %v6055_v22 = vpop.f32.mrb[103].mxu1  ;;  %v5311_v35 = vld [vmem:[%s7532_s10] ss:$0 sm:$0xff] }
 0x5df   :  { %v4294_v32 = vpop.f32.mrb[64].mxu0  ;;  %v4335_v30 = vpop.f32.mrb[104].mxu1 }
 0x5e0   :  { %v4382_v61 = vadd.f32 %v4294_v32, %v3998_v52  ;;  %v4384_v17 = vadd.f32 %v4335_v30, %v4000_v63  ;;  %v4296_v20 = vpop.f32.mrb[65].mxu0  ;;  %v4337_v45 = vpop.f32.mrb[105].mxu1  ;;  %v4407_v52 = vsub.s32 4, %v7496_v8 }
 0x5e1   :  { %v4383_v5 = vadd.f32 %v4296_v20, %v3999_v57  ;;  %v4385_v18 = vadd.f32 %v4337_v45, %v4001_v38  ;;  %v4298_v14 = vpop.f32.mrb[66].mxu0  ;;  %v4339_v51 = vpop.f32.mrb[106].mxu1 }
 0x5e2   :  { %v4414_v11 = vadd.f32 %v4392_v13, %v4382_v61  ;;  %v4416_v24 = vadd.f32 %v4400_v41, %v4384_v17  ;;  %v4299_v25 = vpop.f32.mrb[67].mxu0  ;;  %v4340_v26 = vpop.f32.mrb[107].mxu1  ;;  %v4408_v55 = vrot.slane %v4387_v39, %v4407_v52 }
 0x5e3   :  { %v4415_v29 = vadd.f32 %v4396_v16, %v4383_v5  ;;  %v4417_v1 = vadd.f32 %v4404_v21, %v4385_v18 }
 0x5e4   :  { %vm4419_vm11 = vcmp.ge.f32.partialorder %v4414_v11, 0.0  ;;  %v4424_v4 = vmul.f32 0.01, %v4414_v11  ;;  %vm4421_vm12 = vcmp.ge.f32.partialorder %v4416_v24, 0.0  ;;  %v4426_v7 = vmul.f32 0.01, %v4416_v24 }
 0x5e5   :  { %v4425_v19 = vmul.f32 0.01, %v4415_v29  ;;  %v4427_v27 = vmul.f32 0.01, %v4417_v1  ;;  %vm4420_vm13 = vcmp.ge.f32.partialorder %v4415_v29, 0.0  ;;  %vm4422_vm14 = vcmp.ge.f32.partialorder %v4417_v1, 0.0 }
 0x5e6   :  { %v4429_v28 = vsel %vm4419_vm11, %v4414_v11, %v4424_v4  ;;  %v4431_v36 = vsel %vm4421_vm12, %v4416_v24, %v4426_v7 }
 0x5e7   :  { %v4430_v31 = vsel %vm4420_vm13, %v4415_v29, %v4425_v19  ;;  %v4432_v37 = vsel %vm4422_vm14, %v4417_v1, %v4427_v27  ;;  %v4434_v43 = vpack.c.bf16 %v4429_v28, %v4429_v28  ;;  %v4436_v44 = vpack.c.bf16 %v4431_v36, %v4431_v36 }
 0x5e8   :  { %v4435_v40 = vpack.c.bf16 %v4430_v31, %v4430_v31  ;;  %v4437_v53 = vpack.c.bf16 %v4432_v37, %v4432_v37 }
 0x5ea   :  { %4798 = vmatprep.mubr.bf16.mxu1 %v4435_v40  ;;  %4838 = vmatprep.mubr.bf16.mxu0 %v4437_v53 }
 0x5eb   :  { %4799 = vmatmul.mubr.bf16.vlgmr.msra.gmra.mrb[108].mxu1 %v4434_v43  ;;  %4839 = vmatmul.mubr.bf16.vlgmr.msra.gmra.mrb[72].mxu0 %v4436_v44 }
 0x5ec   :  { %6077 = vmatpush3.bf16.msra.mxu1 %v6630_v34  ;;  %6092 = vmatprep.mubr.msk.bf16.mxu1 %vm6717_vm10, %v6716_v15 }
 0x5ed   :  { %6078 = vmatprep.subr.bf16.mxu1 %v6716_v15 }
 0x5f0   :  { %6079 = vmatpush3.bf16.msra.mxu1 %v6631_v23 }
 0x5f1   :  { %6080 = vmatprep.subr.bf16.mxu1 %v6716_v15 }
 0x5f4   :  { %6081 = vmatpush3.bf16.msra.mxu1 %v6632_v47 }
 0x5f5   :  { %6082 = vmatprep.subr.bf16.mxu1 %v6716_v15 }
 0x5f8   :  { %6083 = vmatpush3.bf16.msra.mxu1 %v6633_v48 }
 0x5f9   :  { %6084 = vmatprep.subr.bf16.mxu1 %v6716_v15 }
 0x5fc   :  { %6085 = vmatpush3.bf16.msra.mxu1 %v6634_v50 }
 0x5fd   :  { %6086 = vmatprep.subr.bf16.mxu1 %v6716_v15 }
 0x5ff   :  { %v4376_v57 = vpop.f32.mrb[68].mxu0 }
 0x600   :  { %v4386_v58 = vadd.f32 %v4376_v57, %v7494_v49  ;;  %6087 = vmatpush3.bf16.msra.mxu1 %v6635_v54  ;;  %v6074_v59 = vpop.f32.mrb[69].mxu0 }
 0x601   :  { %v4379_v60 = vpop.f32.mrb[70].mxu0  ;;  %6088 = vmatprep.subr.bf16.mxu1 %v6716_v15 }
 0x602   :  { %v4418_v62 = vadd.f32 %v4408_v55, %v4386_v58  ;;  %v6075_v33 = vpop.f32.mrb[71].mxu0 }
 0x604   :  { %vm4423_vm10 = vcmp.ge.f32.partialorder %v4418_v62, 0.0  ;;  %v4428_v63 = vmul.f32 0.01, %v4418_v62  ;;  %6089 = vmatpush3.bf16.msra.mxu1 %v6636_v46 }
 0x605   :  { %6090 = vmatprep.subr.bf16.mxu1 %v6716_v15 }
 0x606   :  { %v4433_v2 = vsel %vm4423_vm10, %v4418_v62, %v4428_v63 }
 0x607   :  { %v4438_v38 = vpack.c.bf16 %v4433_v2, %v4433_v2 }
 0x608   :  { %6091 = vmatpush3.bf16.msra.mxu1 %v6637_v0 }
 0x60b   :  { %6093 = vmatmul.mubr.bf16.vlgmr.msra.gmra.mrb[112].mxu1 %v4438_v38 }
 0x6be   :  { %v5597_v3 = vpop.f32.mrb[108].mxu1  ;;  %v5619_v49 = vpop.f32.mrb[72].mxu0 }
 0x6bf   :  { %v5598_v6 = vpop.f32.mrb[109].mxu1  ;;  %v5620_v22 = vpop.f32.mrb[73].mxu0 }
 0x6c0   :  { %v5599_v42 = vadd.f32 %v5598_v6, %v5597_v3  ;;  %v5621_v8 = vadd.f32 %v5620_v22, %v5619_v49  ;;  %v5600_v56 = vpop.f32.mrb[110].mxu1  ;;  %v5622_v9 = vpop.f32.mrb[74].mxu0 }
 0x6c1   :  { %v5601_v39 = vpop.f32.mrb[111].mxu1  ;;  %v5623_v10 = vpop.f32.mrb[75].mxu0 }
 0x6c2   :  { %v4801_v12 = vadd.f32 %v5599_v42, %v5311_v35 }
 0x6c4   :  { %v4841_v15 = vadd.f32 %v5621_v8, %v4801_v12 }
 0x6de   :  { %v4880_v13 = vpop.f32.mrb[112].mxu1 }
 0x6df   :  { %v4881_v41 = vadd.f32 %v4880_v13, %v4841_v15  ;;  %v6094_v32 = vpop.f32.mrb[113].mxu1 }
 0x6e0   :  { %v4883_v30 = vpop.f32.mrb[114].mxu1 }
 0x6e1   :  { %4886 = vst [vmem:[%s7533_s11] sm:$0xff] %v4881_v41  ;;  %v6095_v16 = vpop.f32.mrb[115].mxu1 }
 0x6e2   :  { %4891 = vsyncpa [#allocation3], 1 }
 0x6e3   :  { %4892 = vsyncpa [#allocation5], 1 }

</bundles_post_ra>
